<compile_context>
chip_gen: v7x
topology: tpu7x:2x2x1
jax: 0.10.0
libtpu: 0.0.40
codegen_flags: <defaults>
</compile_context>

<pallas_src>
import functools
import math

import jax
import jax.numpy as jnp
from jax.experimental import pallas as pl
from jax.experimental.pallas import tpu as pltpu

VMEM = pl.BlockSpec(memory_space=pltpu.MemorySpace.VMEM)
_LN_EPS = 1e-5          # PyTorch layer_norm_eps default
_NEG_INF = -1e30


def _layernorm(x, g, b, eps=_LN_EPS):
    mu = jnp.mean(x, axis=-1, keepdims=True)
    xc = x - mu
    var = jnp.mean(xc * xc, axis=-1, keepdims=True)
    return xc * jax.lax.rsqrt(var + eps) * g + b


# ---------------------------- MusicEncoder kernel ----------------------------

def _music_kernel(x_ref, w1_ref, b1_ref, w2_ref, b2_ref, o_ref):
    # Linear(128->256) + ReLU + Linear(256->128), hidden kept in VMEM.
    h = jnp.dot(x_ref[...].astype(jnp.bfloat16), w1_ref[...],
                preferred_element_type=jnp.float32) + b1_ref[...]
    h = jnp.maximum(h, 0.0)
    y = jnp.dot(h.astype(jnp.bfloat16), w2_ref[...],
                preferred_element_type=jnp.float32) + b2_ref[...]
    o_ref[...] = y.astype(o_ref.dtype)


def music_encoder(mp, audio):
    B, T, C = audio.shape
    x = audio.reshape(B * T, C)
    out = pl.pallas_call(
        _music_kernel,
        out_shape=jax.ShapeDtypeStruct((B * T, mp["w2"].shape[1]), jnp.float32),
        in_specs=[VMEM] * 5,
        out_specs=VMEM,
    )(x, mp["w1"], mp["b1"], mp["w2"], mp["b2"])
    return out.reshape(B, T, -1)


# --------------------- LightingEncoder fused kernel --------------------------

def _lighting_kernel(cue_ref, emb_w_ref, emb_b_ref, bias_ref,
                     in_w_ref, in_b_ref, out_w_ref, out_b_ref,
                     ln1_g_ref, ln1_b_ref,
                     ff1_w_ref, ff1_b_ref, ff2_w_ref, ff2_b_ref,
                     ln2_g_ref, ln2_b_ref,
                     o_ref, x_ref, *, num_heads):
    layer = pl.program_id(0)
    num_layers = pl.num_programs(0)

    @pl.when(layer == 0)
    def _():
        # Embedding (K padded to 8) folded into the first grid step.
        x_ref[...] = (jnp.dot(cue_ref[...], emb_w_ref[...],
                              preferred_element_type=jnp.float32)
                      + emb_b_ref[...])

    x = x_ref[...]                               # [M, E] fp32, VMEM-resident
    M, E = x.shape
    H = num_heads
    D = E // H
    scale = 1.0 / math.sqrt(D)

    # ---- self-attention: fused QKV projection (bf16 MXU, fp32 accumulate) ----
    qkv = (jnp.dot(x.astype(jnp.bfloat16), in_w_ref[...],
                   preferred_element_type=jnp.float32) + in_b_ref[...])
    q = qkv[:, 0:E] * scale
    k = qkv[:, E:2 * E]
    v = qkv[:, 2 * E:3 * E]

    lane = jax.lax.broadcasted_iota(jnp.int32, (1, E), 1)
    attn = jnp.zeros((M, E), jnp.float32)
    for h in range(H):                           # static unroll over heads
        qh = q[:, h * D:(h + 1) * D]
        kh = k[:, h * D:(h + 1) * D]
        s = jax.lax.dot_general(qh, kh, (((1,), (1,)), ((), ())),
                                preferred_element_type=jnp.float32)
        s = s + bias_ref[...]                    # mask cross-"batch" pairs
        s = s - jnp.max(s, axis=-1, keepdims=True)
        p = jnp.exp(s)
        p = p * pl.reciprocal(jnp.sum(p, axis=-1, keepdims=True), approx=True)
        # Place head h's output directly in lanes [h*D, (h+1)*D): p @ (v*mask).
        v_h = jnp.where((lane >= h * D) & (lane < (h + 1) * D), v, 0.0)
        attn = attn + jnp.dot(p, v_h, preferred_element_type=jnp.float32)

    attn = (jnp.dot(attn.astype(jnp.bfloat16), out_w_ref[...],
                    preferred_element_type=jnp.float32) + out_b_ref[...])

    h1 = _layernorm(x + attn, ln1_g_ref[...], ln1_b_ref[...])

    # ---- feed-forward 128 -> 2048 -> 128 ----
    ff = (jnp.dot(h1.astype(jnp.bfloat16), ff1_w_ref[...],
                  preferred_element_type=jnp.float32) + ff1_b_ref[...])
    ff = jnp.maximum(ff, 0.0)
    ff = (jnp.dot(ff.astype(jnp.bfloat16), ff2_w_ref[...],
                  preferred_element_type=jnp.float32) + ff2_b_ref[...])

    out = _layernorm(h1 + ff, ln2_g_ref[...], ln2_b_ref[...])
    x_ref[...] = out     # carried to the next layer (stays in VMEM)

    @pl.when(layer == num_layers - 1)
    def _():
        o_ref[...] = out  # single HBM writeback after the last layer


def lighting_encoder(lp, cue, num_heads):
    B, N, C = cue.shape
    M = B * N
    E = lp["embed_w"].shape[1]
    F = lp["ffn_w1"].shape[2]
    L = lp["in_proj_w"].shape[0]

    # Pad the 3-wide embedding K-axis to 8 (zeros -> identical result).
    cue2 = jnp.pad(cue.reshape(M, C).astype(jnp.float32), ((0, 0), (0, 8 - C)))
    emb_w = jnp.pad(lp["embed_w"], ((0, 8 - C), (0, 0)))

    # batch_first=False: rows i, j of the flattened [B*N, E] activation may
    # attend to each other iff i % N == j % N (same "batch" column).
    bid = jnp.arange(M, dtype=jnp.int32) % N
    attn_bias = jnp.where(bid[:, None] == bid[None, :], 0.0,
                          _NEG_INF).astype(jnp.float32)

    spec_c = lambda shape: pl.BlockSpec(shape, lambda l: (0,) * len(shape))
    spec_l = lambda shape: pl.BlockSpec((None,) + shape, lambda l: (l, 0, 0))

    grid_spec = pltpu.PrefetchScalarGridSpec(
        num_scalar_prefetch=0,
        grid=(L,),
        in_specs=[
            spec_c((M, 8)),            # padded cue
            spec_c((8, E)),            # padded embedding weight
            spec_c((1, E)),            # embedding bias
            spec_c((M, M)),            # additive attention mask
            spec_l((E, 3 * E)),        # in_proj_w   (bf16)
            spec_l((1, 3 * E)),        # in_proj_b
            spec_l((E, E)),            # out_proj_w  (bf16)
            spec_l((1, E)),            # out_proj_b
            spec_l((1, E)),            # ln1_g
            spec_l((1, E)),            # ln1_b
            spec_l((E, F)),            # ffn_w1      (bf16)
            spec_l((1, F)),            # ffn_b1
            spec_l((F, E)),            # ffn_w2      (bf16)
            spec_l((1, E)),            # ffn_b2
            spec_l((1, E)),            # ln2_g
            spec_l((1, E)),            # ln2_b
        ],
        out_specs=pl.BlockSpec((M, E), lambda l: (0, 0)),
        scratch_shapes=[pltpu.VMEM((M, E), jnp.float32)],
    )
    out = pl.pallas_call(
        functools.partial(_lighting_kernel, num_heads=num_heads),
        out_shape=jax.ShapeDtypeStruct((M, E), jnp.float32),
        grid_spec=grid_spec,
        compiler_params=pltpu.CompilerParams(
            dimension_semantics=("arbitrary",),
            vmem_limit_bytes=64 * 1024 * 1024),
    )(cue2, emb_w, lp["embed_b"], attn_bias,
      lp["in_proj_w"], lp["in_proj_b"], lp["out_proj_w"], lp["out_proj_b"],
      lp["ln1_g"], lp["ln1_b"],
      lp["ffn_w1"], lp["ffn_b1"], lp["ffn_w2"], lp["ffn_b2"],
      lp["ln2_g"], lp["ln2_b"])
    return out.reshape(B, N, E)


@functools.partial(jax.jit, static_argnames=("num_heads",))
def lamp_forward(params, audio_waveform, cue_sequence, num_heads=4):
    music_features = music_encoder(params["music"], audio_waveform)
    if cue_sequence is not None:
        lighting_features = lighting_encoder(params["lighting"], cue_sequence,
                                             num_heads)
    else:
        lighting_features = None
    return music_features, lighting_features


# --------------------------------- params ------------------------------------

def init_params(key, embed_dim=128, num_heads=4, num_layers=4, ffn_dim=2048,
                music_in=128, music_hidden=256, music_out=128):
    kit = iter(jax.random.split(key, 64))

    def w(shape, scale=0.02, dtype=jnp.float32):
        return (scale * jax.random.normal(next(kit), shape)).astype(dtype)

    music = dict(
        w1=w((music_in, music_hidden), dtype=jnp.bfloat16),
        b1=w((1, music_hidden)),
        w2=w((music_hidden, music_out), dtype=jnp.bfloat16),
        b2=w((1, music_out)),
    )
    L, E, F = num_layers, embed_dim, ffn_dim
    lighting = dict(
        embed_w=w((3, E)), embed_b=w((1, E)),
        in_proj_w=w((L, E, 3 * E), dtype=jnp.bfloat16),
        in_proj_b=w((L, 1, 3 * E)),
        out_proj_w=w((L, E, E), dtype=jnp.bfloat16),
        out_proj_b=w((L, 1, E)),
        ln1_g=jnp.ones((L, 1, E), jnp.float32),
        ln1_b=jnp.zeros((L, 1, E), jnp.float32),
        ffn_w1=w((L, E, F), dtype=jnp.bfloat16), ffn_b1=w((L, 1, F)),
        ffn_w2=w((L, F, E), dtype=jnp.bfloat16), ffn_b2=w((L, 1, E)),
        ln2_g=jnp.ones((L, 1, E), jnp.float32),
        ln2_b=jnp.zeros((L, 1, E), jnp.float32),
    )
    return dict(music=music, lighting=lighting)


# ------------------------- pure-JAX reference (check) ------------------------

def _ref_ln(x, g, b, eps=_LN_EPS):
    mu = jnp.mean(x, axis=-1, keepdims=True)
    var = jnp.mean((x - mu) ** 2, axis=-1, keepdims=True)
    return (x - mu) / jnp.sqrt(var + eps) * g + b


def _ref_mm(a, w, b):
    return (jnp.dot(a.astype(jnp.bfloat16), w.astype(jnp.bfloat16),
                    preferred_element_type=jnp.float32) + b)


def ref_forward(params, audio, cue, num_heads):
    mp = params["music"]
    B, T, C = audio.shape
    h = jax.nn.relu(_ref_mm(audio.reshape(B * T, C), mp["w1"], mp["b1"]))
    music = _ref_mm(h, mp["w2"], mp["b2"]).reshape(B, T, -1)

    lp = params["lighting"]
    B, N, C = cue.shape
    E = lp["embed_w"].shape[1]
    H, D = num_heads, E // num_heads
    x = (jnp.dot(cue.reshape(B * N, C), lp["embed_w"],
                 preferred_element_type=jnp.float32) + lp["embed_b"])
    x = x.reshape(B, N, E)                        # [seq=B, batch=N, E]
    for l in range(lp["in_proj_w"].shape[0]):
        S, Bt, _ = x.shape
        x2 = x.reshape(S * Bt, E)
        qkv = _ref_mm(x2, lp["in_proj_w"][l], lp["in_proj_b"][l])
        q, k, v = qkv[:, :E], qkv[:, E:2 * E], qkv[:, 2 * E:]
        heads = lambda t: t.reshape(S, Bt, H, D).transpose(1, 2, 0, 3)
        s = jnp.einsum("bhqd,bhkd->bhqk", heads(q), heads(k)) / math.sqrt(D)
        p = jax.nn.softmax(s, axis=-1)
        a = jnp.einsum("bhqk,bhkd->bhqd", p, heads(v))
        a = a.transpose(2, 0, 1, 3).reshape(S * Bt, E)
        a = _ref_mm(a, lp["out_proj_w"][l], lp["out_proj_b"][l])
        h1 = _ref_ln(x2 + a, lp["ln1_g"][l], lp["ln1_b"][l])
        ff = jax.nn.relu(_ref_mm(h1, lp["ffn_w1"][l], lp["ffn_b1"][l]))
        ff = _ref_mm(ff, lp["ffn_w2"][l], lp["ffn_b2"][l])
        x = _ref_ln(h1 + ff, lp["ln2_g"][l], lp["ln2_b"][l]).reshape(S, Bt, E)
    return music, x


# ----------------------------------- main -------------------------------------

if __name__ == "__main__":
    key = jax.random.PRNGKey(0)
    pk, ak, ck = jax.random.split(key, 3)
    params = init_params(pk)

    B, T, N = 2, 8, 8
    audio_waveform = jax.random.normal(ak, (B, T, 128), dtype=jnp.float32)
    cue_sequence = jax.random.normal(ck, (B, N, 3), dtype=jnp.float32)

    music_feat, light_feat = lamp_forward(params, audio_waveform, cue_sequence,
                                          num_heads=4)
    jax.block_until_ready((music_feat, light_feat))

    assert music_feat.shape == (B, T, 128), music_feat.shape
    assert light_feat.shape == (B, N, 128), light_feat.shape
    assert bool(jnp.all(jnp.isfinite(music_feat)))
    assert bool(jnp.all(jnp.isfinite(light_feat)))

    ref_music, ref_light = ref_forward(params, audio_waveform, cue_sequence, 4)
    m_err = float(jnp.max(jnp.abs(music_feat - ref_music)))
    l_err = float(jnp.max(jnp.abs(light_feat - ref_light)))
    assert m_err < 5e-2 and l_err < 5e-2, (m_err, l_err)

    print("KERNEL_OK")
</pallas_src>

<mosaic_0001>
module attributes {stable_mosaic.version = 11 : i64} {
  func.func @_music_kernel(%arg0: memref<16x128xf32, #tpu.memory_space<vmem>>, %arg1: memref<128x256xbf16, #tpu.memory_space<vmem>>, %arg2: memref<1x256xf32, #tpu.memory_space<vmem>>, %arg3: memref<256x128xbf16, #tpu.memory_space<vmem>>, %arg4: memref<1x128xf32, #tpu.memory_space<vmem>>, %arg5: memref<16x128xf32, #tpu.memory_space<vmem>>) attributes {dimension_semantics = [], scalar_prefetch = 0 : i64, scratch_operands = 0 : i64, tpu.core_type = #tpu.core_type<tc>} {
    %c0 = arith.constant 0 : index
    %c0_0 = arith.constant 0 : index
    %0 = vector.load %arg0[%c0, %c0_0] : memref<16x128xf32, #tpu.memory_space<vmem>>, vector<16x128xf32>
    %1 = arith.truncf %0 : vector<16x128xf32> to vector<16x128xbf16>
    %c0_1 = arith.constant 0 : index
    %c0_2 = arith.constant 0 : index
    %2 = vector.load %arg1[%c0_1, %c0_2] : memref<128x256xbf16, #tpu.memory_space<vmem>>, vector<128x256xbf16>
    %cst = arith.constant dense<0.000000e+00> : vector<16x256xf32>
    %3 = tpu.matmul %1, %2, %cst {dimension_numbers = #tpu.dot_dimension_numbers<[1], [0], [0], [1], [0, 0, 1, 1], [], []>} : vector<16x128xbf16>, vector<128x256xbf16>, vector<16x256xf32> -> vector<16x256xf32>
    %c0_3 = arith.constant 0 : index
    %c0_4 = arith.constant 0 : index
    %4 = vector.load %arg2[%c0_3, %c0_4] : memref<1x256xf32, #tpu.memory_space<vmem>>, vector<1x256xf32>
    %5 = vector.broadcast %4 : vector<1x256xf32> to vector<16x256xf32>
    %6 = arith.addf %3, %5 : vector<16x256xf32>
    %cst_5 = arith.constant 0.000000e+00 : f32
    %7 = vector.broadcast %cst_5 : f32 to vector<16x256xf32>
    %8 = arith.maximumf %6, %7 : vector<16x256xf32>
    %9 = arith.truncf %8 : vector<16x256xf32> to vector<16x256xbf16>
    %c0_6 = arith.constant 0 : index
    %c0_7 = arith.constant 0 : index
    %10 = vector.load %arg3[%c0_6, %c0_7] : memref<256x128xbf16, #tpu.memory_space<vmem>>, vector<256x128xbf16>
    %cst_8 = arith.constant dense<0.000000e+00> : vector<16x128xf32>
    %11 = tpu.matmul %9, %10, %cst_8 {dimension_numbers = #tpu.dot_dimension_numbers<[1], [0], [0], [1], [0, 0, 1, 1], [], []>} : vector<16x256xbf16>, vector<256x128xbf16>, vector<16x128xf32> -> vector<16x128xf32>
    %c0_9 = arith.constant 0 : index
    %c0_10 = arith.constant 0 : index
    %12 = vector.load %arg4[%c0_9, %c0_10] : memref<1x128xf32, #tpu.memory_space<vmem>>, vector<1x128xf32>
    %13 = vector.broadcast %12 : vector<1x128xf32> to vector<16x128xf32>
    %14 = arith.addf %11, %13 : vector<16x128xf32>
    %c0_11 = arith.constant 0 : index
    %c0_12 = arith.constant 0 : index
    %15 = vector.load %arg5[%c0_11, %c0_12] : memref<16x128xf32, #tpu.memory_space<vmem>>, vector<16x128xf32>
    tpu.vector_store %arg5[%c0_11, %c0_12], %14 {strides = array<i32>} : memref<16x128xf32, #tpu.memory_space<vmem>>, vector<16x128xf32>,
    return
  }
}

module attributes {stable_mosaic.version = 11 : i64} {
  func.func @_lighting_kernel(%arg0: i32, %arg1: memref<16x8xf32, #tpu.memory_space<vmem>>, %arg2: memref<8x128xf32, #tpu.memory_space<vmem>>, %arg3: memref<1x128xf32, #tpu.memory_space<vmem>>, %arg4: memref<16x16xf32, #tpu.memory_space<vmem>>, %arg5: memref<1x128x384xbf16, #tpu.memory_space<vmem>>, %arg6: memref<1x1x384xf32, #tpu.memory_space<vmem>>, %arg7: memref<1x128x128xbf16, #tpu.memory_space<vmem>>, %arg8: memref<1x1x128xf32, #tpu.memory_space<vmem>>, %arg9: memref<1x1x128xf32, #tpu.memory_space<vmem>>, %arg10: memref<1x1x128xf32, #tpu.memory_space<vmem>>, %arg11: memref<1x128x2048xbf16, #tpu.memory_space<vmem>>, %arg12: memref<1x1x2048xf32, #tpu.memory_space<vmem>>, %arg13: memref<1x2048x128xbf16, #tpu.memory_space<vmem>>, %arg14: memref<1x1x128xf32, #tpu.memory_space<vmem>>, %arg15: memref<1x1x128xf32, #tpu.memory_space<vmem>>, %arg16: memref<1x1x128xf32, #tpu.memory_space<vmem>>, %arg17: memref<16x128xf32, #tpu.memory_space<vmem>>, %arg18: memref<16x128xf32, #tpu.memory_space<vmem>>) attributes {dimension_semantics = [#tpu.dimension_semantics<arbitrary>], iteration_bounds = array<i64: 4>, scalar_prefetch = 0 : i64, scratch_operands = 1 : i64, tpu.core_type = #tpu.core_type<tc>, window_params = [{pipeline_mode = #tpu.pipeline_mode<synchronous>, transform_indices = @transform_0, window_bounds = array<i64: 16, 8>}, {pipeline_mode = #tpu.pipeline_mode<synchronous>, transform_indices = @transform_1, window_bounds = array<i64: 8, 128>}, {pipeline_mode = #tpu.pipeline_mode<synchronous>, transform_indices = @transform_2, window_bounds = array<i64: 1, 128>}, {pipeline_mode = #tpu.pipeline_mode<synchronous>, transform_indices = @transform_3, window_bounds = array<i64: 16, 16>}, {transform_indices = @transform_4, window_bounds = array<i64: 1, 128, 384>}, {transform_indices = @transform_5, window_bounds = array<i64: 1, 1, 384>}, {transform_indices = @transform_6, window_bounds = array<i64: 1, 128, 128>}, {transform_indices = @transform_7, window_bounds = array<i64: 1, 1, 128>}, {transform_indices = @transform_8, window_bounds = array<i64: 1, 1, 128>}, {transform_indices = @transform_9, window_bounds = array<i64: 1, 1, 128>}, {transform_indices = @transform_10, window_bounds = array<i64: 1, 128, 2048>}, {transform_indices = @transform_11, window_bounds = array<i64: 1, 1, 2048>}, {transform_indices = @transform_12, window_bounds = array<i64: 1, 2048, 128>}, {transform_indices = @transform_13, window_bounds = array<i64: 1, 1, 128>}, {transform_indices = @transform_14, window_bounds = array<i64: 1, 1, 128>}, {transform_indices = @transform_15, window_bounds = array<i64: 1, 1, 128>}, {pipeline_mode = #tpu.pipeline_mode<synchronous>, transform_indices = @transform_16, window_bounds = array<i64: 16, 128>}]} {
    %c0_i32 = arith.constant 0 : i32
    %0 = arith.cmpi eq, %arg0, %c0_i32 : i32
    %1 = arith.extui %0 : i1 to i32
    %c0_i32_0 = arith.constant 0 : i32
    %2 = arith.cmpi ne, %1, %c0_i32_0 : i32
    scf.if %2 {
      %c0_89 = arith.constant 0 : index
      %c0_90 = arith.constant 0 : index
      %203 = vector.load %arg1[%c0_89, %c0_90] : memref<16x8xf32, #tpu.memory_space<vmem>>, vector<16x8xf32>
      %c0_91 = arith.constant 0 : index
      %c0_92 = arith.constant 0 : index
      %204 = vector.load %arg2[%c0_91, %c0_92] : memref<8x128xf32, #tpu.memory_space<vmem>>, vector<8x128xf32>
      %cst_93 = arith.constant dense<0.000000e+00> : vector<16x128xf32>
      %205 = tpu.matmul %203, %204, %cst_93 {dimension_numbers = #tpu.dot_dimension_numbers<[1], [0], [0], [1], [0, 0, 1, 1], [], []>} : vector<16x8xf32>, vector<8x128xf32>, vector<16x128xf32> -> vector<16x128xf32>
      %c0_94 = arith.constant 0 : index
      %c0_95 = arith.constant 0 : index
      %206 = vector.load %arg3[%c0_94, %c0_95] : memref<1x128xf32, #tpu.memory_space<vmem>>, vector<1x128xf32>
      %207 = vector.broadcast %206 : vector<1x128xf32> to vector<16x128xf32>
      %208 = arith.addf %205, %207 : vector<16x128xf32>
      %c0_96 = arith.constant 0 : index
      %c0_97 = arith.constant 0 : index
      %209 = vector.load %arg18[%c0_96, %c0_97] : memref<16x128xf32, #tpu.memory_space<vmem>>, vector<16x128xf32>
      tpu.vector_store %arg18[%c0_96, %c0_97], %208 {strides = array<i32>} : memref<16x128xf32, #tpu.memory_space<vmem>>, vector<16x128xf32>,
    } else {
    }
    %c0 = arith.constant 0 : index
    %c0_1 = arith.constant 0 : index
    %3 = vector.load %arg18[%c0, %c0_1] : memref<16x128xf32, #tpu.memory_space<vmem>>, vector<16x128xf32>
    %4 = arith.truncf %3 : vector<16x128xf32> to vector<16x128xbf16>
    %c0_2 = arith.constant 0 : index
    %c0_3 = arith.constant 0 : index
    %c0_4 = arith.constant 0 : index
    %5 = vector.load %arg5[%c0_2, %c0_3, %c0_4] : memref<1x128x384xbf16, #tpu.memory_space<vmem>>, vector<1x128x384xbf16>
    %6 = vector.shape_cast %5 : vector<1x128x384xbf16> to vector<128x384xbf16>
    %cst = arith.constant dense<0.000000e+00> : vector<16x384xf32>
    %7 = tpu.matmul %4, %6, %cst {dimension_numbers = #tpu.dot_dimension_numbers<[1], [0], [0], [1], [0, 0, 1, 1], [], []>} : vector<16x128xbf16>, vector<128x384xbf16>, vector<16x384xf32> -> vector<16x384xf32>
    %c0_5 = arith.constant 0 : index
    %c0_6 = arith.constant 0 : index
    %c0_7 = arith.constant 0 : index
    %8 = vector.load %arg6[%c0_5, %c0_6, %c0_7] : memref<1x1x384xf32, #tpu.memory_space<vmem>>, vector<1x1x384xf32>
    %9 = vector.shape_cast %8 : vector<1x1x384xf32> to vector<1x384xf32>
    %10 = vector.broadcast %9 : vector<1x384xf32> to vector<16x384xf32>
    %11 = arith.addf %7, %10 : vector<16x384xf32>
    %12 = vector.extract_strided_slice %11 {offsets = [0, 0], sizes = [16, 128], strides = [1, 1]} : vector<16x384xf32> to vector<16x128xf32>
    %cst_8 = arith.constant 0.176776692 : f32
    %13 = vector.broadcast %cst_8 : f32 to vector<16x128xf32>
    %14 = arith.mulf %12, %13 : vector<16x128xf32>
    %15 = vector.extract_strided_slice %11 {offsets = [0, 128], sizes = [16, 128], strides = [1, 1]} : vector<16x384xf32> to vector<16x128xf32>
    %16 = vector.extract_strided_slice %11 {offsets = [0, 256], sizes = [16, 128], strides = [1, 1]} : vector<16x384xf32> to vector<16x128xf32>
    %17 = tpu.iota {dimensions = array<i32: 1>} : vector<1x128xi32>
    %cst_9 = arith.constant 0.000000e+00 : f32
    %18 = vector.broadcast %cst_9 : f32 to vector<16x128xf32>
    %19 = vector.extract_strided_slice %14 {offsets = [0, 0], sizes = [16, 32], strides = [1, 1]} : vector<16x128xf32> to vector<16x32xf32>
    %20 = vector.extract_strided_slice %15 {offsets = [0, 0], sizes = [16, 32], strides = [1, 1]} : vector<16x128xf32> to vector<16x32xf32>
    %cst_10 = arith.constant dense<0.000000e+00> : vector<16x16xf32>
    %21 = tpu.matmul %19, %20, %cst_10 {dimension_numbers = #tpu.dot_dimension_numbers<[1], [1], [0], [0], [0, 0, 1, 0], [], []>} : vector<16x32xf32>, vector<16x32xf32>, vector<16x16xf32> -> vector<16x16xf32>
    %c0_11 = arith.constant 0 : index
    %c0_12 = arith.constant 0 : index
    %22 = vector.load %arg4[%c0_11, %c0_12] : memref<16x16xf32, #tpu.memory_space<vmem>>, vector<16x16xf32>
    %23 = arith.addf %21, %22 : vector<16x16xf32>
    %cst_13 = arith.constant dense<0xFF800000> : vector<16xf32>
    %24 = vector.multi_reduction <maximumf>, %23, %cst_13 [1] : vector<16x16xf32> to vector<16xf32>
    %25 = vector.shape_cast %24 : vector<16xf32> to vector<16x1xf32>
    %26 = vector.broadcast %25 : vector<16x1xf32> to vector<16x16xf32>
    %27 = arith.subf %23, %26 : vector<16x16xf32>
    %28 = math.exp %27 : vector<16x16xf32>
    %cst_14 = arith.constant dense<0.000000e+00> : vector<16xf32>
    %29 = vector.multi_reduction <add>, %28, %cst_14 [1] : vector<16x16xf32> to vector<16xf32>
    %30 = vector.shape_cast %29 : vector<16xf32> to vector<16x1xf32>
    %31 = tpu.reciprocal %30 {approx = true} : vector<16x1xf32> -> vector<16x1xf32>
    %32 = vector.broadcast %31 : vector<16x1xf32> to vector<16x16xf32>
    %33 = arith.mulf %28, %32 : vector<16x16xf32>
    %c0_i32_15 = arith.constant 0 : i32
    %34 = vector.broadcast %c0_i32_15 : i32 to vector<1x128xi32>
    %35 = arith.cmpi sge, %17, %34 : vector<1x128xi32>
    %c32_i32 = arith.constant 32 : i32
    %36 = vector.broadcast %c32_i32 : i32 to vector<1x128xi32>
    %37 = arith.cmpi slt, %17, %36 : vector<1x128xi32>
    %38 = arith.andi %35, %37 : vector<1x128xi1>
    %cst_16 = arith.constant 0.000000e+00 : f32
    %39 = vector.shape_cast %38 : vector<1x128xi1> to vector<1x128xi1>
    %40 = vector.broadcast %39 : vector<1x128xi1> to vector<16x128xi1>
    %41 = vector.broadcast %cst_16 : f32 to vector<16x128xf32>
    %42 = arith.select %40, %16, %41 : vector<16x128xi1>, vector<16x128xf32>
    %cst_17 = arith.constant dense<0.000000e+00> : vector<16x128xf32>
    %43 = tpu.matmul %33, %42, %cst_17 {dimension_numbers = #tpu.dot_dimension_numbers<[1], [0], [0], [1], [0, 0, 1, 1], [], []>} : vector<16x16xf32>, vector<16x128xf32>, vector<16x128xf32> -> vector<16x128xf32>
    %44 = arith.addf %18, %43 : vector<16x128xf32>
    %45 = vector.extract_strided_slice %14 {offsets = [0, 32], sizes = [16, 32], strides = [1, 1]} : vector<16x128xf32> to vector<16x32xf32>
    %46 = vector.extract_strided_slice %15 {offsets = [0, 32], sizes = [16, 32], strides = [1, 1]} : vector<16x128xf32> to vector<16x32xf32>
    %cst_18 = arith.constant dense<0.000000e+00> : vector<16x16xf32>
    %47 = tpu.matmul %45, %46, %cst_18 {dimension_numbers = #tpu.dot_dimension_numbers<[1], [1], [0], [0], [0, 0, 1, 0], [], []>} : vector<16x32xf32>, vector<16x32xf32>, vector<16x16xf32> -> vector<16x16xf32>
    %c0_19 = arith.constant 0 : index
    %c0_20 = arith.constant 0 : index
    %48 = vector.load %arg4[%c0_19, %c0_20] : memref<16x16xf32, #tpu.memory_space<vmem>>, vector<16x16xf32>
    %49 = arith.addf %47, %48 : vector<16x16xf32>
    %cst_21 = arith.constant dense<0xFF800000> : vector<16xf32>
    %50 = vector.multi_reduction <maximumf>, %49, %cst_21 [1] : vector<16x16xf32> to vector<16xf32>
    %51 = vector.shape_cast %50 : vector<16xf32> to vector<16x1xf32>
    %52 = vector.broadcast %51 : vector<16x1xf32> to vector<16x16xf32>
    %53 = arith.subf %49, %52 : vector<16x16xf32>
    %54 = math.exp %53 : vector<16x16xf32>
    %cst_22 = arith.constant dense<0.000000e+00> : vector<16xf32>
    %55 = vector.multi_reduction <add>, %54, %cst_22 [1] : vector<16x16xf32> to vector<16xf32>
    %56 = vector.shape_cast %55 : vector<16xf32> to vector<16x1xf32>
    %57 = tpu.reciprocal %56 {approx = true} : vector<16x1xf32> -> vector<16x1xf32>
    %58 = vector.broadcast %57 : vector<16x1xf32> to vector<16x16xf32>
    %59 = arith.mulf %54, %58 : vector<16x16xf32>
    %c32_i32_23 = arith.constant 32 : i32
    %60 = vector.broadcast %c32_i32_23 : i32 to vector<1x128xi32>
    %61 = arith.cmpi sge, %17, %60 : vector<1x128xi32>
    %c64_i32 = arith.constant 64 : i32
    %62 = vector.broadcast %c64_i32 : i32 to vector<1x128xi32>
    %63 = arith.cmpi slt, %17, %62 : vector<1x128xi32>
    %64 = arith.andi %61, %63 : vector<1x128xi1>
    %cst_24 = arith.constant 0.000000e+00 : f32
    %65 = vector.shape_cast %64 : vector<1x128xi1> to vector<1x128xi1>
    %66 = vector.broadcast %65 : vector<1x128xi1> to vector<16x128xi1>
    %67 = vector.broadcast %cst_24 : f32 to vector<16x128xf32>
    %68 = arith.select %66, %16, %67 : vector<16x128xi1>, vector<16x128xf32>
    %cst_25 = arith.constant dense<0.000000e+00> : vector<16x128xf32>
    %69 = tpu.matmul %59, %68, %cst_25 {dimension_numbers = #tpu.dot_dimension_numbers<[1], [0], [0], [1], [0, 0, 1, 1], [], []>} : vector<16x16xf32>, vector<16x128xf32>, vector<16x128xf32> -> vector<16x128xf32>
    %70 = arith.addf %44, %69 : vector<16x128xf32>
    %71 = vector.extract_strided_slice %14 {offsets = [0, 64], sizes = [16, 32], strides = [1, 1]} : vector<16x128xf32> to vector<16x32xf32>
    %72 = vector.extract_strided_slice %15 {offsets = [0, 64], sizes = [16, 32], strides = [1, 1]} : vector<16x128xf32> to vector<16x32xf32>
    %cst_26 = arith.constant dense<0.000000e+00> : vector<16x16xf32>
    %73 = tpu.matmul %71, %72, %cst_26 {dimension_numbers = #tpu.dot_dimension_numbers<[1], [1], [0], [0], [0, 0, 1, 0], [], []>} : vector<16x32xf32>, vector<16x32xf32>, vector<16x16xf32> -> vector<16x16xf32>
    %c0_27 = arith.constant 0 : index
    %c0_28 = arith.constant 0 : index
    %74 = vector.load %arg4[%c0_27, %c0_28] : memref<16x16xf32, #tpu.memory_space<vmem>>, vector<16x16xf32>
    %75 = arith.addf %73, %74 : vector<16x16xf32>
    %cst_29 = arith.constant dense<0xFF800000> : vector<16xf32>
    %76 = vector.multi_reduction <maximumf>, %75, %cst_29 [1] : vector<16x16xf32> to vector<16xf32>
    %77 = vector.shape_cast %76 : vector<16xf32> to vector<16x1xf32>
    %78 = vector.broadcast %77 : vector<16x1xf32> to vector<16x16xf32>
    %79 = arith.subf %75, %78 : vector<16x16xf32>
    %80 = math.exp %79 : vector<16x16xf32>
    %cst_30 = arith.constant dense<0.000000e+00> : vector<16xf32>
    %81 = vector.multi_reduction <add>, %80, %cst_30 [1] : vector<16x16xf32> to vector<16xf32>
    %82 = vector.shape_cast %81 : vector<16xf32> to vector<16x1xf32>
    %83 = tpu.reciprocal %82 {approx = true} : vector<16x1xf32> -> vector<16x1xf32>
    %84 = vector.broadcast %83 : vector<16x1xf32> to vector<16x16xf32>
    %85 = arith.mulf %80, %84 : vector<16x16xf32>
    %c64_i32_31 = arith.constant 64 : i32
    %86 = vector.broadcast %c64_i32_31 : i32 to vector<1x128xi32>
    %87 = arith.cmpi sge, %17, %86 : vector<1x128xi32>
    %c96_i32 = arith.constant 96 : i32
    %88 = vector.broadcast %c96_i32 : i32 to vector<1x128xi32>
    %89 = arith.cmpi slt, %17, %88 : vector<1x128xi32>
    %90 = arith.andi %87, %89 : vector<1x128xi1>
    %cst_32 = arith.constant 0.000000e+00 : f32
    %91 = vector.shape_cast %90 : vector<1x128xi1> to vector<1x128xi1>
    %92 = vector.broadcast %91 : vector<1x128xi1> to vector<16x128xi1>
    %93 = vector.broadcast %cst_32 : f32 to vector<16x128xf32>
    %94 = arith.select %92, %16, %93 : vector<16x128xi1>, vector<16x128xf32>
    %cst_33 = arith.constant dense<0.000000e+00> : vector<16x128xf32>
    %95 = tpu.matmul %85, %94, %cst_33 {dimension_numbers = #tpu.dot_dimension_numbers<[1], [0], [0], [1], [0, 0, 1, 1], [], []>} : vector<16x16xf32>, vector<16x128xf32>, vector<16x128xf32> -> vector<16x128xf32>
    %96 = arith.addf %70, %95 : vector<16x128xf32>
    %97 = vector.extract_strided_slice %14 {offsets = [0, 96], sizes = [16, 32], strides = [1, 1]} : vector<16x128xf32> to vector<16x32xf32>
    %98 = vector.extract_strided_slice %15 {offsets = [0, 96], sizes = [16, 32], strides = [1, 1]} : vector<16x128xf32> to vector<16x32xf32>
    %cst_34 = arith.constant dense<0.000000e+00> : vector<16x16xf32>
    %99 = tpu.matmul %97, %98, %cst_34 {dimension_numbers = #tpu.dot_dimension_numbers<[1], [1], [0], [0], [0, 0, 1, 0], [], []>} : vector<16x32xf32>, vector<16x32xf32>, vector<16x16xf32> -> vector<16x16xf32>
    %c0_35 = arith.constant 0 : index
    %c0_36 = arith.constant 0 : index
    %100 = vector.load %arg4[%c0_35, %c0_36] : memref<16x16xf32, #tpu.memory_space<vmem>>, vector<16x16xf32>
    %101 = arith.addf %99, %100 : vector<16x16xf32>
    %cst_37 = arith.constant dense<0xFF800000> : vector<16xf32>
    %102 = vector.multi_reduction <maximumf>, %101, %cst_37 [1] : vector<16x16xf32> to vector<16xf32>
    %103 = vector.shape_cast %102 : vector<16xf32> to vector<16x1xf32>
    %104 = vector.broadcast %103 : vector<16x1xf32> to vector<16x16xf32>
    %105 = arith.subf %101, %104 : vector<16x16xf32>
    %106 = math.exp %105 : vector<16x16xf32>
    %cst_38 = arith.constant dense<0.000000e+00> : vector<16xf32>
    %107 = vector.multi_reduction <add>, %106, %cst_38 [1] : vector<16x16xf32> to vector<16xf32>
    %108 = vector.shape_cast %107 : vector<16xf32> to vector<16x1xf32>
    %109 = tpu.reciprocal %108 {approx = true} : vector<16x1xf32> -> vector<16x1xf32>
    %110 = vector.broadcast %109 : vector<16x1xf32> to vector<16x16xf32>
    %111 = arith.mulf %106, %110 : vector<16x16xf32>
    %c96_i32_39 = arith.constant 96 : i32
    %112 = vector.broadcast %c96_i32_39 : i32 to vector<1x128xi32>
    %113 = arith.cmpi sge, %17, %112 : vector<1x128xi32>
    %c128_i32 = arith.constant 128 : i32
    %114 = vector.broadcast %c128_i32 : i32 to vector<1x128xi32>
    %115 = arith.cmpi slt, %17, %114 : vector<1x128xi32>
    %116 = arith.andi %113, %115 : vector<1x128xi1>
    %cst_40 = arith.constant 0.000000e+00 : f32
    %117 = vector.shape_cast %116 : vector<1x128xi1> to vector<1x128xi1>
    %118 = vector.broadcast %117 : vector<1x128xi1> to vector<16x128xi1>
    %119 = vector.broadcast %cst_40 : f32 to vector<16x128xf32>
    %120 = arith.select %118, %16, %119 : vector<16x128xi1>, vector<16x128xf32>
    %cst_41 = arith.constant dense<0.000000e+00> : vector<16x128xf32>
    %121 = tpu.matmul %111, %120, %cst_41 {dimension_numbers = #tpu.dot_dimension_numbers<[1], [0], [0], [1], [0, 0, 1, 1], [], []>} : vector<16x16xf32>, vector<16x128xf32>, vector<16x128xf32> -> vector<16x128xf32>
    %122 = arith.addf %96, %121 : vector<16x128xf32>
    %123 = arith.truncf %122 : vector<16x128xf32> to vector<16x128xbf16>
    %c0_42 = arith.constant 0 : index
    %c0_43 = arith.constant 0 : index
    %c0_44 = arith.constant 0 : index
    %124 = vector.load %arg7[%c0_42, %c0_43, %c0_44] : memref<1x128x128xbf16, #tpu.memory_space<vmem>>, vector<1x128x128xbf16>
    %125 = vector.shape_cast %124 : vector<1x128x128xbf16> to vector<128x128xbf16>
    %cst_45 = arith.constant dense<0.000000e+00> : vector<16x128xf32>
    %126 = tpu.matmul %123, %125, %cst_45 {dimension_numbers = #tpu.dot_dimension_numbers<[1], [0], [0], [1], [0, 0, 1, 1], [], []>} : vector<16x128xbf16>, vector<128x128xbf16>, vector<16x128xf32> -> vector<16x128xf32>
    %c0_46 = arith.constant 0 : index
    %c0_47 = arith.constant 0 : index
    %c0_48 = arith.constant 0 : index
    %127 = vector.load %arg8[%c0_46, %c0_47, %c0_48] : memref<1x1x128xf32, #tpu.memory_space<vmem>>, vector<1x1x128xf32>
    %128 = vector.shape_cast %127 : vector<1x1x128xf32> to vector<1x128xf32>
    %129 = vector.broadcast %128 : vector<1x128xf32> to vector<16x128xf32>
    %130 = arith.addf %126, %129 : vector<16x128xf32>
    %131 = arith.addf %3, %130 : vector<16x128xf32>
    %c0_49 = arith.constant 0 : index
    %c0_50 = arith.constant 0 : index
    %c0_51 = arith.constant 0 : index
    %132 = vector.load %arg9[%c0_49, %c0_50, %c0_51] : memref<1x1x128xf32, #tpu.memory_space<vmem>>, vector<1x1x128xf32>
    %133 = vector.shape_cast %132 : vector<1x1x128xf32> to vector<1x128xf32>
    %c0_52 = arith.constant 0 : index
    %c0_53 = arith.constant 0 : index
    %c0_54 = arith.constant 0 : index
    %134 = vector.load %arg10[%c0_52, %c0_53, %c0_54] : memref<1x1x128xf32, #tpu.memory_space<vmem>>, vector<1x1x128xf32>
    %135 = vector.shape_cast %134 : vector<1x1x128xf32> to vector<1x128xf32>
    %cst_55 = arith.constant dense<0.000000e+00> : vector<16xf32>
    %136 = vector.multi_reduction <add>, %131, %cst_55 [1] : vector<16x128xf32> to vector<16xf32>
    %137 = vector.shape_cast %136 : vector<16xf32> to vector<16x1xf32>
    %cst_56 = arith.constant 1.280000e+02 : f32
    %138 = vector.broadcast %cst_56 : f32 to vector<16x1xf32>
    %139 = arith.divf %137, %138 : vector<16x1xf32>
    %140 = vector.broadcast %139 : vector<16x1xf32> to vector<16x128xf32>
    %141 = arith.subf %131, %140 : vector<16x128xf32>
    %142 = arith.mulf %141, %141 : vector<16x128xf32>
    %cst_57 = arith.constant dense<0.000000e+00> : vector<16xf32>
    %143 = vector.multi_reduction <add>, %142, %cst_57 [1] : vector<16x128xf32> to vector<16xf32>
    %144 = vector.shape_cast %143 : vector<16xf32> to vector<16x1xf32>
    %cst_58 = arith.constant 1.280000e+02 : f32
    %145 = vector.broadcast %cst_58 : f32 to vector<16x1xf32>
    %146 = arith.divf %144, %145 : vector<16x1xf32>
    %cst_59 = arith.constant 9.99999974E-6 : f32
    %147 = vector.broadcast %cst_59 : f32 to vector<16x1xf32>
    %148 = arith.addf %146, %147 : vector<16x1xf32>
    %149 = math.rsqrt %148 : vector<16x1xf32>
    %150 = vector.broadcast %149 : vector<16x1xf32> to vector<16x128xf32>
    %151 = arith.mulf %141, %150 : vector<16x128xf32>
    %152 = vector.broadcast %133 : vector<1x128xf32> to vector<16x128xf32>
    %153 = arith.mulf %151, %152 : vector<16x128xf32>
    %154 = vector.broadcast %135 : vector<1x128xf32> to vector<16x128xf32>
    %155 = arith.addf %153, %154 : vector<16x128xf32>
    %156 = arith.truncf %155 : vector<16x128xf32> to vector<16x128xbf16>
    %c0_60 = arith.constant 0 : index
    %c0_61 = arith.constant 0 : index
    %c0_62 = arith.constant 0 : index
    %157 = vector.load %arg11[%c0_60, %c0_61, %c0_62] : memref<1x128x2048xbf16, #tpu.memory_space<vmem>>, vector<1x128x2048xbf16>
    %158 = vector.shape_cast %157 : vector<1x128x2048xbf16> to vector<128x2048xbf16>
    %cst_63 = arith.constant dense<0.000000e+00> : vector<16x2048xf32>
    %159 = tpu.matmul %156, %158, %cst_63 {dimension_numbers = #tpu.dot_dimension_numbers<[1], [0], [0], [1], [0, 0, 1, 1], [], []>} : vector<16x128xbf16>, vector<128x2048xbf16>, vector<16x2048xf32> -> vector<16x2048xf32>
    %c0_64 = arith.constant 0 : index
    %c0_65 = arith.constant 0 : index
    %c0_66 = arith.constant 0 : index
    %160 = vector.load %arg12[%c0_64, %c0_65, %c0_66] : memref<1x1x2048xf32, #tpu.memory_space<vmem>>, vector<1x1x2048xf32>
    %161 = vector.shape_cast %160 : vector<1x1x2048xf32> to vector<1x2048xf32>
    %162 = vector.broadcast %161 : vector<1x2048xf32> to vector<16x2048xf32>
    %163 = arith.addf %159, %162 : vector<16x2048xf32>
    %cst_67 = arith.constant 0.000000e+00 : f32
    %164 = vector.broadcast %cst_67 : f32 to vector<16x2048xf32>
    %165 = arith.maximumf %163, %164 : vector<16x2048xf32>
    %166 = arith.truncf %165 : vector<16x2048xf32> to vector<16x2048xbf16>
    %c0_68 = arith.constant 0 : index
    %c0_69 = arith.constant 0 : index
    %c0_70 = arith.constant 0 : index
    %167 = vector.load %arg13[%c0_68, %c0_69, %c0_70] : memref<1x2048x128xbf16, #tpu.memory_space<vmem>>, vector<1x2048x128xbf16>
    %168 = vector.shape_cast %167 : vector<1x2048x128xbf16> to vector<2048x128xbf16>
    %cst_71 = arith.constant dense<0.000000e+00> : vector<16x128xf32>
    %169 = tpu.matmul %166, %168, %cst_71 {dimension_numbers = #tpu.dot_dimension_numbers<[1], [0], [0], [1], [0, 0, 1, 1], [], []>} : vector<16x2048xbf16>, vector<2048x128xbf16>, vector<16x128xf32> -> vector<16x128xf32>
    %c0_72 = arith.constant 0 : index
    %c0_73 = arith.constant 0 : index
    %c0_74 = arith.constant 0 : index
    %170 = vector.load %arg14[%c0_72, %c0_73, %c0_74] : memref<1x1x128xf32, #tpu.memory_space<vmem>>, vector<1x1x128xf32>
    %171 = vector.shape_cast %170 : vector<1x1x128xf32> to vector<1x128xf32>
    %172 = vector.broadcast %171 : vector<1x128xf32> to vector<16x128xf32>
    %173 = arith.addf %169, %172 : vector<16x128xf32>
    %174 = arith.addf %155, %173 : vector<16x128xf32>
    %c0_75 = arith.constant 0 : index
    %c0_76 = arith.constant 0 : index
    %c0_77 = arith.constant 0 : index
    %175 = vector.load %arg15[%c0_75, %c0_76, %c0_77] : memref<1x1x128xf32, #tpu.memory_space<vmem>>, vector<1x1x128xf32>
    %176 = vector.shape_cast %175 : vector<1x1x128xf32> to vector<1x128xf32>
    %c0_78 = arith.constant 0 : index
    %c0_79 = arith.constant 0 : index
    %c0_80 = arith.constant 0 : index
    %177 = vector.load %arg16[%c0_78, %c0_79, %c0_80] : memref<1x1x128xf32, #tpu.memory_space<vmem>>, vector<1x1x128xf32>
    %178 = vector.shape_cast %177 : vector<1x1x128xf32> to vector<1x128xf32>
    %cst_81 = arith.constant dense<0.000000e+00> : vector<16xf32>
    %179 = vector.multi_reduction <add>, %174, %cst_81 [1] : vector<16x128xf32> to vector<16xf32>
    %180 = vector.shape_cast %179 : vector<16xf32> to vector<16x1xf32>
    %cst_82 = arith.constant 1.280000e+02 : f32
    %181 = vector.broadcast %cst_82 : f32 to vector<16x1xf32>
    %182 = arith.divf %180, %181 : vector<16x1xf32>
    %183 = vector.broadcast %182 : vector<16x1xf32> to vector<16x128xf32>
    %184 = arith.subf %174, %183 : vector<16x128xf32>
    %185 = arith.mulf %184, %184 : vector<16x128xf32>
    %cst_83 = arith.constant dense<0.000000e+00> : vector<16xf32>
    %186 = vector.multi_reduction <add>, %185, %cst_83 [1] : vector<16x128xf32> to vector<16xf32>
    %187 = vector.shape_cast %186 : vector<16xf32> to vector<16x1xf32>
    %cst_84 = arith.constant 1.280000e+02 : f32
    %188 = vector.broadcast %cst_84 : f32 to vector<16x1xf32>
    %189 = arith.divf %187, %188 : vector<16x1xf32>
    %cst_85 = arith.constant 9.99999974E-6 : f32
    %190 = vector.broadcast %cst_85 : f32 to vector<16x1xf32>
    %191 = arith.addf %189, %190 : vector<16x1xf32>
    %192 = math.rsqrt %191 : vector<16x1xf32>
    %193 = vector.broadcast %192 : vector<16x1xf32> to vector<16x128xf32>
    %194 = arith.mulf %184, %193 : vector<16x128xf32>
    %195 = vector.broadcast %176 : vector<1x128xf32> to vector<16x128xf32>
    %196 = arith.mulf %194, %195 : vector<16x128xf32>
    %197 = vector.broadcast %178 : vector<1x128xf32> to vector<16x128xf32>
    %198 = arith.addf %196, %197 : vector<16x128xf32>
    %c0_86 = arith.constant 0 : index
    %c0_87 = arith.constant 0 : index
    %199 = vector.load %arg18[%c0_86, %c0_87] : memref<16x128xf32, #tpu.memory_space<vmem>>, vector<16x128xf32>
    tpu.vector_store %arg18[%c0_86, %c0_87], %198 {strides = array<i32>} : memref<16x128xf32, #tpu.memory_space<vmem>>, vector<16x128xf32>,
    %c3_i32 = arith.constant 3 : i32
    %200 = arith.cmpi eq, %arg0, %c3_i32 : i32
    %201 = arith.extui %200 : i1 to i32
    %c0_i32_88 = arith.constant 0 : i32
    %202 = arith.cmpi ne, %201, %c0_i32_88 : i32
    scf.if %202 {
      %c0_89 = arith.constant 0 : index
      %c0_90 = arith.constant 0 : index
      %203 = vector.load %arg17[%c0_89, %c0_90] : memref<16x128xf32, #tpu.memory_space<vmem>>, vector<16x128xf32>
      tpu.vector_store %arg17[%c0_89, %c0_90], %198 {strides = array<i32>} : memref<16x128xf32, #tpu.memory_space<vmem>>, vector<16x128xf32>,
    } else {
    }
    return
  }
  func.func @transform_0(%arg0: i32) -> (i32, i32) {
    %c0_i32 = arith.constant 0 : i32
    %c0_i32_0 = arith.constant 0 : i32
    %c0_i32_1 = arith.constant 0 : i32
    return %c0_i32, %c0_i32_0 : i32, i32
  }
  func.func @transform_1(%arg0: i32) -> (i32, i32) {
    %c0_i32 = arith.constant 0 : i32
    %c0_i32_0 = arith.constant 0 : i32
    %c0_i32_1 = arith.constant 0 : i32
    return %c0_i32, %c0_i32_0 : i32, i32
  }
  func.func @transform_2(%arg0: i32) -> (i32, i32) {
    %c0_i32 = arith.constant 0 : i32
    %c0_i32_0 = arith.constant 0 : i32
    %c0_i32_1 = arith.constant 0 : i32
    return %c0_i32, %c0_i32_0 : i32, i32
  }
  func.func @transform_3(%arg0: i32) -> (i32, i32) {
    %c0_i32 = arith.constant 0 : i32
    %c0_i32_0 = arith.constant 0 : i32
    %c0_i32_1 = arith.constant 0 : i32
    return %c0_i32, %c0_i32_0 : i32, i32
  }
  func.func @transform_4(%arg0: i32) -> (i32, i32, i32) {
    %c0_i32 = arith.constant 0 : i32
    %c0_i32_0 = arith.constant 0 : i32
    %c0_i32_1 = arith.constant 0 : i32
    return %arg0, %c0_i32, %c0_i32_0 : i32, i32, i32
  }
  func.func @transform_5(%arg0: i32) -> (i32, i32, i32) {
    %c0_i32 = arith.constant 0 : i32
    %c0_i32_0 = arith.constant 0 : i32
    %c0_i32_1 = arith.constant 0 : i32
    return %arg0, %c0_i32, %c0_i32_0 : i32, i32, i32
  }
  func.func @transform_6(%arg0: i32) -> (i32, i32, i32) {
    %c0_i32 = arith.constant 0 : i32
    %c0_i32_0 = arith.constant 0 : i32
    %c0_i32_1 = arith.constant 0 : i32
    return %arg0, %c0_i32, %c0_i32_0 : i32, i32, i32
  }
  func.func @transform_7(%arg0: i32) -> (i32, i32, i32) {
    %c0_i32 = arith.constant 0 : i32
    %c0_i32_0 = arith.constant 0 : i32
    %c0_i32_1 = arith.constant 0 : i32
    return %arg0, %c0_i32, %c0_i32_0 : i32, i32, i32
  }
  func.func @transform_8(%arg0: i32) -> (i32, i32, i32) {
    %c0_i32 = arith.constant 0 : i32
    %c0_i32_0 = arith.constant 0 : i32
    %c0_i32_1 = arith.constant 0 : i32
    return %arg0, %c0_i32, %c0_i32_0 : i32, i32, i32
  }
  func.func @transform_9(%arg0: i32) -> (i32, i32, i32) {
    %c0_i32 = arith.constant 0 : i32
    %c0_i32_0 = arith.constant 0 : i32
    %c0_i32_1 = arith.constant 0 : i32
    return %arg0, %c0_i32, %c0_i32_0 : i32, i32, i32
  }
  func.func @transform_10(%arg0: i32) -> (i32, i32, i32) {
    %c0_i32 = arith.constant 0 : i32
    %c0_i32_0 = arith.constant 0 : i32
    %c0_i32_1 = arith.constant 0 : i32
    return %arg0, %c0_i32, %c0_i32_0 : i32, i32, i32
  }
  func.func @transform_11(%arg0: i32) -> (i32, i32, i32) {
    %c0_i32 = arith.constant 0 : i32
    %c0_i32_0 = arith.constant 0 : i32
    %c0_i32_1 = arith.constant 0 : i32
    return %arg0, %c0_i32, %c0_i32_0 : i32, i32, i32
  }
  func.func @transform_12(%arg0: i32) -> (i32, i32, i32) {
    %c0_i32 = arith.constant 0 : i32
    %c0_i32_0 = arith.constant 0 : i32
    %c0_i32_1 = arith.constant 0 : i32
    return %arg0, %c0_i32, %c0_i32_0 : i32, i32, i32
  }
  func.func @transform_13(%arg0: i32) -> (i32, i32, i32) {
    %c0_i32 = arith.constant 0 : i32
    %c0_i32_0 = arith.constant 0 : i32
    %c0_i32_1 = arith.constant 0 : i32
    return %arg0, %c0_i32, %c0_i32_0 : i32, i32, i32
  }
  func.func @transform_14(%arg0: i32) -> (i32, i32, i32) {
    %c0_i32 = arith.constant 0 : i32
    %c0_i32_0 = arith.constant 0 : i32
    %c0_i32_1 = arith.constant 0 : i32
    return %arg0, %c0_i32, %c0_i32_0 : i32, i32, i32
  }
  func.func @transform_15(%arg0: i32) -> (i32, i32, i32) {
    %c0_i32 = arith.constant 0 : i32
    %c0_i32_0 = arith.constant 0 : i32
    %c0_i32_1 = arith.constant 0 : i32
    return %arg0, %c0_i32, %c0_i32_0 : i32, i32, i32
  }
  func.func @transform_16(%arg0: i32) -> (i32, i32) {
    %c0_i32 = arith.constant 0 : i32
    %c0_i32_0 = arith.constant 0 : i32
    %c0_i32_1 = arith.constant 0 : i32
    return %c0_i32, %c0_i32_0 : i32, i32
  }
}

</mosaic_0001>

<bundles_post_ra>
// kernel: lamp_forward.2
= control target key start
LH: loop header
LB: loop body
LE: loop exit
PB: predicated region body
PF: predicated region fallthrough
CT: control target
= control target key end

     0   :  { %10 = vsyncpa [#allocation3], 0  ;;  %s818_s0 = inlined_call_operand.hbm [shape: f32[16,128], index: 0, kind: input, shape index: {}]   ;;  %s819_s1 = inlined_call_operand.hbm [shape: bf16[128,256], index: 1, kind: input, shape index: {}]   ;;  %s820_s2 = inlined_call_operand.hbm [shape: f32[1,256], index: 2, kind: input, shape index: {}]   ;;  %s821_s3 = inlined_call_operand.hbm [shape: bf16[256,128], index: 3, kind: input, shape index: {}]   ;;  %s822_s4 = inlined_call_operand.hbm [shape: f32[1,128], index: 4, kind: input, shape index: {}]   ;;  %s823_s5 = inlined_call_operand.hbm [shape: f32[16,128], index: 5, kind: output, shape index: {}]  }
   0x1   :  { %11 = vsyncpa [#allocation6], 0 }
   0x2   :  { %12 = vsyncpa [#allocation9], 0 }
   0x3   :  { %13 = vsyncpa [#allocation4], 0  ;;  %s689_s18 = smov [#allocation5]   ;;  %s690_s20 = smov [#allocation8]  }
   0x4   :  { %s31_s19 = sshll.u32 %s689_s18, 4  ;;  %s53_s21 = sshll.u32 %s690_s20, 4  ;;  %s32_s19 = int_to_ptr.vmem [resolvable:$true] %s31_s19  ;;  %s730_s21 = int_to_ptr.vmem [resolvable:$true] %s53_s21 }
   0x5   :  { %s549_s24 = scalar_lea.hbm %s819_s1, 2048 }
   0x6   :  { %p550_p0 = scmp.ne.s32.totalorder %s819_s1, %s549_s24  ;;  %p553_p1 = scmp.lt.u32.totalorder %s549_s24, %s819_s1 }
   0x8   :  { %p555_p2 = pnand %p553_p1, %p550_p0 }
   0xa   :  { %558 = shalt.err (!%p555_p2)
}
   0xb   :  { %s559_s29 = scalar_lea.vmem %s32_s19, 2048  ;;  %p564_p4 = scmp.lt.s32.totalorder %s32_s19, %s32_s19 }
   0xc   :  { %p560_p3 = scmp.ne.s32.totalorder %s32_s19, %s559_s29  ;;  %p565_p5 = scmp.lt.s32.totalorder %s559_s29, %s559_s29 }
   0xe   :  { %p566_p6 = por %p565_p5, %p564_p4 }
  0x10   :  { %p567_p7 = pnand %p566_p6, %p560_p3 }
  0x12   :  { %570 = shalt.err (!%p567_p7)
}
  0x13   :  { %s691_s30 = smov 128   ;;  %s692_s6 = smov 8  }
  0x14   :  { %37 = dma.hbm_to_vmem [thread:$0]  %s819_s1, 2048, %s32_s19, [#allocation6], %s691_s30, %s691_s30, %s692_s6  }
  0x15   :  { %s571_s11 = scalar_lea.hbm %s821_s3, 2048 }
  0x16   :  { %p572_p8 = scmp.ne.s32.totalorder %s821_s3, %s571_s11  ;;  %p575_p9 = scmp.lt.u32.totalorder %s571_s11, %s821_s3 }
  0x18   :  { %p577_p10 = pnand %p575_p9, %p572_p8 }
  0x1a   :  { %580 = shalt.err (!%p577_p10)
}
  0x1b   :  { %s581_s16 = scalar_lea.vmem %s730_s21, 2048  ;;  %p586_p12 = scmp.lt.s32.totalorder %s730_s21, %s730_s21 }
  0x1c   :  { %p582_p11 = scmp.ne.s32.totalorder %s730_s21, %s581_s16  ;;  %p587_p13 = scmp.lt.s32.totalorder %s581_s16, %s581_s16 }
  0x1e   :  { %p588_p0 = por %p587_p13, %p586_p12 }
  0x20   :  { %p589_p1 = pnand %p588_p0, %p582_p11 }
  0x22   :  { %592 = shalt.err (!%p589_p1)
}
  0x23   :  { %s693_s1 = smov 64   ;;  %s694_s17 = smov 4  }
  0x24   :  { %59 = dma.hbm_to_vmem [thread:$0]  %s821_s3, 2048, %s730_s21, [#allocation9], %s693_s1, %s693_s1, %s694_s17  }
  0x25   :  { %s695_s20 = smov [#allocation2]   ;;  %s696_s23 = smov [#allocation7]  }
  0x26   :  { %s19_s22 = sshll.u32 %s695_s20, 4  ;;  %s44_s24 = sshll.u32 %s696_s23, 4  ;;  %s20_s22 = int_to_ptr.vmem [resolvable:$true] %s19_s22  ;;  %s45_s24 = int_to_ptr.vmem [resolvable:$true] %s44_s24 }
  0x27   :  { %s593_s27 = scalar_lea.hbm %s818_s0, 256 }
  0x28   :  { %p594_p2 = scmp.ne.s32.totalorder %s818_s0, %s593_s27  ;;  %p597_p3 = scmp.lt.u32.totalorder %s593_s27, %s818_s0 }
  0x2a   :  { %p599_p4 = pnand %p597_p3, %p594_p2 }
  0x2c   :  { %602 = shalt.err (!%p599_p4)
}
  0x2d   :  { %s603_s3 = scalar_lea.vmem %s20_s22, 256  ;;  %p608_p6 = scmp.lt.s32.totalorder %s20_s22, %s20_s22 }
  0x2e   :  { %p604_p5 = scmp.ne.s32.totalorder %s20_s22, %s603_s3  ;;  %p609_p7 = scmp.lt.s32.totalorder %s603_s3, %s603_s3 }
  0x30   :  { %p610_p8 = por %p609_p7, %p608_p6 }
  0x32   :  { %p611_p9 = pnand %p610_p8, %p604_p5 }
  0x34   :  { %614 = shalt.err (!%p611_p9)
}
  0x35   :  { %25 = dma.hbm_to_vmem [thread:$0]  %s818_s0, 256, %s20_s22, [#allocation3], %s691_s30, %s691_s30, %s692_s6  }
  0x36   :  { %s615_s12 = scalar_lea.hbm %s820_s2, 32 }
  0x37   :  { %p616_p10 = scmp.ne.s32.totalorder %s820_s2, %s615_s12  ;;  %p619_p11 = scmp.lt.u32.totalorder %s615_s12, %s820_s2 }
  0x39   :  { %p621_p12 = pnand %p619_p11, %p616_p10 }
  0x3b   :  { %624 = shalt.err (!%p621_p12)
}
  0x3c   :  { %s625_s1 = scalar_lea.vmem %s45_s24, 32  ;;  %p630_p0 = scmp.lt.s32.totalorder %s45_s24, %s45_s24 }
  0x3d   :  { %p626_p13 = scmp.ne.s32.totalorder %s45_s24, %s625_s1  ;;  %p631_p1 = scmp.lt.s32.totalorder %s625_s1, %s625_s1 }
  0x3f   :  { %p632_p2 = por %p631_p1, %p630_p0 }
  0x41   :  { %p633_p3 = pnand %p632_p2, %p626_p13 }
  0x43   :  { %636 = shalt.err (!%p633_p3)
}
  0x44   :  { %47 = dma.hbm_to_vmem [thread:$0]  %s820_s2, 32, %s45_s24, [#allocation6]  }
  0x45   :  { %s697_s18 = smov [#allocation10]   ;;  %s637_s23 = scalar_lea.hbm %s822_s4, 16 }
  0x46   :  { %s66_s19 = sshll.u32 %s697_s18, 4  ;;  %p638_p4 = scmp.ne.s32.totalorder %s822_s4, %s637_s23  ;;  %s67_s19 = int_to_ptr.vmem [resolvable:$true] %s66_s19 }
  0x47   :  { %p641_p5 = scmp.lt.u32.totalorder %s637_s23, %s822_s4 }
  0x49   :  { %p643_p6 = pnand %p641_p5, %p638_p4 }
  0x4b   :  { %646 = shalt.err (!%p643_p6)
}
  0x4c   :  { %s647_s29 = scalar_lea.vmem %s67_s19, 16  ;;  %s651_s2 = scalar_lea.vmem %s67_s19, 32 }
  0x4d   :  { %p648_p7 = scmp.ne.s32.totalorder %s67_s19, %s647_s29  ;;  %p652_p8 = scmp.lt.s32.totalorder %s67_s19, %s67_s19 }
  0x4e   :  { %p653_p9 = scmp.lt.s32.totalorder %s651_s2, %s647_s29 }
  0x50   :  { %p654_p10 = por %p653_p9, %p652_p8 }
  0x52   :  { %p655_p11 = pnand %p654_p10, %p648_p7 }
  0x54   :  { %658 = shalt.err (!%p655_p11)
}
  0x55   :  { %69 = dma.hbm_to_vmem [thread:$0]  %s822_s4, 16, %s67_s19, [#allocation9]  }
  0x56   :  { %681 = dma.done.wait [#allocation3], 256  }
  0x57   :  { %682 = vsyncadd [#allocation3], 4294967040 }
  0x58   :  { %683 = dma.done.wait [#allocation6], 2080  }
  0x59   :  { %684 = vsyncadd [#allocation6], 4294965216 }
  0x5a   :  { %685 = dma.done.wait [#allocation9], 2064  }
  0x5b   :  { %686 = vsyncadd [#allocation9], 4294965232  ;;  %v698_v0 = vmov 0   ;;  %v509_v1 = vld [vmem:[#allocation5 + $0x4] ss:$8 sps:$4 sm:$0xff]   ;;  %v537_v16 = vld [vmem:[#allocation8 + $0x50] sm:$0xff]   ;;  %v107_v36 = vlaneseq }
  0x5c   :  { %229 = vmatprep.mubr.bf16.mxu0 %v698_v0  ;;  %v511_v2 = vld [vmem:[#allocation5] ss:$8 sps:$4 sm:$0xff]   ;;  %197 = vmatprep.subr.bf16.mxu0 %v509_v1  ;;  %v512_v3 = vld [vmem:[#allocation5 + $0x14] ss:$8 sps:$4 sm:$0xff]   ;;  %v514_v4 = vld [vmem:[#allocation5 + $0x10] ss:$8 sps:$4 sm:$0xff]  }
  0x5d   :  { %198 = vmatpush1.bf16.msra.mxu0 %v511_v2  ;;  %v515_v5 = vld [vmem:[#allocation5 + $0x24] ss:$8 sps:$4 sm:$0xff]   ;;  %v517_v6 = vld [vmem:[#allocation5 + $0x20] ss:$8 sps:$4 sm:$0xff]   ;;  %v518_v7 = vld [vmem:[#allocation5 + $0x34] ss:$8 sps:$4 sm:$0xff]  }
  0x5e   :  { %199 = vmatprep.subr.bf16.mxu0 %v512_v3  ;;  %v520_v8 = vld [vmem:[#allocation5 + $0x30] ss:$8 sps:$4 sm:$0xff]   ;;  %v521_v9 = vld [vmem:[#allocation5 + $0x44] ss:$8 sps:$4 sm:$0xff]   ;;  %v523_v11 = vld [vmem:[#allocation5 + $0x40] ss:$8 sps:$4 sm:$0xff]  }
  0x5f   :  { %v533_v10 = vld [vmem:[#allocation8 + $0x40] sm:$0xff]   ;;  %v524_v13 = vld [vmem:[#allocation5 + $0x54] ss:$8 sps:$4 sm:$0xff]   ;;  %v535_v14 = vld [vmem:[#allocation8 + $0x48] sm:$0xff]   ;;  %v108_v37 = vshrl.u32 %v107_v36, 7  ;;  %s699_s4 = smov [#allocation11]  }
  0x60   :  { %v534_v12 = vld [vmem:[#allocation8] sm:$0xff]   ;;  %476 = vmatprep.subr.bf16.mxu1 %v533_v10  ;;  %v536_v15 = vld [vmem:[#allocation8 + $0x8] sm:$0xff]   ;;  %v538_v19 = vld [vmem:[#allocation8 + $0x10] sm:$0xff]   ;;  %s429_s8 = sshll.u32 %s699_s4, 4  ;;  %s430_s8 = int_to_ptr.vmem [resolvable:$true] %s429_s8 }
  0x61   :  { %200 = vmatpush1.bf16.msra.mxu0 %v514_v4  ;;  %477 = vmatpush3.bf16.msra.mxu1 %v534_v12  ;;  %v526_v17 = vld [vmem:[#allocation5 + $0x50] ss:$8 sps:$4 sm:$0xff]   ;;  %v527_v18 = vld [vmem:[#allocation5 + $0x64] ss:$8 sps:$4 sm:$0xff]   ;;  %v529_v21 = vld [vmem:[#allocation5 + $0x60] ss:$8 sps:$4 sm:$0xff]   ;;  %p664_p13 = scmp.lt.s32.totalorder %s430_s8, %s430_s8 }
  0x62   :  { %201 = vmatprep.subr.bf16.mxu0 %v515_v5  ;;  %478 = vmatprep.subr.bf16.mxu1 %v535_v14  ;;  %v539_v20 = vld [vmem:[#allocation8 + $0x58] sm:$0xff]   ;;  %v541_v24 = vld [vmem:[#allocation8 + $0x60] sm:$0xff]   ;;  %v86_v26 = vld [vmem:[#allocation2] sm:$0xff]  ;;  %v109_v38 = vsub.s32 0, %v108_v37  ;;  %v113_v40 = vsub.s32 1, %v108_v37  ;;  %s659_s3 = scalar_lea.vmem %s430_s8, 256 }
  0x63   :  { %v530_v22 = vld [vmem:[#allocation5 + $0x74] ss:$8 sps:$4 sm:$0xff]   ;;  %v532_v25 = vld [vmem:[#allocation5 + $0x70] ss:$8 sps:$4 sm:$0xff]   ;;  %v542_v28 = vld [vmem:[#allocation8 + $0x20] sm:$0xff]   ;;  %p660_p12 = scmp.ne.s32.totalorder %s430_s8, %s659_s3  ;;  %p665_p0 = scmp.lt.s32.totalorder %s659_s3, %s659_s3 }
  0x64   :  { %v540_v23 = vld [vmem:[#allocation8 + $0x18] sm:$0xff]   ;;  %v543_v29 = vld [vmem:[#allocation8 + $0x68] sm:$0xff]   ;;  %v545_v32 = vld [vmem:[#allocation8 + $0x70] sm:$0xff]  }
  0x65   :  { %202 = vmatpush1.bf16.msra.mxu0 %v517_v6  ;;  %479 = vmatpush3.bf16.msra.mxu1 %v536_v15  ;;  %v87_v27 = vld [vmem:[#allocation2 + $0x8] sm:$0xff]  ;;  %v544_v31 = vld [vmem:[#allocation8 + $0x28] sm:$0xff]   ;;  %v105_v39 = vld [vmem:[#allocation7] sm:$0x3]  ;;  %p666_p1 = por %p665_p0, %p664_p13 }
  0x66   :  { %203 = vmatprep.subr.bf16.mxu0 %v518_v7  ;;  %480 = vmatprep.subr.bf16.mxu1 %v537_v16  ;;  %v88_v30 = vpack.c.bf16 %v87_v27, %v86_v26  ;;  %v546_v33 = vld [vmem:[#allocation8 + $0x30] sm:$0xff]   ;;  %v547_v34 = vld [vmem:[#allocation8 + $0x78] sm:$0xff]   ;;  %v110_v41 = vrot.slane %v105_v39, %v109_v38  ;;  %v114_v42 = vrot.slane %v105_v39, %v113_v40  ;;  %v459_v58 = vld [vmem:[#allocation10] ss:$0 sm:$0xff] }
  0x67   :  { %v548_v35 = vld [vmem:[#allocation8 + $0x38] sm:$0xff]   ;;  %p667_p2 = pnand %p666_p1, %p660_p12 }
  0x69   :  { %204 = vmatpush1.bf16.msra.mxu0 %v520_v8  ;;  %481 = vmatpush3.bf16.msra.mxu1 %v538_v19 }
  0x6a   :  { %205 = vmatprep.subr.bf16.mxu0 %v521_v9  ;;  %482 = vmatprep.subr.bf16.mxu1 %v539_v20 }
  0x6d   :  { %206 = vmatpush1.bf16.msra.mxu0 %v523_v11  ;;  %483 = vmatpush3.bf16.msra.mxu1 %v540_v23 }
  0x6e   :  { %207 = vmatprep.subr.bf16.mxu0 %v524_v13  ;;  %484 = vmatprep.subr.bf16.mxu1 %v541_v24 }
  0x71   :  { %208 = vmatpush1.bf16.msra.mxu0 %v526_v17  ;;  %485 = vmatpush3.bf16.msra.mxu1 %v542_v28 }
  0x72   :  { %209 = vmatprep.subr.bf16.mxu0 %v527_v18  ;;  %486 = vmatprep.subr.bf16.mxu1 %v543_v29 }
  0x75   :  { %210 = vmatpush1.bf16.msra.mxu0 %v529_v21  ;;  %487 = vmatpush3.bf16.msra.mxu1 %v544_v31 }
  0x76   :  { %211 = vmatprep.subr.bf16.mxu0 %v530_v22  ;;  %488 = vmatprep.subr.bf16.mxu1 %v545_v32 }
  0x79   :  { %212 = vmatpush1.bf16.msra.mxu0 %v532_v25  ;;  %489 = vmatpush3.bf16.msra.mxu1 %v546_v33 }
  0x7a   :  { %490 = vmatprep.subr.bf16.mxu1 %v547_v34 }
  0x7c   :  { %230 = vmatmul.mubr.bf16.vlgmr.msra.gmra.mrb[0].mxu0 %v88_v30 }
  0x7d   :  { %491 = vmatpush3.bf16.msra.mxu1 %v548_v35 }
 0x14f   :  { %v231_v43 = vpop.f32.mrb[0].mxu0 }
 0x150   :  { %v232_v44 = vadd.f32 %v231_v43, %v110_v41  ;;  %v233_v45 = vpop.f32.mrb[1].mxu0 }
 0x151   :  { %v234_v46 = vadd.f32 %v233_v45, %v114_v42  ;;  %v235_v47 = vpop.f32.mrb[2].mxu0 }
 0x152   :  { %v236_v48 = vadd.f32 %v235_v47, %v110_v41  ;;  %v237_v49 = vpop.f32.mrb[3].mxu0  ;;  %v240_v51 = vmax.f32 %v232_v44, 0.0 }
 0x153   :  { %v238_v50 = vadd.f32 %v237_v49, %v114_v42  ;;  %v241_v53 = vmax.f32 %v234_v46, 0.0 }
 0x154   :  { %v242_v52 = vmax.f32 %v236_v48, 0.0 }
 0x155   :  { %v243_v54 = vmax.f32 %v238_v50, 0.0 }
 0x156   :  { %v244_v55 = vpack.c.bf16 %v242_v52, %v240_v51 }
 0x157   :  { %v245_v56 = vpack.c.bf16 %v243_v54, %v241_v53 }
 0x159   :  { %413 = vmatprep.mubr.bf16.mxu1 %v245_v56 }
 0x15a   :  { %414 = vmatmul.mubr.bf16.vlgmr.msra.gmra.mrb[0].mxu1 %v244_v55 }
 0x22d   :  { %v492_v57 = vpop.f32.mrb[0].mxu1 }
 0x22e   :  { %v493_v59 = vpop.f32.mrb[1].mxu1 }
 0x22f   :  { %v494_v60 = vadd.f32 %v493_v59, %v492_v57  ;;  %v495_v61 = vpop.f32.mrb[2].mxu1 }
 0x230   :  { %v496_v62 = vpop.f32.mrb[3].mxu1 }
 0x231   :  { %v416_v63 = vadd.f32 %v494_v60, %v459_v58  ;;  %v497_v0 = vadd.f32 %v496_v62, %v495_v61 }
 0x233   :  { %422 = vst [vmem:[#allocation11] sm:$0xff] %v416_v63  ;;  %v419_v1 = vadd.f32 %v497_v0, %v459_v58 }
 0x235   :  { %423 = vst [vmem:[#allocation11 + $0x8] sm:$0xff] %v419_v1 }
 0x236   :  { %670 = shalt.err (!%p667_p2)
}
 0x237   :  { %s671_s10 = scalar_lea.hbm %s823_s5, 256 }
 0x238   :  { %p672_p3 = scmp.ne.s32.totalorder %s823_s5, %s671_s10  ;;  %p675_p4 = scmp.lt.u32.totalorder %s671_s10, %s823_s5 }
 0x23a   :  { %p677_p5 = pnand %p675_p4, %p672_p3 }
 0x23c   :  { %680 = shalt.err (!%p677_p5)
}
 0x23d   :  { %435 = dma.vmem_to_hbm [thread:$0]  %s430_s8, 256, %s823_s5, [#allocation4], %s691_s30, %s691_s30, %s692_s6  }
 0x23e   :  { %687 = dma.done.wait [#allocation4], 256  }
 0x23f   :  { %688 = vsyncadd [#allocation4], 4294967040 }
 0x240   :  { %439 = vsyncpa [#allocation3], 1 }
 0x241   :  { %440 = vsyncpa [#allocation6], 1 }
 0x242   :  { %441 = vsyncpa [#allocation9], 1 }
 0x243   :  { %442 = vsyncpa [#allocation4], 1 }

// kernel: lamp_forward.3
= control target key start
LH: loop header
LB: loop body
LE: loop exit
PB: predicated region body
PF: predicated region fallthrough
CT: control target
= control target key end

     0   :  { %s8181_s0 = inlined_call_operand.hbm [shape: f32[16,8], index: 0, kind: input, shape index: {}]   ;;  %s8182_s1 = inlined_call_operand.hbm [shape: f32[8,128], index: 1, kind: input, shape index: {}]   ;;  %s8183_s2 = inlined_call_operand.hbm [shape: f32[1,128], index: 2, kind: input, shape index: {}]   ;;  %s8184_s3 = inlined_call_operand.hbm [shape: f32[16,16], index: 3, kind: input, shape index: {}]   ;;  %s8185_s4 = inlined_call_operand.hbm [shape: bf16[4,128,384], index: 4, kind: input, shape index: {}]   ;;  %s8186_s5 = inlined_call_operand.hbm [shape: f32[4,1,384], index: 5, kind: input, shape index: {}]   ;;  %s8187_s6 = inlined_call_operand.hbm [shape: bf16[4,128,128], index: 6, kind: input, shape index: {}]   ;;  %s8188_s7 = inlined_call_operand.hbm [shape: f32[4,1,128], index: 7, kind: input, shape index: {}]   ;;  %s8189_s8 = inlined_call_operand.hbm [shape: f32[4,1,128], index: 8, kind: input, shape index: {}]   ;;  %s8190_s9 = inlined_call_operand.hbm [shape: f32[4,1,128], index: 9, kind: input, shape index: {}]   ;;  %s8191_s10 = inlined_call_operand.hbm [shape: bf16[4,128,2048], index: 10, kind: input, shape index: {}]   ;;  %s8192_s11 = inlined_call_operand.hbm [shape: f32[4,1,2048], index: 11, kind: input, shape index: {}]   ;;  %s8193_s12 = inlined_call_operand.hbm [shape: bf16[4,2048,128], index: 12, kind: input, shape index: {}]   ;;  %s8194_s13 = inlined_call_operand.hbm [shape: f32[4,1,128], index: 13, kind: input, shape index: {}]   ;;  %s8195_s14 = inlined_call_operand.hbm [shape: f32[4,1,128], index: 14, kind: input, shape index: {}]   ;;  %s8196_s15 = inlined_call_operand.hbm [shape: f32[4,1,128], index: 15, kind: input, shape index: {}]   ;;  %s8197_s16 = inlined_call_operand.hbm [shape: f32[16,128], index: 16, kind: output, shape index: {}]  }
   0x1   :  { %8235 = sst [smem:[#allocation37_spill]] %s8181_s0 }
   0x2   :  { %8236 = sst [smem:[#allocation38_spill]] %s8182_s1 }
   0x3   :  { %8237 = sst [smem:[#allocation39_spill]] %s8183_s2 }
   0x4   :  { %8238 = sst [smem:[#allocation40_spill]] %s8184_s3 }
   0x5   :  { %8239 = sst [smem:[#allocation41_spill]] %s8185_s4 }
   0x6   :  { %8240 = sst [smem:[#allocation42_spill]] %s8186_s5 }
   0x7   :  { %8241 = sst [smem:[#allocation43_spill]] %s8195_s14 }
   0x8   :  { %8242 = sst [smem:[#allocation44_spill]] %s8196_s15 }
   0x9   :  { %8243 = sst [smem:[#allocation45_spill]] %s8197_s16 }
   0xa   :  { %21 = vsyncpa [#allocation4], 0 }
   0xb   :  { %22 = vsyncpa [#allocation7], 0 }
   0xc   :  { %23 = vsyncpa [#allocation10], 0 }
   0xd   :  { %24 = vsyncpa [#allocation5], 0  ;;  %s7045_s21 = smov 0   ;;  %s7047_s22 = smov 0  }
   0xe   :  { %s7049_s23 = smov 0   ;;  %s7051_s24 = smov 0  }
   0xf LB: > { %8244 = sst [smem:[#allocation29_spill]] %s6918_s22  ;;  %s7064_s25 = sadd.s32 4294967295, %s6926_s24   ;;  %s6926_s24 = sphi %s7051_s24, %s8310_s24   ;;  %s6922_s23 = sphi %s7049_s23, %s8313_s23   ;;  %s6918_s22 = sphi %s7047_s22, %s8312_s22   ;;  %s6914_s21 = sphi %s7045_s21, %s8311_s21  }
  0x10   : > { %8245 = sst [smem:[#allocation30_spill]] %s6922_s23  ;;  %s7067_s26 = sadd.s32 1, %s6926_s24  }
  0x11   : > { %8246 = sst [smem:[#allocation31_spill]] %s7064_s25  ;;  %s118_s27 = ssub.s32 %s6926_s24, %s7067_s26 }
  0x12   : > { %8247 = sst [smem:[#allocation32_spill]] %s7067_s26  ;;  %s121_s28 = sadd.s32 1, %s6922_s23 }
  0x13   : > { %p119_p0 = scmp.eq.s32.totalorder %s118_s27, 0  ;;  %p128_p1 = scmp.ne.s32.totalorder %s6922_s23, %s6918_s22 }
  0x14   : > { %p129_p2 = scmp.eq.s32.totalorder %s6926_s24, 0  ;;  %p134_p3 = scmp.ne.s32.totalorder %s6918_s22, %s6914_s21 }
  0x15   : > { %s7077_s29 = scalar_select %p119_p0, %s6922_s23, %s121_s28  }
  0x16   : > { %p7079_p4 = por %p129_p2, %p128_p1  ;;  %p8209_p5 = scmp.eq.s32.totalorder %s7064_s25, 0 }
  0x17   : > { %8248 = sst [smem:[#allocation33_spill]] %s7077_s29  ;;  %p5232_p6 = scmp.ge.s32.totalorder %s6926_s24, 1 }
  0x18   : > { %p452_p7 = scmp.lt.s32.totalorder %s6926_s24, 5  ;;  %p7088_p8 = por %p8209_p5, %p134_p3 }
  0x19   : > { %s6928_s18 = smov [#allocation3]   ;;  %p6094_p13 = scmp.lt.s32.totalorder %s6926_s24, 4 }
  0x1a   : > { %s8250_s0 = scalar_select %p7088_p8, 1, 0 }
  0x1b   : > { %p7093_p10 = pnand %p5232_p6, %p452_p7  ;;  %s464_s19 = sshll.u32 %s6928_s18, 4  ;;  %s465_s19 = int_to_ptr.vmem [resolvable:$true] %s464_s19 }
  0x1c   : > { %8251 = sst [smem:[#allocation34_spill]] %s8250_s0  ;;  %s7107_s21 = sand.u32 1, %s6922_s23  }
  0x1d   : > { %s8252_s17 = scalar_select %p7093_p10, 1, 0 }
  0x1e   : > { %p6040_p11 = pneg %p7093_p10  ;;  %s513_s27 = sand.u32 1, %s6926_s24  }
  0x1f   : > { %8253 = sst [smem:[#allocation35_spill]] %s8252_s17  ;;  %p7112_p0 = pnand %p6094_p13, %p7079_p4 }
  0x20   : > { %p7101_p12 = pnand %p6040_p11, %p8209_p5  ;;  %s8257_s26 = sld [smem:[#allocation37_spill]] }
  0x21   : > { %s8256_s28 = scalar_select %p7112_p0, 1, 0 }
  0x22   : > { %s8254_s20 = scalar_select %p7101_p12, 1, 0 }
  0x23   : > { %p7124_p2 = pneg %p7101_p12 }
  0x24   : > { %8255 = sst [smem:[#allocation36_spill]] %s8254_s20 }
  0x25   : > { %s8258_s25 = scalar_select %p7124_p2, 1, 0 }
  0x26   : > { %s6378_s16 = scalar_lea.hbm %s8257_s26, 256 }
  0x27   : > { %p6379_p1 = scmp.ne.s32.totalorder %s8257_s26, %s6378_s16  ;;  %p6385_p6 = scmp.lt.u32.totalorder %s6378_s16, %s8257_s26 }
  0x29   : > { %p6381_p3 = pnand %p7124_p2, %p6379_p1 }
  0x2b   : > { %p6382_p4 = pneg %p6381_p3 }
  0x2d   : > { %p6387_p7 = pnand %p6385_p6, %p6382_p4 }
  0x2f   : > { %6390 = shalt.err (!%p6387_p7)
}
  0x30   : > { %s6391_s29 = scalar_lea.vmem %s465_s19, 256  ;;  %p6399_p5 = scmp.lt.s32.totalorder %s465_s19, %s465_s19 }
  0x31   : > { %p6392_p11 = scmp.ne.s32.totalorder %s465_s19, %s6391_s29  ;;  %p6400_p8 = scmp.lt.s32.totalorder %s6391_s29, %s6391_s29 }
  0x33   : > { %p6394_p13 = pnand %p6392_p11, %p7124_p2  ;;  %p6401_p10 = por %p6400_p8, %p6399_p5 }
  0x35   : > { %p6395_p9 = pneg %p6394_p13 }
  0x37   : > { %p6402_p0 = pnand %p6401_p10, %p6395_p9 }
  0x39   : > { %6405 = shalt.err (!%p6402_p0)
}
  0x3a   : > { %s8224_s22 = smov 128   ;;  %s8225_s16 = smov 8  }
  0x3b   : > { %6043 = dma.hbm_to_vmem [thread:$0]  (!%p7101_p12), %s8257_s26, 256, %s465_s19, [#allocation4], %s8224_s22, %s8224_s22, %s8225_s16  }
  0x3c   : > { %s5990_s18 = smul.u32 192, %s7107_s21  ;;  %s8259_s4 = sld [smem:[#allocation41_spill]] }
  0x3d   : > { %s5991_s30 = smul.u32 3072, %s6926_s24  ;;  %s7153_s20 = scalar_lea.sflag [#allocation4], %s513_s27 }
  0x3e   : > { %s5992_s29 = smul.u32 3, %s7107_s21  ;;  %s517_s2 = scalar_lea.vmem [#allocation11], %s5990_s18 }
  0x3f   : > { %s524_s14 = sshll.u32 %s517_s2, 4  ;;  %p8260_p8 = scmp.ne.s32.totalorder %s8256_s28, 0  ;;  %s7151_s14 = int_to_ptr.vmem [resolvable:$true] %s524_s14 }
  0x41   : > { %p7159_p9 = pneg %p8260_p8 }
  0x42   : > { %s7149_s3 = scalar_lea.hbm %s8259_s4, %s5991_s30  ;;  %s6411_s0 = scalar_lea.hbm %s8259_s4, 12288 }
  0x43   : > { %s6406_s23 = scalar_lea.hbm %s7149_s3, 3072  ;;  %p6412_p1 = scmp.lt.u32.totalorder %s7149_s3, %s8259_s4 }
  0x44   : > { %p6407_p5 = scmp.ne.s32.totalorder %s7149_s3, %s6406_s23  ;;  %p6413_p3 = scmp.lt.u32.totalorder %s6411_s0, %s6406_s23 }
  0x45   : > { %s8261_s19 = scalar_select %p7159_p9, 1, 0 }
  0x46   : > { %p6409_p10 = pnand %p7159_p9, %p6407_p5  ;;  %p6414_p4 = por %p6413_p3, %p6412_p1 }
  0x47   : > { %p6415_p6 = scmp.lt.u32.totalorder %s6406_s23, %s7149_s3 }
  0x48   : > { %p6410_p0 = pneg %p6409_p10 }
  0x49   : > { %p6416_p7 = por %p6415_p6, %p6414_p4 }
  0x4b   : > { %p6417_p11 = pnand %p6416_p7, %p6410_p0 }
  0x4d   : > { %6420 = shalt.err (!%p6417_p11)
}
  0x4e   : > { %s6421_s27 = scalar_lea.vmem %s7151_s14, 3072  ;;  %s6931_s30 = smov [#allocation11]  }
  0x4f   : > { %p6422_p13 = scmp.ne.s32.totalorder %s7151_s14, %s6421_s27  ;;  %s6426_s15 = sshll.u32 %s6931_s30, 4  ;;  %s6427_s15 = int_to_ptr.vmem [resolvable:$false] %s6426_s15 }
  0x50   : > { %s6428_s17 = scalar_lea.vmem %s6427_s15, 6144  ;;  %p6429_p12 = scmp.lt.s32.totalorder %s7151_s14, %s6427_s15 }
  0x51   : > { %p6424_p5 = pnand %p6422_p13, %p7159_p9  ;;  %p6430_p2 = scmp.lt.s32.totalorder %s6428_s17, %s6421_s27 }
  0x53   : > { %p6425_p10 = pneg %p6424_p5  ;;  %p6431_p1 = por %p6430_p2, %p6429_p12 }
  0x55   : > { %p6432_p3 = pnand %p6431_p1, %p6425_p10 }
  0x57   : > { %6435 = shalt.err (!%p6432_p3)
}
  0x58   : > { %s6932_s23 = smov 192   ;;  %s6933_s0 = smov 12  }
  0x59   : > { %6056 = dma.hbm_to_vmem [thread:$0]  (!%p8260_p8), %s7149_s3, 3072, %s7151_s14, %s7153_s20, %s6932_s23, %s6932_s23, %s6933_s0  }
  0x5a   : > { %s5993_s2 = smul.u32 48, %s6926_s24  ;;  %s538_s18 = scalar_lea.vmem [#allocation12], %s5992_s29 }
  0x5b   : > { %s546_s30 = sshll.u32 %s538_s18, 4  ;;  %s5240_s27 = sshll.u32 %s7107_s21, 6  ;;  %s7186_s30 = int_to_ptr.vmem [resolvable:$true] %s546_s30 }
  0x5c   : > { %s8262_s5 = sld [smem:[#allocation42_spill]] }
  0x62   : > { %s544_s22 = scalar_lea.hbm %s8262_s5, %s5993_s2  ;;  %s6441_s3 = scalar_lea.hbm %s8262_s5, 192 }
  0x63   : > { %s6436_s16 = scalar_lea.hbm %s544_s22, 48  ;;  %p6442_p4 = scmp.lt.u32.totalorder %s544_s22, %s8262_s5 }
  0x64   : > { %p6437_p12 = scmp.ne.s32.totalorder %s544_s22, %s6436_s16  ;;  %p6443_p6 = scmp.lt.u32.totalorder %s6441_s3, %s6436_s16 }
  0x65   : > { %p6445_p11 = scmp.lt.u32.totalorder %s6436_s16, %s544_s22 }
  0x66   : > { %p6439_p2 = pnand %p6437_p12, %p7159_p9  ;;  %p6444_p7 = por %p6443_p6, %p6442_p4 }
  0x68   : > { %p6440_p0 = pneg %p6439_p2  ;;  %p6446_p13 = por %p6445_p11, %p6444_p7 }
  0x6a   : > { %p6447_p5 = pnand %p6446_p13, %p6440_p0 }
  0x6c   : > { %6450 = shalt.err (!%p6447_p5)
}
  0x6d   : > { %s6451_s29 = scalar_lea.vmem %s7186_s30, 48  ;;  %s6934_s4 = smov [#allocation12]  }
  0x6e   : > { %p6452_p10 = scmp.ne.s32.totalorder %s7186_s30, %s6451_s29  ;;  %s6456_s26 = sshll.u32 %s6934_s4, 4  ;;  %s6457_s26 = int_to_ptr.vmem [resolvable:$false] %s6456_s26 }
  0x6f   : > { %s6458_s0 = scalar_lea.vmem %s6457_s26, 96  ;;  %p6459_p12 = scmp.lt.s32.totalorder %s7186_s30, %s6457_s26 }
  0x70   : > { %p6454_p1 = pnand %p6452_p10, %p7159_p9  ;;  %p6460_p2 = scmp.lt.s32.totalorder %s6458_s0, %s6451_s29 }
  0x72   : > { %p6455_p3 = pneg %p6454_p1  ;;  %p6461_p4 = por %p6460_p2, %p6459_p12 }
  0x74   : > { %p6462_p6 = pnand %p6461_p4, %p6455_p3 }
  0x76   : > { %6465 = shalt.err (!%p6462_p6)
}
  0x77   : > { %6059 = dma.hbm_to_vmem [thread:$0]  (!%p8260_p8), %s544_s22, 48, %s7186_s30, %s7153_s20  }
  0x78   : > { %s5602_s16 = sshll.u32 %s6926_s24, 10  ;;  %s557_s2 = scalar_lea.vmem [#allocation13], %s5240_s27 }
  0x79   : > { %s564_s18 = sshll.u32 %s557_s2, 4  ;;  %s7215_s3 = scalar_lea.hbm %s8187_s6, %s5602_s16  ;;  %s7217_s18 = int_to_ptr.vmem [resolvable:$true] %s564_s18 }
  0x7a   : > { %s6466_s14 = scalar_lea.hbm %s7215_s3, 1024  ;;  %s6471_s27 = scalar_lea.hbm %s8187_s6, 4096 }
  0x7b   : > { %p6467_p0 = scmp.ne.s32.totalorder %s7215_s3, %s6466_s14  ;;  %p6472_p13 = scmp.lt.u32.totalorder %s7215_s3, %s8187_s6 }
  0x7c   : > { %p6473_p5 = scmp.lt.u32.totalorder %s6471_s27, %s6466_s14  ;;  %p6475_p1 = scmp.lt.u32.totalorder %s6466_s14, %s7215_s3 }
  0x7d   : > { %p6469_p7 = pnand %p6467_p0, %p7159_p9 }
  0x7e   : > { %p6474_p10 = por %p6473_p5, %p6472_p13 }
  0x7f   : > { %p6470_p11 = pneg %p6469_p7 }
  0x80   : > { %p6476_p3 = por %p6475_p1, %p6474_p10 }
  0x82   : > { %p6477_p12 = pnand %p6476_p3, %p6470_p11 }
  0x84   : > { %6480 = shalt.err (!%p6477_p12)
}
  0x85   : > { %s6481_s4 = scalar_lea.vmem %s7217_s18, 1024  ;;  %s6935_s26 = smov [#allocation13]  }
  0x86   : > { %p6482_p2 = scmp.ne.s32.totalorder %s7217_s18, %s6481_s4  ;;  %s6486_s0 = sshll.u32 %s6935_s26, 4  ;;  %s6487_s0 = int_to_ptr.vmem [resolvable:$false] %s6486_s0 }
  0x87   : > { %s6488_s16 = scalar_lea.vmem %s6487_s0, 2048  ;;  %p6489_p0 = scmp.lt.s32.totalorder %s7217_s18, %s6487_s0 }
  0x88   : > { %p6484_p4 = pnand %p6482_p2, %p7159_p9  ;;  %p6490_p7 = scmp.lt.s32.totalorder %s6488_s16, %s6481_s4 }
  0x8a   : > { %p6485_p6 = pneg %p6484_p4  ;;  %p6491_p13 = por %p6490_p7, %p6489_p0 }
  0x8c   : > { %p6492_p5 = pnand %p6491_p13, %p6485_p6 }
  0x8e   : > { %6495 = shalt.err (!%p6492_p5)
}
  0x8f   : > { %s6936_s2 = smov 64   ;;  %s8228_s15 = smov 4  }
  0x90   : > { %6062 = dma.hbm_to_vmem [thread:$0]  (!%p8260_p8), %s7215_s3, 1024, %s7217_s18, %s7153_s20, %s6936_s2, %s6936_s2, %s8228_s15  }
  0x91   : > { %s7245_s17 = sshll.u32 %s6926_s24, 4  ;;  %s577_s27 = scalar_lea.vmem [#allocation14], %s7107_s21 }
  0x92   : > { %s7251_s30 = scalar_lea.hbm %s8188_s7, %s7245_s17  ;;  %s584_s23 = sshll.u32 %s577_s27, 4  ;;  %s585_s23 = int_to_ptr.vmem [resolvable:$true] %s584_s23 }
  0x93   : > { %s6496_s29 = scalar_lea.hbm %s7251_s30, 16  ;;  %s6501_s4 = scalar_lea.hbm %s8188_s7, 64 }
  0x94   : > { %p6497_p11 = scmp.ne.s32.totalorder %s7251_s30, %s6496_s29  ;;  %p6502_p3 = scmp.lt.u32.totalorder %s7251_s30, %s8188_s7 }
  0x95   : > { %p6503_p12 = scmp.lt.u32.totalorder %s6501_s4, %s6496_s29  ;;  %p6505_p4 = scmp.lt.u32.totalorder %s6496_s29, %s7251_s30 }
  0x96   : > { %p6499_p10 = pnand %p6497_p11, %p7159_p9 }
  0x97   : > { %p6504_p2 = por %p6503_p12, %p6502_p3 }
  0x98   : > { %p6500_p1 = pneg %p6499_p10 }
  0x99   : > { %p6506_p6 = por %p6505_p4, %p6504_p2 }
  0x9b   : > { %p6507_p0 = pnand %p6506_p6, %p6500_p1 }
  0x9d   : > { %6510 = shalt.err (!%p6507_p0)
}
  0x9e   : > { %s6511_s16 = scalar_lea.vmem %s585_s23, 16  ;;  %s6938_s14 = smov [#allocation14]  }
  0x9f   : > { %p6512_p7 = scmp.ne.s32.totalorder %s585_s23, %s6511_s16  ;;  %s6516_s22 = sshll.u32 %s6938_s14, 4  ;;  %s6517_s22 = int_to_ptr.vmem [resolvable:$false] %s6516_s22 }
  0xa0   : > { %s6518_s27 = scalar_lea.vmem %s6517_s22, 32  ;;  %p6519_p11 = scmp.lt.s32.totalorder %s585_s23, %s6517_s22 }
  0xa1   : > { %p6514_p13 = pnand %p6512_p7, %p7159_p9  ;;  %p6520_p10 = scmp.lt.s32.totalorder %s6518_s27, %s6511_s16 }
  0xa3   : > { %p6515_p5 = pneg %p6514_p13  ;;  %p6521_p8 = por %p6520_p10, %p6519_p11 }
  0xa5   : > { %p6522_p3 = pnand %p6521_p8, %p6515_p5 }
  0xa7   : > { %6525 = shalt.err (!%p6522_p3)
}
  0xa8   : > { %p8263_p12 = scmp.ne.s32.totalorder %s8256_s28, 0  ;;  %s7276_s3 = scalar_lea.hbm %s8189_s8, %s7245_s17 }
  0xa9   : > { %s594_s4 = scalar_lea.vmem [#allocation15], %s7107_s21  ;;  %s6526_s0 = scalar_lea.hbm %s7276_s3, 16 }
  0xaa   : > { %6065 = dma.hbm_to_vmem [thread:$0]  (!%p8263_p12), %s7251_s30, 16, %s585_s23, %s7153_s20  }
  0xab   : > { %s601_s26 = sshll.u32 %s594_s4, 4  ;;  %p6527_p8 = scmp.ne.s32.totalorder %s7276_s3, %s6526_s0  ;;  %s602_s26 = int_to_ptr.vmem [resolvable:$true] %s601_s26 }
  0xac   : > { %s6531_s30 = scalar_lea.hbm %s8189_s8, 64  ;;  %p6532_p4 = scmp.lt.u32.totalorder %s7276_s3, %s8189_s8 }
  0xad   : > { %p6529_p1 = pnand %p6527_p8, %p7159_p9  ;;  %p6533_p6 = scmp.lt.u32.totalorder %s6531_s30, %s6526_s0 }
  0xae   : > { %p6535_p7 = scmp.lt.u32.totalorder %s6526_s0, %s7276_s3 }
  0xaf   : > { %p6530_p2 = pneg %p6529_p1  ;;  %p6534_p0 = por %p6533_p6, %p6532_p4 }
  0xb1   : > { %p6536_p13 = por %p6535_p7, %p6534_p0 }
  0xb3   : > { %p6537_p5 = pnand %p6536_p13, %p6530_p2 }
  0xb5   : > { %6540 = shalt.err (!%p6537_p5)
}
  0xb6   : > { %s6541_s27 = scalar_lea.vmem %s602_s26, 16  ;;  %s6939_s29 = smov [#allocation15]  }
  0xb7   : > { %p6542_p11 = scmp.ne.s32.totalorder %s602_s26, %s6541_s27  ;;  %s6546_s18 = sshll.u32 %s6939_s29, 4  ;;  %s6547_s18 = int_to_ptr.vmem [resolvable:$false] %s6546_s18 }
  0xb8   : > { %s6548_s4 = scalar_lea.vmem %s6547_s18, 32  ;;  %p6549_p8 = scmp.lt.s32.totalorder %s602_s26, %s6547_s18 }
  0xb9   : > { %p6544_p10 = pnand %p6542_p11, %p7159_p9  ;;  %p6550_p1 = scmp.lt.s32.totalorder %s6548_s4, %s6541_s27 }
  0xbb   : > { %p6545_p3 = pneg %p6544_p10  ;;  %p6551_p12 = por %p6550_p1, %p6549_p8 }
  0xbd   : > { %p6552_p4 = pnand %p6551_p12, %p6545_p3 }
  0xbf   : > { %6555 = shalt.err (!%p6552_p4)
}
  0xc0   : > { %p8264_p6 = scmp.ne.s32.totalorder %s8256_s28, 0  ;;  %s7301_s14 = scalar_lea.hbm %s8190_s9, %s7245_s17 }
  0xc1   : > { %s611_s30 = scalar_lea.vmem [#allocation16], %s7107_s21  ;;  %s8229_s22 = sshll.u32 %s7107_s21, 10 }
  0xc2   : > { %6068 = dma.hbm_to_vmem [thread:$0]  (!%p8264_p6), %s7276_s3, 16, %s602_s26, %s7153_s20  }
  0xc3   : > { %s618_s23 = sshll.u32 %s611_s30, 4  ;;  %s6556_s27 = scalar_lea.hbm %s7301_s14, 16  ;;  %s619_s23 = int_to_ptr.vmem [resolvable:$true] %s618_s23 }
  0xc4   : > { %p6557_p12 = scmp.ne.s32.totalorder %s7301_s14, %s6556_s27  ;;  %s6561_s26 = scalar_lea.hbm %s8190_s9, 64 }
  0xc5   : > { %p6562_p7 = scmp.lt.u32.totalorder %s7301_s14, %s8190_s9  ;;  %p6563_p13 = scmp.lt.u32.totalorder %s6561_s26, %s6556_s27 }
  0xc6   : > { %p6559_p2 = pnand %p6557_p12, %p7159_p9  ;;  %p6565_p11 = scmp.lt.u32.totalorder %s6556_s27, %s7301_s14 }
  0xc7   : > { %p6564_p5 = por %p6563_p13, %p6562_p7 }
  0xc8   : > { %p6560_p0 = pneg %p6559_p2 }
  0xc9   : > { %p6566_p10 = por %p6565_p11, %p6564_p5 }
  0xcb   : > { %p6567_p3 = pnand %p6566_p10, %p6560_p0 }
  0xcd   : > { %6570 = shalt.err (!%p6567_p3)
}
  0xce   : > { %s6571_s0 = scalar_lea.vmem %s619_s23, 16  ;;  %s6940_s16 = smov [#allocation16]  }
  0xcf   : > { %p6572_p8 = scmp.ne.s32.totalorder %s619_s23, %s6571_s0  ;;  %s6576_s30 = sshll.u32 %s6940_s16, 4  ;;  %s6577_s30 = int_to_ptr.vmem [resolvable:$false] %s6576_s30 }
  0xd0   : > { %s6578_s29 = scalar_lea.vmem %s6577_s30, 32  ;;  %p6579_p12 = scmp.lt.s32.totalorder %s619_s23, %s6577_s30 }
  0xd1   : > { %p6574_p1 = pnand %p6572_p8, %p7159_p9  ;;  %p6580_p2 = scmp.lt.s32.totalorder %s6578_s29, %s6571_s0 }
  0xd3   : > { %p6575_p4 = pneg %p6574_p1  ;;  %p6581_p6 = por %p6580_p2, %p6579_p12 }
  0xd5   : > { %p6582_p7 = pnand %p6581_p6, %p6575_p4 }
  0xd7   : > { %6585 = shalt.err (!%p6582_p7)
}
  0xd8   : > { %p8265_p13 = scmp.ne.s32.totalorder %s8256_s28, 0  ;;  %s5603_s27 = sshll.u32 %s6926_s24, 14 }
  0xd9   : > { %s7329_s18 = scalar_lea.hbm %s8191_s10, %s5603_s27  ;;  %s629_s4 = scalar_lea.vmem [#allocation17], %s8229_s22 }
  0xda   : > { %6071 = dma.hbm_to_vmem [thread:$0]  (!%p8265_p13), %s7301_s14, 16, %s619_s23, %s7153_s20  }
  0xdb   : > { %s636_s0 = sshll.u32 %s629_s4, 4  ;;  %s6586_s16 = scalar_lea.hbm %s7329_s18, 16384  ;;  %s7333_s0 = int_to_ptr.vmem [resolvable:$true] %s636_s0 }
  0xdc   : > { %p6587_p6 = scmp.ne.s32.totalorder %s7329_s18, %s6586_s16  ;;  %s6591_s30 = scalar_lea.hbm %s8191_s10, 65536 }
  0xdd   : > { %p6592_p11 = scmp.lt.u32.totalorder %s7329_s18, %s8191_s10  ;;  %p6593_p10 = scmp.lt.u32.totalorder %s6591_s30, %s6586_s16 }
  0xde   : > { %p6589_p0 = pnand %p6587_p6, %p7159_p9  ;;  %p6595_p8 = scmp.lt.u32.totalorder %s6586_s16, %s7329_s18 }
  0xdf   : > { %p6594_p3 = por %p6593_p10, %p6592_p11 }
  0xe0   : > { %p6590_p5 = pneg %p6589_p0 }
  0xe1   : > { %p6596_p1 = por %p6595_p8, %p6594_p3 }
  0xe3   : > { %p6597_p4 = pnand %p6596_p1, %p6590_p5 }
  0xe5   : > { %6600 = shalt.err (!%p6597_p4)
}
  0xe6   : > { %s6601_s26 = scalar_lea.vmem %s7333_s0, 16384  ;;  %s6941_s4 = smov [#allocation17]  }
  0xe7   : > { %p6602_p12 = scmp.ne.s32.totalorder %s7333_s0, %s6601_s26  ;;  %s6606_s14 = sshll.u32 %s6941_s4, 4  ;;  %s6607_s14 = int_to_ptr.vmem [resolvable:$false] %s6606_s14 }
  0xe8   : > { %s6608_s23 = scalar_lea.vmem %s6607_s14, 32768  ;;  %p6609_p6 = scmp.lt.s32.totalorder %s7333_s0, %s6607_s14 }
  0xe9   : > { %p6604_p2 = pnand %p6602_p12, %p7159_p9  ;;  %p6610_p0 = scmp.lt.s32.totalorder %s6608_s23, %s6601_s26 }
  0xeb   : > { %p6605_p7 = pneg %p6604_p2  ;;  %p6611_p11 = por %p6610_p0, %p6609_p6 }
  0xed   : > { %p6612_p10 = pnand %p6611_p11, %p6605_p7 }
  0xef   : > { %6615 = shalt.err (!%p6612_p10)
}
  0xf0   : > { %s6942_s16 = smov 1024   ;;  %s5249_s30 = sshll.u32 %s7107_s21, 4 }
  0xf1   : > { %6074 = dma.hbm_to_vmem [thread:$0]  (!%p8265_p13), %s7329_s18, 16384, %s7333_s0, %s7153_s20, %s6942_s16, %s6942_s16, %s6936_s2  }
  0xf2   : > { %s5604_s29 = sshll.u32 %s6926_s24, 8  ;;  %s650_s14 = scalar_lea.vmem [#allocation18], %s5249_s30 }
  0xf3   : > { %s7363_s26 = scalar_lea.hbm %s8192_s11, %s5604_s29  ;;  %s658_s23 = sshll.u32 %s650_s14, 4  ;;  %s659_s23 = int_to_ptr.vmem [resolvable:$true] %s658_s23 }
  0xf4   : > { %s7370_s5 = scalar_lea.hbm %s8193_s12, %s5603_s27  ;;  %s6616_s18 = scalar_lea.hbm %s7363_s26, 256 }
  0xf5   : > { %p6617_p5 = scmp.ne.s32.totalorder %s7363_s26, %s6616_s18  ;;  %s6621_s29 = scalar_lea.hbm %s8192_s11, 1024 }
  0xf6   : > { %p6622_p1 = scmp.lt.u32.totalorder %s7363_s26, %s8192_s11  ;;  %p6623_p4 = scmp.lt.u32.totalorder %s6621_s29, %s6616_s18 }
  0xf7   : > { %p6619_p3 = pnand %p6617_p5, %p7159_p9  ;;  %p6625_p2 = scmp.lt.u32.totalorder %s6616_s18, %s7363_s26 }
  0xf8   : > { %p6624_p12 = por %p6623_p4, %p6622_p1 }
  0xf9   : > { %p6620_p8 = pneg %p6619_p3 }
  0xfa   : > { %p6626_p7 = por %p6625_p2, %p6624_p12 }
  0xfc   : > { %p6627_p6 = pnand %p6626_p7, %p6620_p8 }
  0xfe   : > { %6630 = shalt.err (!%p6627_p6)
}
  0xff   : > { %s6631_s24 = scalar_lea.vmem %s659_s23, 256  ;;  %s6943_s15 = smov [#allocation18]  }
 0x100   : > { %p6632_p0 = scmp.ne.s32.totalorder %s659_s23, %s6631_s24  ;;  %s6636_s22 = sshll.u32 %s6943_s15, 4  ;;  %s6637_s22 = int_to_ptr.vmem [resolvable:$false] %s6636_s22 }
 0x101   : > { %s6638_s27 = scalar_lea.vmem %s6637_s22, 512  ;;  %p6639_p5 = scmp.lt.s32.totalorder %s659_s23, %s6637_s22 }
 0x102   : > { %p6634_p11 = pnand %p6632_p0, %p7159_p9  ;;  %p6640_p3 = scmp.lt.s32.totalorder %s6638_s27, %s6631_s24 }
 0x104   : > { %p6635_p10 = pneg %p6634_p11  ;;  %p6641_p13 = por %p6640_p3, %p6639_p5 }
 0x106   : > { %p6642_p1 = pnand %p6641_p13, %p6635_p10 }
 0x108   : > { %6645 = shalt.err (!%p6642_p1)
}
 0x109   : > { %p8266_p4 = scmp.ne.s32.totalorder %s8256_s28, 0  ;;  %s8267_s30 = sshll.u32 %s7107_s21, 10 }
 0x10a   : > { %s669_s14 = scalar_lea.vmem [#allocation19], %s8267_s30  ;;  %s7398_s29 = scalar_lea.hbm %s8194_s13, %s7245_s17 }
 0x10b   : > { %6077 = dma.hbm_to_vmem [thread:$0]  (!%p8266_p4), %s7363_s26, 256, %s659_s23, %s7153_s20  }
 0x10c   : > { %s676_s18 = sshll.u32 %s669_s14, 4  ;;  %s6646_s3 = scalar_lea.hbm %s7370_s5, 16384  ;;  %s7392_s18 = int_to_ptr.vmem [resolvable:$true] %s676_s18 }
 0x10d   : > { %p6647_p13 = scmp.ne.s32.totalorder %s7370_s5, %s6646_s3  ;;  %s6651_s15 = scalar_lea.hbm %s8193_s12, 65536 }
 0x10e   : > { %p6652_p2 = scmp.lt.u32.totalorder %s7370_s5, %s8193_s12  ;;  %p6653_p7 = scmp.lt.u32.totalorder %s6651_s15, %s6646_s3 }
 0x10f   : > { %p6649_p8 = pnand %p6647_p13, %p7159_p9  ;;  %p6655_p0 = scmp.lt.u32.totalorder %s6646_s3, %s7370_s5 }
 0x110   : > { %p6654_p6 = por %p6653_p7, %p6652_p2 }
 0x111   : > { %p6650_p12 = pneg %p6649_p8 }
 0x112   : > { %p6656_p11 = por %p6655_p0, %p6654_p6 }
 0x114   : > { %p6657_p10 = pnand %p6656_p11, %p6650_p12 }
 0x116   : > { %6660 = shalt.err (!%p6657_p10)
}
 0x117   : > { %s6661_s22 = scalar_lea.vmem %s7392_s18, 16384  ;;  %s6944_s27 = smov [#allocation19]  }
 0x118   : > { %p6662_p5 = scmp.ne.s32.totalorder %s7392_s18, %s6661_s22  ;;  %s6666_s30 = sshll.u32 %s6944_s27, 4  ;;  %s6667_s30 = int_to_ptr.vmem [resolvable:$false] %s6666_s30 }
 0x119   : > { %s6668_s14 = scalar_lea.vmem %s6667_s30, 32768  ;;  %p6669_p13 = scmp.lt.s32.totalorder %s7392_s18, %s6667_s30 }
 0x11a   : > { %p6664_p3 = pnand %p6662_p5, %p7159_p9  ;;  %p6670_p8 = scmp.lt.s32.totalorder %s6668_s14, %s6661_s22 }
 0x11c   : > { %p6665_p1 = pneg %p6664_p3  ;;  %p6671_p2 = por %p6670_p8, %p6669_p13 }
 0x11e   : > { %p6672_p7 = pnand %p6671_p2, %p6665_p1 }
 0x120   : > { %6675 = shalt.err (!%p6672_p7)
}
 0x121   : > { %s8268_s0 = smov 4   ;;  %s689_s16 = scalar_lea.vmem [#allocation20], %s7107_s21 }
 0x122   : > { %6080 = dma.hbm_to_vmem [thread:$0]  (!%p8266_p4), %s7370_s5, 16384, %s7392_s18, %s7153_s20, %s6936_s2, %s6936_s2, %s8268_s0  }
 0x123   : > { %s696_s3 = sshll.u32 %s689_s16, 4  ;;  %s6945_s4 = smov [#allocation6]   ;;  %s7426_s3 = int_to_ptr.vmem [resolvable:$true] %s696_s3 }
 0x124   : > { %s478_s24 = sshll.u32 %s6945_s4, 4  ;;  %s6676_s15 = scalar_lea.hbm %s7398_s29, 16  ;;  %s479_s24 = int_to_ptr.vmem [resolvable:$true] %s478_s24 }
 0x125   : > { %p6677_p12 = scmp.ne.s32.totalorder %s7398_s29, %s6676_s15  ;;  %s6681_s22 = scalar_lea.hbm %s8194_s13, 64 }
 0x126   : > { %p6682_p11 = scmp.lt.u32.totalorder %s7398_s29, %s8194_s13  ;;  %p6683_p10 = scmp.lt.u32.totalorder %s6681_s22, %s6676_s15 }
 0x127   : > { %p6679_p6 = pnand %p6677_p12, %p7159_p9  ;;  %p6685_p3 = scmp.lt.u32.totalorder %s6676_s15, %s7398_s29 }
 0x128   : > { %p6684_p5 = por %p6683_p10, %p6682_p11 }
 0x129   : > { %p6680_p0 = pneg %p6679_p6 }
 0x12a   : > { %p6686_p1 = por %p6685_p3, %p6684_p5 }
 0x12c   : > { %p6687_p13 = pnand %p6686_p1, %p6680_p0 }
 0x12e   : > { %6690 = shalt.err (!%p6687_p13)
}
 0x12f   : > { %s6691_s5 = scalar_lea.vmem %s7426_s3, 16  ;;  %s6946_s2 = smov [#allocation20]  }
 0x130   : > { %p6692_p8 = scmp.ne.s32.totalorder %s7426_s3, %s6691_s5  ;;  %s6696_s18 = sshll.u32 %s6946_s2, 4  ;;  %s6697_s18 = int_to_ptr.vmem [resolvable:$false] %s6696_s18 }
 0x131   : > { %s6698_s14 = scalar_lea.vmem %s6697_s18, 32  ;;  %p6699_p12 = scmp.lt.s32.totalorder %s7426_s3, %s6697_s18 }
 0x132   : > { %p6694_p2 = pnand %p6692_p8, %p7159_p9  ;;  %p6700_p6 = scmp.lt.s32.totalorder %s6698_s14, %s6691_s5 }
 0x134   : > { %p6695_p7 = pneg %p6694_p2  ;;  %p6701_p11 = por %p6700_p6, %p6699_p12 }
 0x136   : > { %p6702_p10 = pnand %p6701_p11, %p6695_p7 }
 0x138   : > { %6705 = shalt.err (!%p6702_p10)
}
 0x139   : > { %6083 = dma.hbm_to_vmem [thread:$0]  (!%p8266_p4), %s7398_s29, 16, %s7426_s3, %s7153_s20  }
 0x13a   : > { %s8269_s1 = sld [smem:[#allocation38_spill]]  ;;  %p8270_p5 = scmp.ne.s32.totalorder %s8258_s25, 0 }
 0x140   : > { %s6706_s4 = scalar_lea.hbm %s8269_s1, 128 }
 0x141   : > { %p6707_p0 = scmp.ne.s32.totalorder %s8269_s1, %s6706_s4  ;;  %p6713_p13 = scmp.lt.u32.totalorder %s6706_s4, %s8269_s1 }
 0x143   : > { %p6709_p3 = pnand %p6707_p0, %p8270_p5 }
 0x145   : > { %p6710_p1 = pneg %p6709_p3 }
 0x147   : > { %p6715_p8 = pnand %p6713_p13, %p6710_p1 }
 0x149   : > { %6718 = shalt.err (!%p6715_p8)
}
 0x14a   : > { %s6719_s27 = scalar_lea.vmem %s479_s24, 128  ;;  %p6727_p6 = scmp.lt.s32.totalorder %s479_s24, %s479_s24 }
 0x14b   : > { %p6720_p2 = scmp.ne.s32.totalorder %s479_s24, %s6719_s27  ;;  %p6728_p11 = scmp.lt.s32.totalorder %s6719_s27, %s6719_s27 }
 0x14d   : > { %p6722_p7 = pnand %p6720_p2, %p8270_p5  ;;  %p6729_p10 = por %p6728_p11, %p6727_p6 }
 0x14f   : > { %p6723_p12 = pneg %p6722_p7 }
 0x151   : > { %p6730_p4 = pnand %p6729_p10, %p6723_p12 }
 0x153   : > { %6733 = shalt.err (!%p6730_p4)
}
 0x154   : > { %s8271_s29 = sld [smem:[#allocation36_spill]]  ;;  %s8273_s18 = sld [smem:[#allocation43_spill]] }
 0x155   : > { %s706_s0 = scalar_lea.vmem [#allocation21], %s7107_s21 }
 0x156   : > { %s713_s16 = sshll.u32 %s706_s0, 4  ;;  %s714_s16 = int_to_ptr.vmem [resolvable:$true] %s713_s16 }
 0x15a   : > { %p8272_p0 = scmp.ne.s32.totalorder %s8271_s29, 0  ;;  %s7472_s14 = scalar_lea.hbm %s8273_s18, %s7245_s17 }
 0x15b   : > { %s6734_s4 = scalar_lea.hbm %s7472_s14, 16  ;;  %p6740_p13 = scmp.lt.u32.totalorder %s7472_s14, %s8273_s18 }
 0x15c   : > { %6046 = dma.hbm_to_vmem [thread:$0]  (!%p8272_p0), %s8269_s1, 128, %s479_s24, [#allocation7]  }
 0x15d   : > { %p6735_p4 = scmp.ne.s32.totalorder %s7472_s14, %s6734_s4  ;;  %s6739_s24 = scalar_lea.hbm %s8273_s18, 64 }
 0x15e   : > { %p6741_p8 = scmp.lt.u32.totalorder %s6739_s24, %s6734_s4  ;;  %p6743_p7 = scmp.lt.u32.totalorder %s6734_s4, %s7472_s14 }
 0x15f   : > { %p6737_p3 = pnand %p6735_p4, %p7159_p9 }
 0x160   : > { %p6742_p2 = por %p6741_p8, %p6740_p13 }
 0x161   : > { %p6738_p1 = pneg %p6737_p3 }
 0x162   : > { %p6744_p12 = por %p6743_p7, %p6742_p2 }
 0x164   : > { %p6745_p6 = pnand %p6744_p12, %p6738_p1 }
 0x166   : > { %6748 = shalt.err (!%p6745_p6)
}
 0x167   : > { %s6749_s27 = scalar_lea.vmem %s714_s16, 16  ;;  %s6947_s3 = smov [#allocation21]  }
 0x168   : > { %p6750_p11 = scmp.ne.s32.totalorder %s714_s16, %s6749_s27  ;;  %s6754_s30 = sshll.u32 %s6947_s3, 4  ;;  %s6755_s30 = int_to_ptr.vmem [resolvable:$false] %s6754_s30 }
 0x169   : > { %s6756_s5 = scalar_lea.vmem %s6755_s30, 32  ;;  %p6757_p3 = scmp.lt.s32.totalorder %s714_s16, %s6755_s30 }
 0x16a   : > { %p6752_p10 = pnand %p6750_p11, %p7159_p9  ;;  %p6758_p0 = scmp.lt.s32.totalorder %s6756_s5, %s6749_s27 }
 0x16c   : > { %p6753_p4 = pneg %p6752_p10  ;;  %p6759_p5 = por %p6758_p0, %p6757_p3 }
 0x16e   : > { %p6760_p8 = pnand %p6759_p5, %p6753_p4 }
 0x170   : > { %6763 = shalt.err (!%p6760_p8)
}
 0x171   : > { %p8274_p13 = scmp.ne.s32.totalorder %s8256_s28, 0  ;;  %s6948_s2 = smov [#allocation8]  }
 0x172   : > { %s489_s0 = sshll.u32 %s6948_s2, 4  ;;  %s6949_s4 = smov [#allocation9]   ;;  %s490_s0 = int_to_ptr.vmem [resolvable:$true] %s489_s0 }
 0x173   : > { %6086 = dma.hbm_to_vmem [thread:$0]  (!%p8274_p13), %s7472_s14, 16, %s714_s16, %s7153_s20  }
 0x174   : > { %s499_s15 = sshll.u32 %s6949_s4, 4  ;;  %s8275_s23 = sld [smem:[#allocation39_spill]]  ;;  %s500_s15 = int_to_ptr.vmem [resolvable:$true] %s499_s15 }
 0x175   : > { %p8277_p0 = scmp.ne.s32.totalorder %s8258_s25, 0 }
 0x17a   : > { %s8276_s3 = smov %s8275_s23  ;;  %s6764_s22 = scalar_lea.hbm %s8275_s23, 16 }
 0x17b   : > { %p6765_p5 = scmp.ne.s32.totalorder %s8276_s3, %s6764_s22  ;;  %p6771_p7 = scmp.lt.u32.totalorder %s6764_s22, %s8276_s3 }
 0x17d   : > { %p6767_p1 = pnand %p6765_p5, %p8277_p0 }
 0x17f   : > { %p6768_p2 = pneg %p6767_p1 }
 0x181   : > { %p6773_p12 = pnand %p6771_p7, %p6768_p2 }
 0x183   : > { %6776 = shalt.err (!%p6773_p12)
}
 0x184   : > { %s6777_s14 = scalar_lea.vmem %s490_s0, 16  ;;  %s6784_s16 = scalar_lea.vmem %s490_s0, 32 }
 0x185   : > { %p6778_p6 = scmp.ne.s32.totalorder %s490_s0, %s6777_s14  ;;  %p6785_p4 = scmp.lt.s32.totalorder %s490_s0, %s490_s0 }
 0x186   : > { %p6786_p3 = scmp.lt.s32.totalorder %s6784_s16, %s6777_s14 }
 0x187   : > { %p6780_p11 = pnand %p6778_p6, %p8277_p0 }
 0x188   : > { %p6787_p8 = por %p6786_p3, %p6785_p4 }
 0x189   : > { %p6781_p10 = pneg %p6780_p11 }
 0x18b   : > { %p6788_p13 = pnand %p6787_p8, %p6781_p10 }
 0x18d   : > { %6791 = shalt.err (!%p6788_p13)
}
 0x18e   : > { %p8278_p5 = scmp.ne.s32.totalorder %s8271_s29, 0  ;;  %s8279_s24 = sld [smem:[#allocation40_spill]] }
 0x190   : > { %6049 = dma.hbm_to_vmem [thread:$0]  (!%p8278_p5), %s8276_s3, 16, %s490_s0, [#allocation7]  }
 0x194   : > { %s8280_s30 = smov %s8279_s24  ;;  %s6792_s23 = scalar_lea.hbm %s8279_s24, 256 }
 0x195   : > { %p6793_p1 = scmp.ne.s32.totalorder %s8280_s30, %s6792_s23  ;;  %p6799_p13 = scmp.lt.u32.totalorder %s6792_s23, %s8280_s30 }
 0x197   : > { %p6795_p2 = pnand %p6793_p1, %p8277_p0 }
 0x199   : > { %p6796_p7 = pneg %p6795_p2 }
 0x19b   : > { %p6801_p12 = pnand %p6799_p13, %p6796_p7 }
 0x19d   : > { %6804 = shalt.err (!%p6801_p12)
}
 0x19e   : > { %s6805_s16 = scalar_lea.vmem %s500_s15, 256  ;;  %p6813_p4 = scmp.lt.s32.totalorder %s500_s15, %s500_s15 }
 0x19f   : > { %p6806_p6 = scmp.ne.s32.totalorder %s500_s15, %s6805_s16  ;;  %p6814_p3 = scmp.lt.s32.totalorder %s6805_s16, %s6805_s16 }
 0x1a1   : > { %p6808_p11 = pnand %p6806_p6, %p8277_p0  ;;  %p6815_p8 = por %p6814_p3, %p6813_p4 }
 0x1a3   : > { %p6809_p10 = pneg %p6808_p11 }
 0x1a5   : > { %p6816_p9 = pnand %p6815_p8, %p6809_p10 }
 0x1a7   : > { %6819 = shalt.err (!%p6816_p9)
}
 0x1a8   : > { %s8281_s0 = smov 8   ;;  %s8282_s2 = smov 128  }
 0x1a9   : > { %6052 = dma.hbm_to_vmem [thread:$0]  (!%p8278_p5), %s8280_s30, 256, %s500_s15, [#allocation10], %s8282_s2, %s8282_s2, %s8281_s0  }
 0x1aa   : > { %s8283_s24 = sld [smem:[#allocation44_spill]]  ;;  %s723_s29 = scalar_lea.vmem [#allocation22], %s7107_s21 }
 0x1ab   : > { %s730_s22 = sshll.u32 %s723_s29, 4  ;;  %p8285_p0 = scmp.ne.s32.totalorder %s8261_s19, 0  ;;  %s731_s22 = int_to_ptr.vmem [resolvable:$true] %s730_s22 }
 0x1b0   : > { %s8284_s27 = smov %s8283_s24  ;;  %s7536_s23 = scalar_lea.hbm %s8283_s24, %s7245_s17 }
 0x1b1   : > { %s6820_s5 = scalar_lea.hbm %s7536_s23, 16  ;;  %s6825_s15 = scalar_lea.hbm %s8284_s27, 64 }
 0x1b2   : > { %p6821_p9 = scmp.ne.s32.totalorder %s7536_s23, %s6820_s5  ;;  %p6826_p5 = scmp.lt.u32.totalorder %s7536_s23, %s8284_s27 }
 0x1b3   : > { %p6827_p7 = scmp.lt.u32.totalorder %s6825_s15, %s6820_s5  ;;  %p6829_p12 = scmp.lt.u32.totalorder %s6820_s5, %s7536_s23 }
 0x1b4   : > { %p6823_p1 = pnand %p6821_p9, %p8285_p0 }
 0x1b5   : > { %p6828_p13 = por %p6827_p7, %p6826_p5 }
 0x1b6   : > { %p6824_p2 = pneg %p6823_p1 }
 0x1b7   : > { %p6830_p6 = por %p6829_p12, %p6828_p13 }
 0x1b9   : > { %p6831_p11 = pnand %p6830_p6, %p6824_p2 }
 0x1bb   : > { %6834 = shalt.err (!%p6831_p11)
}
 0x1bc   : > { %s6835_s21 = scalar_lea.vmem %s731_s22, 16  ;;  %s6950_s17 = smov [#allocation22]  }
 0x1bd   : > { %p6836_p10 = scmp.ne.s32.totalorder %s731_s22, %s6835_s21  ;;  %s6840_s4 = sshll.u32 %s6950_s17, 4  ;;  %s6841_s4 = int_to_ptr.vmem [resolvable:$false] %s6840_s4 }
 0x1be   : > { %s6842_s1 = scalar_lea.vmem %s6841_s4, 32  ;;  %p6843_p8 = scmp.lt.s32.totalorder %s731_s22, %s6841_s4 }
 0x1bf   : > { %p6838_p4 = pnand %p6836_p10, %p8285_p0  ;;  %p6844_p9 = scmp.lt.s32.totalorder %s6842_s1, %s6835_s21 }
 0x1c1   : > { %p6839_p3 = pneg %p6838_p4  ;;  %p6845_p1 = por %p6844_p9, %p6843_p8 }
 0x1c3   : > { %p6846_p5 = pnand %p6845_p1, %p6839_p3 }
 0x1c5   : > { %6849 = shalt.err (!%p6846_p5)
}
 0x1c6   : > { %p8286_p7 = scmp.ne.s32.totalorder %s8256_s28, 0  ;;  %s8287_s25 = sld [smem:[#allocation35_spill]] }
 0x1c8   : > { %6089 = dma.hbm_to_vmem [thread:$0]  (!%p8286_p7), %s7536_s23, 16, %s731_s22, %s7153_s20  }
 0x1cc   : > { %p8288_p2 = scmp.ne.s32.totalorder %s8287_s25, 0 }
 0x1cd   : > { %s8289_s19 = sld [smem:[#allocation31_spill]] (!%p8288_p2) }
 0x1ce   : > { %739 = sbr.rel (%p8288_p2) target bundleno = 3815 (0xee7), region = 84 }
 0x1d3   : > { %p8290_p0 = scmp.eq.s32.totalorder (!%p8288_p2), %s8289_s19, 0 }
 0x1d5   : > { %6893 = dma.done.wait (%p8290_p0), [#allocation4], 256   ;;  %p8291_p13 = pmov %p8290_p0 }
 0x1d6   : > { %p8292_p12 = pmov %p8290_p0 }
 0x1d7   : > { %6895 = vsyncadd (%p8291_p13), [#allocation4], 4294967040 }
 0x1d8   : > { %6897 = dma.done.wait (%p8292_p12), [#allocation7], 144   ;;  %p8293_p6 = pmov %p8290_p0 }
 0x1d9   : > { %p8294_p11 = pmov %p8290_p0 }
 0x1da   : > { %6899 = vsyncadd (%p8293_p6), [#allocation7], 4294967152 }
 0x1db   : > { %6901 = dma.done.wait (%p8294_p11), [#allocation10], 256   ;;  %p8295_p10 = pmov %p8290_p0 }
 0x1dc   : > { %s8296_s20 = sld [smem:[#allocation29_spill]]  ;;  %s8297_s28 = sld [smem:[#allocation34_spill]] }
 0x1dd   : > { %6903 = vsyncadd (%p8295_p10), [#allocation10], 4294967040  ;;  %s757_s26 = sand.u32 1, %s8289_s19  }
 0x1de   : > { %s758_s29 = scalar_lea.sflag [#allocation4], %s757_s26 }
 0x1e2   : > { %s7573_s24 = sand.u32 1, %s8296_s20   ;;  %p8298_p4 = scmp.ne.s32.totalorder %s8297_s28, 0 }
 0x1e3   : > { %s5994_s23 = smul.u32 192, %s7573_s24 }
 0x1e5   : > { %s7576_s22 = scalar_lea.vmem [#allocation11], %s5994_s23 }
 0x1e6   : > { %6905 = dma.done.wait (%p8298_p4), %s758_s29, 37264  }
 0x1e7   : > { %6907 = vsyncadd (%p8298_p4), %s758_s29, 4294930032  ;;  %s5995_s5 = smul.u32 3, %s7573_s24  ;;  %s5263_s14 = sshll.u32 %s7573_s24, 6 }
 0x1e8   : > { %s5264_s16 = sshll.u32 %s7573_s24, 10  ;;  %s5265_s15 = sshll.u32 %s7573_s24, 4 }
 0x1e9   : > { %s7586_s0 = scalar_lea.vmem [#allocation12], %s5995_s5  ;;  %s7588_s2 = scalar_lea.vmem [#allocation13], %s5263_s14 }
 0x1ea   : > { %s787_s21 = scalar_lea.vmem [#allocation14], %s7573_s24  ;;  %s795_s17 = scalar_lea.vmem [#allocation15], %s7573_s24 }
 0x1eb   : > { %s803_s4 = scalar_lea.vmem [#allocation16], %s7573_s24  ;;  %s7593_s1 = scalar_lea.vmem [#allocation17], %s5264_s16 }
 0x1ec   : > { %s7595_s25 = scalar_lea.vmem [#allocation18], %s5265_s15  ;;  %s7597_s20 = scalar_lea.vmem [#allocation19], %s5264_s16 }
 0x1ed   : > { %s838_s28 = scalar_lea.vmem [#allocation20], %s7573_s24  ;;  %s846_s26 = scalar_lea.vmem [#allocation21], %s7573_s24 }
 0x1ee   : > { %s854_s23 = scalar_lea.vmem [#allocation22], %s7573_s24  ;;  %p8299_p3 = scmp.ne.s32.totalorder %s8289_s19, 0 }
 0x1ef   : > { %v954_v0 = vld [vmem:[#allocation6] sm:$0xff] (!%p8299_p3)  ;;  %v952_v1 = vld [vmem:[#allocation3] sm:$0xff] (!%p8299_p3)  ;;  %vm962_vm0 = vcmask (!%p8299_p3), 64512   ;;  %v953_v2 = vld [vmem:[#allocation3 + $0x8] sm:$0xff] (!%p8299_p3) }
 0x1f0   : > { %951 = sbr.rel (%p8299_p3) target bundleno = 714 (0x2ca), region = 152  ;;  %5835 = vmatprep.subr.mxu0 (!%p8299_p3), %v954_v0  ;;  %5837 = vmatprep.mubr.msk.f32.mxu0 (!%p8299_p3), %vm962_vm0, %v952_v1  ;;  %v5268_v3 = vld [vmem:[#allocation8] ss:$0 sm:$0xff] (!%p8299_p3) }
 0x1f1   : > { %5836 = vmatpush3.msra.mxu0 (!%p8299_p3), %v954_v0 }
 0x1f2   : > { %5838 = vmatmul.mubr.msk.f32.vlgmr.msra.gmra.mrb[0].mxu0 (!%p8299_p3), %vm962_vm0, %v953_v2 }
 0x2c5   : > { %v5839_v4 = vpop.f32.mrb[0].mxu0 }
 0x2c6   : > { %v1041_v5 = vadd.f32 %v5839_v4, %v5268_v3  ;;  %v1035_v6 = vpop.f32.mrb[1].mxu0 }
 0x2c7   : > { %v1036_v7 = vadd.f32 %v5268_v3, %v1035_v6 }
 0x2c8   : > { %1045 = vst [vmem:[#allocation2 + $0x8] sm:$0xff] %v1041_v5 }
 0x2c9   : > { %1044 = vst [vmem:[#allocation2] sm:$0xff] %v1036_v7 }
 0x2ca PF: > { %v6168_v8 = vld [vmem:[%s7576_s22 + $0x4] ss:$12 sps:$4 sm:$0xff]   ;;  %v6170_v9 = vld [vmem:[%s7576_s22] ss:$12 sps:$4 sm:$0xff]   ;;  %v6951_v10 = vmov 0   ;;  %v6952_v11 = vmov 0.0   ;;  %v1083_v37 = vlaneseq }
 0x2cb   : > { %1258 = vmatprep.mubr.bf16.mxu0 %v6951_v10  ;;  %5840 = vmatprep.subr.bf16.mxu1 %v6952_v11  ;;  %v6171_v12 = vld [vmem:[%s7576_s22 + $0x1c] ss:$12 sps:$4 sm:$0xff]   ;;  %v6173_v13 = vld [vmem:[%s7576_s22 + $0x18] ss:$12 sps:$4 sm:$0xff]   ;;  %v6174_v14 = vld [vmem:[%s7576_s22 + $0x34] ss:$12 sps:$4 sm:$0xff]  }
 0x2cc   : > { %1226 = vmatprep.subr.bf16.mxu0 %v6168_v8  ;;  %v6176_v15 = vld [vmem:[%s7576_s22 + $0x30] ss:$12 sps:$4 sm:$0xff]   ;;  %v6177_v16 = vld [vmem:[%s7576_s22 + $0x4c] ss:$12 sps:$4 sm:$0xff]   ;;  %v6179_v17 = vld [vmem:[%s7576_s22 + $0x48] ss:$12 sps:$4 sm:$0xff]  }
 0x2cd   : > { %1227 = vmatpush1.bf16.msra.mxu0 %v6170_v9  ;;  %v6180_v18 = vld [vmem:[%s7576_s22 + $0x64] ss:$12 sps:$4 sm:$0xff]   ;;  %v6192_v19 = vld [vmem:[%s7576_s22 + $0x8] ss:$12 sps:$4 sm:$0xff]   ;;  %v6193_v20 = vld [vmem:[%s7576_s22 + $0x20] ss:$12 sps:$4 sm:$0xff]  }
 0x2ce   : > { %1228 = vmatprep.subr.bf16.mxu0 %v6171_v12  ;;  %5841 = vmatpush3.bf16.msra.mxu1 %v6192_v19  ;;  %v6182_v21 = vld [vmem:[%s7576_s22 + $0x60] ss:$12 sps:$4 sm:$0xff]   ;;  %v6183_v22 = vld [vmem:[%s7576_s22 + $0x7c] ss:$12 sps:$4 sm:$0xff]   ;;  %v6185_v23 = vld [vmem:[%s7576_s22 + $0x78] ss:$12 sps:$4 sm:$0xff]  }
 0x2cf   : > { %5842 = vmatprep.subr.bf16.mxu1 %v6952_v11  ;;  %v6186_v24 = vld [vmem:[%s7576_s22 + $0x94] ss:$12 sps:$4 sm:$0xff]   ;;  %v6194_v25 = vld [vmem:[%s7576_s22 + $0x38] ss:$12 sps:$4 sm:$0xff]   ;;  %v6195_v26 = vld [vmem:[%s7576_s22 + $0x50] ss:$12 sps:$4 sm:$0xff]  }
 0x2d0   : > { %v6188_v27 = vld [vmem:[%s7576_s22 + $0x90] ss:$12 sps:$4 sm:$0xff]   ;;  %v6189_v28 = vld [vmem:[%s7576_s22 + $0xac] ss:$12 sps:$4 sm:$0xff]   ;;  %v6196_v29 = vld [vmem:[%s7576_s22 + $0x68] ss:$12 sps:$4 sm:$0xff]  }
 0x2d1   : > { %1229 = vmatpush1.bf16.msra.mxu0 %v6173_v13  ;;  %v6191_v30 = vld [vmem:[%s7576_s22 + $0xa8] ss:$12 sps:$4 sm:$0xff]   ;;  %v6197_v33 = vld [vmem:[%s7576_s22 + $0x80] ss:$12 sps:$4 sm:$0xff]   ;;  %v6198_v35 = vld [vmem:[%s7576_s22 + $0x98] ss:$12 sps:$4 sm:$0xff]  }
 0x2d2   : > { %1230 = vmatprep.subr.bf16.mxu0 %v6174_v14  ;;  %5843 = vmatpush3.bf16.msra.mxu1 %v6193_v20  ;;  %v1046_v31 = vld [vmem:[#allocation2] sm:$0xff]  ;;  %v1047_v32 = vld [vmem:[#allocation2 + $0x8] sm:$0xff]  ;;  %vm6953_vm1 = vmmov 0   ;;  %v7639_v38 = vshrl.u32 %v1083_v37, 7  ;;  %v1081_v40 = vld [vmem:[%s7586_s0] sm:$0x7] }
 0x2d3   : > { %5844 = vmatprep.subr.bf16.mxu1 %v6952_v11  ;;  %v1048_v34 = vpack.c.bf16 %v1047_v32, %v1046_v31  ;;  %v6199_v36 = vld [vmem:[%s7576_s22 + $0xb0] ss:$12 sps:$4 sm:$0xff]   ;;  %5856 = vmatprep.mubr.msk.bf16.mxu1 %vm6953_vm1, %v6952_v11  ;;  %vm1316_vm2 = vcmask 261120   ;;  %s6954_s19 = smov 96   ;;  %v1313_v2 = vand.u32 127, %v1083_v37  ;;  %vm1404_vm0 = vcmask 130048  }
 0x2d4   : > { %v7642_v39 = vsub.s32 0, %v7639_v38  ;;  %v7646_v41 = vsub.s32 1, %v7639_v38  ;;  %vm7658_vm3 = vmpackc.low %vm1316_vm2, %vm1316_vm2  ;;  %v7674_v57 = vsub.s32 2, %v7639_v38  ;;  %s6955_s29 = smov 32   ;;  %s6956_s22 = smov 64   ;;  %v6203_v3 = vld [vmem:[%s7588_s2 + $0x18] sm:$0xff]  }
 0x2d5   : > { %1231 = vmatpush1.bf16.msra.mxu0 %v6176_v15  ;;  %vm1829_vm4 = vcmp.ge.s32.totalorder %v1313_v2, 64  ;;  %vm1830_vm5 = vcmp.lt.s32.totalorder %v1313_v2, 96  ;;  %vm2032_vm7 = vcmp.ge.s32.totalorder %v1313_v2, 96  ;;  %vm1547_vm10 = vcmp.ge.s32.totalorder %v1313_v2, 32  ;;  %v7703_v15 = vld [vmem:[#allocation9 + $0x8] sm:$0xff]  ;;  %s8306_s5 = sld [smem:[#allocation31_spill]] }
 0x2d6   : > { %1232 = vmatprep.subr.bf16.mxu0 %v6177_v16  ;;  %5845 = vmatpush3.bf16.msra.mxu1 %v6194_v25  ;;  %v1086_v42 = vrot.slane %v1081_v40, %v7642_v39  ;;  %v1090_v44 = vrot.slane %v1081_v40, %v7646_v41  ;;  %v1094_v58 = vrot.slane %v1081_v40, %v7674_v57  ;;  %vm1831_vm6 = vmand %vm1829_vm4, %vm1830_vm5  ;;  %vm1548_vm11 = vcmp.lt.s32.totalorder %v1313_v2, 64  ;;  %v7705_v16 = vld [vmem:[#allocation9] sm:$0xff] }
 0x2d7   : > { %5846 = vmatprep.subr.bf16.mxu1 %v6952_v11  ;;  %vm5967_vm8 = vmpackc.low %vm1831_vm6, %vm1831_vm6  ;;  %vm1428_vm14 = vcmp.lt.s32.totalorder %v1313_v2, 32 }
 0x2d8   : > { %vm7681_vm9 = vmpackc.low %vm2032_vm7, %vm2032_vm7 }
 0x2d9   : > { %1233 = vmatpush1.bf16.msra.mxu0 %v6179_v17  ;;  %vm1549_vm12 = vmand %vm1547_vm10, %vm1548_vm11 }
 0x2da   : > { %1234 = vmatprep.subr.bf16.mxu0 %v6180_v18  ;;  %5847 = vmatpush3.bf16.msra.mxu1 %v6195_v26  ;;  %vm5949_vm13 = vmpackc.low %vm1549_vm12, %vm1549_vm12 }
 0x2db   : > { %5848 = vmatprep.subr.bf16.mxu1 %v6952_v11  ;;  %vm7694_vm15 = vmpackc.low %vm1428_vm14, %vm1428_vm14  ;;  %p5597_p8 = scmp.ne.s32.totalorder %s8306_s5, 3 }
 0x2dd   : > { %1235 = vmatpush1.bf16.msra.mxu0 %v6182_v21 }
 0x2de   : > { %1236 = vmatprep.subr.bf16.mxu0 %v6183_v22  ;;  %5849 = vmatpush3.bf16.msra.mxu1 %v6196_v29 }
 0x2df   : > { %5850 = vmatprep.subr.bf16.mxu1 %v6952_v11 }
 0x2e1   : > { %1237 = vmatpush1.bf16.msra.mxu0 %v6185_v23 }
 0x2e2   : > { %1238 = vmatprep.subr.bf16.mxu0 %v6186_v24  ;;  %5851 = vmatpush3.bf16.msra.mxu1 %v6197_v33 }
 0x2e3   : > { %5852 = vmatprep.subr.bf16.mxu1 %v6952_v11 }
 0x2e5   : > { %1239 = vmatpush1.bf16.msra.mxu0 %v6188_v27 }
 0x2e6   : > { %1240 = vmatprep.subr.bf16.mxu0 %v6189_v28  ;;  %5853 = vmatpush3.bf16.msra.mxu1 %v6198_v35 }
 0x2e7   : > { %5854 = vmatprep.subr.bf16.mxu1 %v6952_v11 }
 0x2e9   : > { %1241 = vmatpush1.bf16.msra.mxu0 %v6191_v30 }
 0x2ea   : > { %5855 = vmatpush3.bf16.msra.mxu1 %v6199_v36 }
 0x2ec   : > { %1259 = vmatmul.mubr.bf16.vlgmr.msra.gmra.mrb[0].mxu0 %v1048_v34 }
 0x2ed   : > { %5857 = vmatmul.mubr.bf16.vlgmr.msra.gmra.mrb[0].mxu1 %v1048_v34 }
 0x3bf   : > { %v1260_v43 = vpop.f32.mrb[0].mxu0 }
 0x3c0   : > { %v1261_v45 = vadd.f32 %v1260_v43, %v1086_v42  ;;  %v1262_v46 = vpop.f32.mrb[1].mxu0  ;;  %v1303_v59 = vpop.f32.mrb[0].mxu1 }
 0x3c1   : > { %v1264_v47 = vpop.f32.mrb[2].mxu0  ;;  %v1263_v51 = vadd.f32 %v1262_v46, %v1090_v44  ;;  %v1304_v60 = vadd.f32 %v1303_v59, %v1094_v58  ;;  %v5858_v61 = vpop.f32.mrb[1].mxu1 }
 0x3c2   : > { %v7650_v48 = vmul.f32 0.17677669, %v1261_v45  ;;  %v1265_v49 = vadd.f32 %v1264_v47, %v1086_v42  ;;  %v1266_v50 = vpop.f32.mrb[3].mxu0  ;;  %v1306_v62 = vpop.f32.mrb[2].mxu1 }
 0x3c3   : > { %v1267_v52 = vadd.f32 %v1266_v50, %v1090_v44  ;;  %v1307_v63 = vadd.f32 %v1306_v62, %v1094_v58  ;;  %v5859_v0 = vpop.f32.mrb[3].mxu1 }
 0x3c4   : > { %v7652_v53 = vmul.f32 0.17677669, %v1265_v49  ;;  %5864 = vmatprep.mubr.msk.f32.mxu1 %vm1316_vm2, %v7650_v48 }
 0x3c5   : > { %v7662_v55 = vpack.i.bf16 %v1267_v52, %v1263_v51  ;;  %v5936_v56 = vpack.c.bf16 %v1267_v52, %v1263_v51  ;;  %v7677_v1 = vpack.c.bf16 %v1307_v63, %v1304_v60 }
 0x3c6   : > { %1436 = vrot.lane.b32.xlu1 %v7652_v53, %s6954_s19 }
 0x3c7   : > { %6154 = vrot.lane.b32.xlu0 %v7662_v55, %s6954_s19  ;;  %5938 = vmatprep.subr.msk.bf16.mxu1 %vm7658_vm3, %v5936_v56 }
 0x3c8   : > { %5941 = vmatpush3.bf16.xpose.msk.msra.mxu1 %vm7658_vm3, %v5936_v56  ;;  %5968 = vmatprep.subr.msk.bf16.mxu0 %vm5967_vm8, %v7677_v1 }
 0x3c9   : > { %5971 = vmatpush3.bf16.msk.msra.mxu0 %vm5967_vm8, %v7677_v1 }
 0x3ca   : > { %5980 = vmatprep.subr.msk.bf16.mxu0 %vm7681_vm9, %v7677_v1 }
 0x3cb   : > { %1434 = vrot.lane.b32.xlu0 %v7650_v48, %s6954_s19 }
 0x3cf   : > { %5865 = vmatmul.mubr.msk.f32.vlgmr.msra.gmra.mrb[4].mxu1 %vm1316_vm2, %v7652_v53 }
 0x438   : > { %v1437_v9 = vpop.permute.xlu1 %1436 }
 0x439   : > { %v6155_v4 = vpop.permute.xlu0 %6154 }
 0x43a   : > { %v6157_v5 = vunpack.i.h.bf16 %v6155_v4  ;;  %v6156_v6 = vunpack.i.l.bf16 %v6155_v4 }
 0x43c   : > { %v5942_v7 = vpack.c.bf16 %v6157_v5, %v6156_v6 }
 0x43d   : > { %v1435_v8 = vpop.permute.xlu0 %1434 }
 0x43e   : > { %5944 = vmatprep.subr.msk.bf16.mxu1 %vm7658_vm3, %v5942_v7  ;;  %5871 = vmatprep.mubr.msk.f32.mxu1 %vm1316_vm2, %v1435_v8 }
 0x43f   : > { %5947 = vmatpush3.bf16.xpose.msk.msra.mxu1 %vm7658_vm3, %v5942_v7 }
 0x440   : > { %5950 = vmatprep.subr.msk.bf16.mxu1 %vm5949_vm13, %v7677_v1 }
 0x446   : > { %5872 = vmatmul.mubr.msk.f32.vlgmr.msra.gmra.mrb[6].mxu1 %vm1316_vm2, %v1437_v9 }
 0x447   : > { %5953 = vmatpush3.bf16.msk.msra.mxu1 %vm5949_vm13, %v7677_v1 }
 0x448   : > { %5956 = vmatprep.subr.msk.bf16.mxu1 %vm7694_vm15, %v7677_v1 }
 0x4a2   : > { %v5866_v13 = vpop.f32.mrb[4].mxu1 }
 0x4a3   : > { %v1395_v14 = vpop.f32.mrb[5].mxu1  ;;  %v1401_v23 = vadd.f32 %v5866_v13, %v7703_v15 }
 0x4a4   : > { %v1396_v21 = vadd.f32 %v1395_v14, %v7705_v16 }
 0x4a5   : > { %v1408_v26 = vsel %vm1404_vm0, %v1401_v23, -inf }
 0x4a6   : > { %v1405_v25 = vsel %vm1404_vm0, %v1396_v21, -inf }
 0x519   : > { %v5873_v17 = vpop.f32.mrb[6].mxu1 }
 0x51a   : > { %v1522_v18 = vadd.f32 %v5873_v17, %v7703_v15  ;;  %v1516_v19 = vpop.f32.mrb[7].mxu1 }
 0x51b   : > { %v1517_v20 = vadd.f32 %v1516_v19, %v7705_v16 }
 0x51c   : > { %v1528_v22 = vsel %vm1404_vm0, %v1522_v18, -inf }
 0x51d   : > { %1529 = vmax.xlane.f32.xlu0 %v1528_v22  ;;  %v1525_v24 = vsel %vm1404_vm0, %v1517_v20, -inf }
 0x51e   : > { %1526 = vmax.xlane.f32.xlu1 %v1525_v24 }
 0x521   : > { %1406 = vmax.xlane.f32.xlu0 %v1405_v25 }
 0x522   : > { %1409 = vmax.xlane.f32.xlu1 %v1408_v26 }
 0x5aa   : > { %v1530_v27 = vpop.xlane.xlu0 %1529 }
 0x5ab   : > { %v1532_v28 = vsub.f32 %v1522_v18, %v1530_v27  ;;  %v1527_v29 = vpop.xlane.xlu1 %1526 }
 0x5ac   : > { %v1531_v30 = vsub.f32 %v1517_v20, %v1527_v29 }
 0x5ad   : > { %v1535_v31 = vmul.f32 1.442695, %v1532_v28 }
 0x5ae   : > { %v1533_v32 = vmul.f32 1.442695, %v1531_v30  ;;  %v1407_v33 = vpop.xlane.xlu0 %1406 }
 0x5af   : > { %6336 = vpow2.f32 %v1535_v31  ;;  %v1411_v34 = vsub.f32 %v1396_v21, %v1407_v33  ;;  %v1410_v35 = vpop.xlane.xlu1 %1409 }
 0x5b0   : > { %6338 = vpow2.f32 %v1533_v32  ;;  %v1412_v36 = vsub.f32 %v1401_v23, %v1410_v35 }
 0x5b1   : > { %v1413_v37 = vmul.f32 1.442695, %v1411_v34 }
 0x5b2   : > { %v1415_v40 = vmul.f32 1.442695, %v1412_v36 }
 0x5b3   : > { %6340 = vpow2.f32 %v1413_v37 }
 0x5b4   : > { %6342 = vpow2.f32 %v1415_v40 }
 0x5b9   : > { %v6337_v42 = vpop.eup %6336 }
 0x5ba   : > { %v6339_v43 = vpop.eup %6338  ;;  %v1540_v44 = vsel %vm1404_vm0, %v6337_v42, 0.0 }
 0x5bb   : > { %1541 = vadd.xlane.f32.xlu1 %v1540_v44  ;;  %v1537_v45 = vsel %vm1404_vm0, %v6339_v43, 0.0 }
 0x5bc   : > { %1538 = vadd.xlane.f32.xlu0 %v1537_v45 }
 0x5bd   : > { %v6341_v46 = vpop.eup %6340 }
 0x5be   : > { %v6343_v47 = vpop.eup %6342  ;;  %v1417_v49 = vsel %vm1404_vm0, %v6341_v46, 0.0 }
 0x5bf   : > { %v1420_v50 = vsel %vm1404_vm0, %v6343_v47, 0.0 }
 0x5c0   : > { %1421 = vadd.xlane.f32.xlu1 %v1420_v50  ;;  %1418 = vadd.xlane.f32.xlu0 %v1417_v49 }
 0x5d1   : > { %6164 = vrot.lane.b32.xlu1 %v7662_v55, %s6955_s29 }
 0x5d5   : > { %1716 = vrot.lane.b32.xlu1 %v7650_v48, %s6956_s22 }
 0x5d6   : > { %6159 = vrot.lane.b32.xlu0 %v7662_v55, %s6956_s22 }
 0x5d9   : > { %1919 = vrot.lane.b32.xlu1 %v7650_v48, %s6955_s29 }
 0x5da   : > { %1718 = vrot.lane.b32.xlu0 %v7652_v53, %s6956_s22 }
 0x5de   : > { %1921 = vrot.lane.b32.xlu0 %v7652_v53, %s6955_s29 }
 0x648   : > { %v1542_v51 = vpop.xlane.xlu1 %1541 }
 0x649   : > { %6344 = vrcp.f32 %v1542_v51  ;;  %v1539_v52 = vpop.xlane.xlu0 %1538 }
 0x64a   : > { %6346 = vrcp.f32 %v1539_v52 }
 0x64d   : > { %v1419_v56 = vpop.xlane.xlu0 %1418  ;;  %v1422_v58 = vpop.xlane.xlu1 %1421 }
 0x64e   : > { %6348 = vrcp.f32 %v1419_v56 }
 0x64f   : > { %6350 = vrcp.f32 %v1422_v58 }
 0x651   : > { %v6160_v59 = vpop.permute.xlu0 %6159  ;;  %v6165_v2 = vpop.permute.xlu1 %6164 }
 0x652   : > { %v6162_v62 = vunpack.i.h.bf16 %v6160_v59  ;;  %v6161_v63 = vunpack.i.l.bf16 %v6160_v59  ;;  %v6167_v6 = vunpack.i.h.bf16 %v6165_v2  ;;  %v6166_v7 = vunpack.i.l.bf16 %v6165_v2  ;;  %v6200_v2 = vld [vmem:[%s7588_s2] sm:$0xff]  }
 0x653   : > { %v6345_v60 = vpop.eup %6344 }
 0x654   : > { %v6347_v61 = vpop.eup %6346  ;;  %v1546_v0 = vmul.f32 %v6345_v60, %v6337_v42  ;;  %v5960_v48 = vpack.c.bf16 %v6162_v62, %v6161_v63  ;;  %v5972_v13 = vpack.c.bf16 %v6167_v6, %v6166_v7  ;;  %v6204_v6 = vld [vmem:[%s7588_s2 + $0x20] sm:$0xff]   ;;  %v6205_v7 = vld [vmem:[%s7588_s2 + $0x28] sm:$0xff]  }
 0x655   : > { %v1545_v55 = vmul.f32 %v6347_v61, %v6339_v43  ;;  %v1717_v9 = vpop.permute.xlu1 %1716  ;;  %v1719_v12 = vpop.permute.xlu0 %1718 }
 0x657   : > { %5878 = vmatprep.mubr.msk.f32.mxu1 %vm1404_vm0, %v1545_v55 }
 0x658   : > { %5879 = vmatmul.mubr.msk.f32.vlgmr.msra.gmra.mrb[8].mxu1 %vm1404_vm0, %v1546_v0  ;;  %v6349_v53 = vpop.eup %6348 }
 0x659   : > { %5959 = vmatpush3.bf16.msk.msra.mxu1 %vm7694_vm15, %v7677_v1  ;;  %v1425_v4 = vmul.f32 %v6349_v53, %v6341_v46  ;;  %v6351_v5 = vpop.eup %6350  ;;  %v1920_v14 = vpop.permute.xlu1 %1919 }
 0x65a   : > { %5962 = vmatprep.subr.msk.bf16.mxu1 %vm7658_vm3, %v5960_v48  ;;  %v1426_v8 = vmul.f32 %v6351_v5, %v6343_v47  ;;  %v1922_v17 = vpop.permute.xlu0 %1921  ;;  %v6201_v5 = vld [vmem:[%s7588_s2 + $0x8] sm:$0xff]  }
 0x65b   : > { %5885 = vmatprep.mubr.msk.f32.mxu1 %vm1404_vm0, %v1425_v4 }
 0x660   : > { %5886 = vmatmul.mubr.msk.f32.vlgmr.msra.gmra.mrb[8].mxu1 %vm1404_vm0, %v1426_v8  ;;  %v6206_v8 = vld [vmem:[%s7588_s2 + $0x30] sm:$0xff]  }
 0x661   : > { %5892 = vmatprep.mubr.msk.f32.mxu1 %vm1316_vm2, %v1717_v9  ;;  %v6207_v9 = vld [vmem:[%s7588_s2 + $0x38] sm:$0xff]  }
 0x662   : > { %5965 = vmatpush3.bf16.xpose.msk.msra.mxu1 %vm7658_vm3, %v5960_v48 }
 0x663   : > { %5974 = vmatprep.subr.msk.bf16.mxu1 %vm7658_vm3, %v5972_v13 }
 0x669   : > { %5893 = vmatmul.mubr.msk.f32.vlgmr.msra.gmra.mrb[10].mxu1 %vm1316_vm2, %v1719_v12 }
 0x66a   : > { %5977 = vmatpush3.bf16.xpose.msk.msra.mxu1 %vm7658_vm3, %v5972_v13  ;;  %5906 = vmatprep.mubr.msk.f32.mxu1 %vm1316_vm2, %v1920_v14 }
 0x671   : > { %5907 = vmatmul.mubr.msk.f32.vlgmr.msra.gmra.mrb[12].mxu1 %vm1316_vm2, %v1922_v17 }
 0x672   : > { %3163 = vmatprep.mubr.bf16.mxu1 %v6951_v10 }
 0x733   : > { %v7745_v18 = vpop.f32.mrb[8].mxu1 }
 0x734   : > { %v7747_v19 = vpop.f32.mrb[9].mxu1 }
 0x73c   : > { %v5894_v20 = vpop.f32.mrb[10].mxu1 }
 0x73d   : > { %v1804_v21 = vadd.f32 %v5894_v20, %v7703_v15  ;;  %v1798_v22 = vpop.f32.mrb[11].mxu1 }
 0x73e   : > { %v1799_v23 = vadd.f32 %v1798_v22, %v7705_v16 }
 0x73f   : > { %v1810_v54 = vsel %vm1404_vm0, %v1804_v21, -inf }
 0x740   : > { %1811 = vmax.xlane.f32.xlu0 %v1810_v54  ;;  %v1807_v24 = vsel %vm1404_vm0, %v1799_v23, -inf }
 0x741   : > { %1808 = vmax.xlane.f32.xlu1 %v1807_v24 }
 0x744   : > { %v5908_v25 = vpop.f32.mrb[12].mxu1 }
 0x745   : > { %v2007_v26 = vadd.f32 %v5908_v25, %v7703_v15  ;;  %v2001_v27 = vpop.f32.mrb[13].mxu1  ;;  %v6376_v25 = vld [vmem:[#allocation2] sm:$0xff] }
 0x746   : > { %v2002_v28 = vadd.f32 %v2001_v27, %v7705_v16 }
 0x747   : > { %v2013_v29 = vsel %vm1404_vm0, %v2007_v26, -inf }
 0x748   : > { %2014 = vmax.xlane.f32.xlu1 %v2013_v29  ;;  %v2010_v30 = vsel %vm1404_vm0, %v2002_v28, -inf  ;;  %v2287_v29 = vld [vmem:[%s7593_s1 + $0x40] sm:$0xff] }
 0x749   : > { %2011 = vmax.xlane.f32.xlu0 %v2010_v30  ;;  %v2280_v30 = vld [vmem:[%s7593_s1 + $0x8] sm:$0xff] }
 0x7cd   : > { %v1812_v31 = vpop.xlane.xlu0 %1811 }
 0x7ce   : > { %v1814_v32 = vsub.f32 %v1804_v21, %v1812_v31  ;;  %v1809_v33 = vpop.xlane.xlu1 %1808  ;;  %v5327_v21 = vld [vmem:[%s787_s21] ss:$0 sm:$0xff] }
 0x7cf   : > { %v1813_v34 = vsub.f32 %v1799_v23, %v1809_v33  ;;  %v2288_v33 = vld [vmem:[%s7593_s1 + $0x48] sm:$0xff] }
 0x7d0   : > { %v1817_v35 = vmul.f32 1.442695, %v1814_v32 }
 0x7d1   : > { %v1815_v36 = vmul.f32 1.442695, %v1813_v34  ;;  %v2295_v34 = vld [vmem:[%s7593_s1 + $0x80] sm:$0xff] }
 0x7d2   : > { %6352 = vpow2.f32 %v1817_v35  ;;  %v2303_v35 = vld [vmem:[%s7593_s1 + $0xc0] sm:$0xff] }
 0x7d3   : > { %6354 = vpow2.f32 %v1815_v36  ;;  %v5340_v36 = vcombine.low %v2280_v30, %v2288_v33 }
 0x7d5   : > { %v2015_v37 = vpop.xlane.xlu1 %2014 }
 0x7d6   : > { %v2017_v40 = vsub.f32 %v2007_v26, %v2015_v37  ;;  %v2012_v15 = vpop.xlane.xlu0 %2011  ;;  %v6377_v26 = vld [vmem:[#allocation2 + $0x8] sm:$0xff]  ;;  %v5341_v37 = vcombine.high %v2280_v30, %v2288_v33 }
 0x7d7   : > { %v2016_v42 = vsub.f32 %v2002_v28, %v2012_v15  ;;  %v2279_v28 = vld [vmem:[%s7593_s1] sm:$0xff]  ;;  %v2296_v15 = vld [vmem:[%s7593_s1 + $0x88] sm:$0xff] }
 0x7d8   : > { %v2020_v43 = vmul.f32 1.442695, %v2017_v40  ;;  %v5338_v31 = vcombine.low %v2279_v28, %v2287_v29  ;;  %v5339_v32 = vcombine.high %v2279_v28, %v2287_v29  ;;  %v5355_v40 = vcombine.high %v2295_v34, %v2303_v35  ;;  %v2384_v29 = vld [vmem:[%s7593_s1 + $0x348] sm:$0xff]  ;;  %v2391_v33 = vld [vmem:[%s7593_s1 + $0x380] sm:$0xff] }
 0x7d9   : > { %v2018_v16 = vmul.f32 1.442695, %v2016_v42  ;;  %v2304_v42 = vld [vmem:[%s7593_s1 + $0xc8] sm:$0xff] }
 0x7da   : > { %6356 = vpow2.f32 %v2020_v43  ;;  %3131 = vmatprep.subr.bf16.mxu1 %v5339_v32  ;;  %v5357_v43 = vcombine.high %v2296_v15, %v2304_v42 }
 0x7db   : > { %6358 = vpow2.f32 %v2018_v16  ;;  %3132 = vmatpush1.bf16.msra.mxu1 %v5338_v31  ;;  %v5354_v16 = vcombine.low %v2295_v34, %v2303_v35  ;;  %v2399_v34 = vld [vmem:[%s7593_s1 + $0x3c0] sm:$0xff]  ;;  %v2392_v35 = vld [vmem:[%s7593_s1 + $0x388] sm:$0xff] }
 0x7dc   : > { %v6353_v44 = vpop.eup %6352  ;;  %3133 = vmatprep.subr.bf16.mxu1 %v5355_v40  ;;  %v5450_v40 = vcombine.low %v2391_v33, %v2399_v34 }
 0x7dd   : > { %v6355_v45 = vpop.eup %6354  ;;  %v1822_v46 = vsel %vm1404_vm0, %v6353_v44, 0.0 }
 0x7de   : > { %1823 = vadd.xlane.f32.xlu1 %v1822_v46  ;;  %v1819_v47 = vsel %vm1404_vm0, %v6355_v45, 0.0 }
 0x7df   : > { %1820 = vadd.xlane.f32.xlu0 %v1819_v47  ;;  %3134 = vmatpush1.bf16.msra.mxu1 %v5354_v16  ;;  %v2289_v16 = vld [vmem:[%s7593_s1 + $0x50] sm:$0xff] }
 0x7e4   : > { %v6357_v49 = vpop.eup %6356 }
 0x7e5   : > { %v6359_v50 = vpop.eup %6358  ;;  %v2025_v51 = vsel %vm1404_vm0, %v6357_v49, 0.0 }
 0x7e6   : > { %2026 = vadd.xlane.f32.xlu1 %v2025_v51  ;;  %v2022_v52 = vsel %vm1404_vm0, %v6359_v50, 0.0 }
 0x7e7   : > { %2023 = vadd.xlane.f32.xlu0 %v2022_v52 }
 0x86b   : > { %v1824_v56 = vpop.xlane.xlu1 %1823 }
 0x86c   : > { %6360 = vrcp.f32 %v1824_v56  ;;  %v1821_v58 = vpop.xlane.xlu0 %1820 }
 0x86d   : > { %6362 = vrcp.f32 %v1821_v58  ;;  %v2311_v58 = vld [vmem:[%s7593_s1 + $0x100] sm:$0xff] }
 0x873   : > { %v2027_v59 = vpop.xlane.xlu1 %2026 }
 0x874   : > { %6364 = vrcp.f32 %v2027_v59  ;;  %v2024_v60 = vpop.xlane.xlu0 %2023  ;;  %v2319_v59 = vld [vmem:[%s7593_s1 + $0x140] sm:$0xff] }
 0x875   : > { %6366 = vrcp.f32 %v2024_v60  ;;  %v2312_v60 = vld [vmem:[%s7593_s1 + $0x108] sm:$0xff] }
 0x876   : > { %v6361_v61 = vpop.eup %6360 }
 0x877   : > { %v6363_v62 = vpop.eup %6362  ;;  %v1828_v55 = vmul.f32 %v6361_v61, %v6353_v44  ;;  %v5356_v44 = vcombine.low %v2296_v15, %v2304_v42  ;;  %v5371_v61 = vcombine.high %v2311_v58, %v2319_v59 }
 0x878   : > { %v1827_v63 = vmul.f32 %v6363_v62, %v6355_v45  ;;  %v2320_v62 = vld [vmem:[%s7593_s1 + $0x148] sm:$0xff] }
 0x879   : > { %3135 = vmatprep.subr.bf16.mxu1 %v5371_v61 }
 0x87a   : > { %5899 = vmatprep.mubr.msk.f32.mxu0 %vm1404_vm0, %v1827_v63  ;;  %v5370_v63 = vcombine.low %v2311_v58, %v2319_v59 }
 0x87b   : > { %5900 = vmatmul.mubr.msk.f32.vlgmr.msra.gmra.mrb[4].mxu0 %vm1404_vm0, %v1828_v55  ;;  %v5372_v55 = vcombine.low %v2312_v60, %v2320_v62 }
 0x87c   : > { %5983 = vmatpush3.bf16.msk.msra.mxu0 %vm7681_vm9, %v7677_v1  ;;  %v6202_v1 = vld [vmem:[%s7588_s2 + $0x10] sm:$0xff]   ;;  %3136 = vmatpush1.bf16.msra.mxu1 %v5370_v63 }
 0x87d   : > { %5916 = vmatprep.subr.bf16.mxu0 %v6952_v11 }
 0x87e   : > { %v6365_v0 = vpop.eup %6364 }
 0x87f   : > { %v6367_v48 = vpop.eup %6366  ;;  %v2031_v4 = vmul.f32 %v6365_v0, %v6357_v49  ;;  %v5373_v0 = vcombine.high %v2312_v60, %v2320_v62 }
 0x880   : > { %v2030_v53 = vmul.f32 %v6367_v48, %v6359_v50  ;;  %v2327_v48 = vld [vmem:[%s7593_s1 + $0x180] sm:$0xff] }
 0x882   : > { %5913 = vmatprep.mubr.msk.f32.mxu0 %vm1404_vm0, %v2030_v53  ;;  %v2335_v53 = vld [vmem:[%s7593_s1 + $0x1c0] sm:$0xff] }
 0x883   : > { %5914 = vmatmul.mubr.msk.f32.vlgmr.msra.gmra.mrb[4].mxu0 %vm1404_vm0, %v2031_v4  ;;  %v5387_v4 = vcombine.high %v2327_v48, %v2335_v53 }
 0x884   : > { %5917 = vmatpush3.bf16.msra.mxu0 %v6200_v2  ;;  %5932 = vmatprep.mubr.msk.bf16.mxu0 %vm6953_vm1, %v6952_v11  ;;  %v2328_v2 = vld [vmem:[%s7593_s1 + $0x188] sm:$0xff] }
 0x885   : > { %5918 = vmatprep.subr.bf16.mxu0 %v6952_v11  ;;  %3137 = vmatprep.subr.bf16.mxu1 %v5387_v4  ;;  %v5337_v4 = vld [vmem:[%s803_s4] ss:$0 sm:$0xff] }
 0x888   : > { %5919 = vmatpush3.bf16.msra.mxu0 %v6201_v5  ;;  %v2336_v5 = vld [vmem:[%s7593_s1 + $0x1c8] sm:$0xff] }
 0x889   : > { %5920 = vmatprep.subr.bf16.mxu0 %v6952_v11 }
 0x88c   : > { %5921 = vmatpush3.bf16.msra.mxu0 %v6202_v1  ;;  %v5386_v1 = vcombine.low %v2327_v48, %v2335_v53 }
 0x88d   : > { %5922 = vmatprep.subr.bf16.mxu0 %v6952_v11 }
 0x88e   : > { %3138 = vmatpush1.bf16.msra.mxu1 %v5386_v1  ;;  %v2297_v1 = vld [vmem:[%s7593_s1 + $0x90] sm:$0xff] }
 0x890   : > { %5923 = vmatpush3.bf16.msra.mxu0 %v6203_v3  ;;  %v5388_v3 = vcombine.low %v2328_v2, %v2336_v5 }
 0x891   : > { %5924 = vmatprep.subr.bf16.mxu0 %v6952_v11 }
 0x894   : > { %5925 = vmatpush3.bf16.msra.mxu0 %v6204_v6  ;;  %v5389_v6 = vcombine.high %v2328_v2, %v2336_v5 }
 0x895   : > { %5926 = vmatprep.subr.bf16.mxu0 %v6952_v11 }
 0x898   : > { %5927 = vmatpush3.bf16.msra.mxu0 %v6205_v7  ;;  %v2343_v7 = vld [vmem:[%s7593_s1 + $0x200] sm:$0xff] }
 0x899   : > { %5928 = vmatprep.subr.bf16.mxu0 %v6952_v11 }
 0x89c   : > { %5929 = vmatpush3.bf16.msra.mxu0 %v6206_v8  ;;  %v2351_v8 = vld [vmem:[%s7593_s1 + $0x240] sm:$0xff] }
 0x89d   : > { %5930 = vmatprep.subr.bf16.mxu0 %v6952_v11 }
 0x8a0   : > { %5931 = vmatpush3.bf16.msra.mxu0 %v6207_v9  ;;  %v2344_v9 = vld [vmem:[%s7593_s1 + $0x208] sm:$0xff] }
 0x8a1   : > { %3174 = vmatprep.subr.bf16.mxu0 %v5341_v37  ;;  %v2400_v37 = vld [vmem:[%s7593_s1 + $0x3c8] sm:$0xff] }
 0x8a2   : > { %v5452_v15 = vcombine.low %v2392_v35, %v2400_v37  ;;  %v5453_v42 = vcombine.high %v2392_v35, %v2400_v37  ;;  %v2361_v37 = vld [vmem:[%s7593_s1 + $0x290] sm:$0xff] }
 0x956   : > { %v5915_v13 = vpop.f32.mrb[4].mxu0 }
 0x957   : > { %v5984_v12 = vadd.f32 %v5915_v13, %v7745_v18  ;;  %v2111_v14 = vpop.f32.mrb[5].mxu0  ;;  %v5403_v13 = vcombine.high %v2343_v7, %v2351_v8 }
 0x958   : > { %v5985_v17 = vadd.f32 %v2111_v14, %v7747_v19  ;;  %v5402_v14 = vcombine.low %v2343_v7, %v2351_v8  ;;  %v2306_v7 = vld [vmem:[%s7593_s1 + $0xd8] sm:$0xff] }
 0x959   : > { %3139 = vmatprep.subr.bf16.mxu1 %v5403_v13 }
 0x95a   : > { %v2122_v20 = vpack.c.bf16 %v5984_v12, %v5985_v17  ;;  %v2352_v12 = vld [vmem:[%s7593_s1 + $0x248] sm:$0xff]  ;;  %3140 = vmatpush1.bf16.msra.mxu1 %v5402_v14  ;;  %v2321_v14 = vld [vmem:[%s7593_s1 + $0x150] sm:$0xff] }
 0x95b   : > { %v5404_v17 = vcombine.low %v2344_v9, %v2352_v12 }
 0x95c   : > { %5933 = vmatmul.mubr.bf16.vlgmr.msra.gmra.mrb[8].mxu0 %v2122_v20  ;;  %v5405_v20 = vcombine.high %v2344_v9, %v2352_v12 }
 0x95d   : > { %3206 = vmatprep.mubr.bf16.mxu0 %v6951_v10  ;;  %3175 = vmatpush1.bf16.msra.mxu0 %v5340_v36  ;;  %v5451_v36 = vcombine.high %v2391_v33, %v2399_v34 }
 0x95e   : > { %3176 = vmatprep.subr.bf16.mxu0 %v5357_v43  ;;  %v2281_v43 = vld [vmem:[%s7593_s1 + $0x10] sm:$0xff] }
 0x961   : > { %3177 = vmatpush1.bf16.msra.mxu0 %v5356_v44  ;;  %v2282_v44 = vld [vmem:[%s7593_s1 + $0x18] sm:$0xff] }
 0x962   : > { %3178 = vmatprep.subr.bf16.mxu0 %v5373_v0 }
 0x965   : > { %3179 = vmatpush1.bf16.msra.mxu0 %v5372_v55  ;;  %v5336_v55 = vld [vmem:[%s795_s17] ss:$0 sm:$0xff] }
 0x966   : > { %3180 = vmatprep.subr.bf16.mxu0 %v5389_v6  ;;  %v2298_v6 = vld [vmem:[%s7593_s1 + $0x98] sm:$0xff] }
 0x967   : > { %v5361_v12 = vcombine.high %v2298_v6, %v2306_v7 }
 0x969   : > { %3181 = vmatpush1.bf16.msra.mxu0 %v5388_v3  ;;  %v2305_v3 = vld [vmem:[%s7593_s1 + $0xd0] sm:$0xff] }
 0x96a   : > { %3182 = vmatprep.subr.bf16.mxu0 %v5405_v20  ;;  %v5359_v13 = vcombine.high %v2297_v1, %v2305_v3  ;;  %v2322_v20 = vld [vmem:[%s7593_s1 + $0x158] sm:$0xff] }
 0x96d   : > { %3183 = vmatpush1.bf16.msra.mxu0 %v5404_v17  ;;  %v2314_v17 = vld [vmem:[%s7593_s1 + $0x118] sm:$0xff] }
 0xa2f   : > { %v2228_v22 = vpop.f32.mrb[8].mxu0 }
 0xa30   : > { %v2229_v23 = vadd.f32 %v5327_v21, %v2228_v22  ;;  %v5934_v11 = vpop.f32.mrb[9].mxu0  ;;  %v2367_v22 = vld [vmem:[%s7593_s1 + $0x2c0] sm:$0xff] }
 0xa31   : > { %v2231_v54 = vpop.f32.mrb[10].mxu0 }
 0xa32   : > { %v2232_v18 = vadd.f32 %v5327_v21, %v2231_v54  ;;  %v5935_v24 = vpop.f32.mrb[11].mxu0  ;;  %v2235_v19 = vadd.f32 %v6376_v25, %v2229_v23  ;;  %v2359_v21 = vld [vmem:[%s7593_s1 + $0x280] sm:$0xff]  ;;  %v2360_v23 = vld [vmem:[%s7593_s1 + $0x288] sm:$0xff] }
 0xa33   : > { %v5419_v11 = vcombine.high %v2359_v21, %v2367_v22  ;;  %v2368_v54 = vld [vmem:[%s7593_s1 + $0x2c8] sm:$0xff] }
 0xa34   : > { %2239 = vadd.xlane.f32.xlu0 %v2235_v19  ;;  %v2236_v27 = vadd.f32 %v6377_v26, %v2232_v18  ;;  %v5418_v18 = vcombine.low %v2359_v21, %v2367_v22  ;;  %v5420_v24 = vcombine.low %v2360_v23, %v2368_v54  ;;  %v5421_v25 = vcombine.high %v2360_v23, %v2368_v54  ;;  %v2383_v26 = vld [vmem:[%s7593_s1 + $0x340] sm:$0xff]  ;;  %v2329_v54 = vld [vmem:[%s7593_s1 + $0x190] sm:$0xff] }
 0xa35   : > { %3141 = vmatprep.subr.bf16.mxu1 %v5419_v11  ;;  %v5358_v21 = vcombine.low %v2297_v1, %v2305_v3  ;;  %v5360_v22 = vcombine.low %v2298_v6, %v2306_v7  ;;  %v5377_v11 = vcombine.high %v2314_v17, %v2322_v20  ;;  %v2284_v1 = vld [vmem:[%s7593_s1 + $0x28] sm:$0xff] }
 0xa36   : > { %2241 = vadd.xlane.f32.xlu1 %v2236_v27  ;;  %3184 = vmatprep.subr.bf16.mxu0 %v5421_v25  ;;  %v2338_v25 = vld [vmem:[%s7593_s1 + $0x1d8] sm:$0xff]  ;;  %v2292_v3 = vld [vmem:[%s7593_s1 + $0x68] sm:$0xff] }
 0xa37   : > { %3142 = vmatpush1.bf16.msra.mxu1 %v5418_v18  ;;  %3185 = vmatpush1.bf16.msra.mxu0 %v5420_v24  ;;  %v2337_v18 = vld [vmem:[%s7593_s1 + $0x1d0] sm:$0xff]  ;;  %v2330_v24 = vld [vmem:[%s7593_s1 + $0x198] sm:$0xff] }
 0xa38   : > { %v5390_v33 = vcombine.low %v2329_v54, %v2337_v18  ;;  %v5392_v34 = vcombine.low %v2330_v24, %v2338_v25 }
 0xac1   : > { %v2240_v45 = vpop.xlane.xlu0 %2239 }
 0xac2   : > { %v2244_v46 = vmul.f32 0.0078125, %v2240_v45  ;;  %v5342_v45 = vcombine.low %v2281_v43, %v2289_v16 }
 0xac3   : > { %v2242_v47 = vpop.xlane.xlu1 %2241 }
 0xac4   : > { %v7799_v49 = vsub.f32 %v2235_v19, %v2244_v46  ;;  %v2245_v50 = vmul.f32 0.0078125, %v2242_v47  ;;  %v2375_v19 = vld [vmem:[%s7593_s1 + $0x300] sm:$0xff]  ;;  %v5343_v46 = vcombine.high %v2281_v43, %v2289_v16  ;;  %v2290_v47 = vld [vmem:[%s7593_s1 + $0x58] sm:$0xff] }
 0xac5   : > { %v5435_v28 = vcombine.high %v2375_v19, %v2383_v26  ;;  %v5434_v30 = vcombine.low %v2375_v19, %v2383_v26  ;;  %v5376_v26 = vcombine.low %v2314_v17, %v2322_v20  ;;  %v2300_v17 = vld [vmem:[%s7593_s1 + $0xa8] sm:$0xff] }
 0xac6   : > { %v7801_v51 = vsub.f32 %v2236_v27, %v2245_v50  ;;  %v2248_v52 = vmul.f32 %v7799_v49, %v7799_v49  ;;  %v2376_v27 = vld [vmem:[%s7593_s1 + $0x308] sm:$0xff]  ;;  %v5344_v50 = vcombine.low %v2282_v44, %v2290_v47 }
 0xac7   : > { %v5436_v31 = vcombine.low %v2376_v27, %v2384_v29  ;;  %v5437_v32 = vcombine.high %v2376_v27, %v2384_v29  ;;  %3143 = vmatprep.subr.bf16.mxu1 %v5435_v28  ;;  %v5391_v27 = vcombine.high %v2329_v54, %v2337_v18  ;;  %v5393_v28 = vcombine.high %v2330_v24, %v2338_v25  ;;  %v2345_v29 = vld [vmem:[%s7593_s1 + $0x210] sm:$0xff]  ;;  %v2308_v20 = vld [vmem:[%s7593_s1 + $0xe8] sm:$0xff]  ;;  %v2315_v54 = vld [vmem:[%s7593_s1 + $0x120] sm:$0xff] }
 0xac8   : > { %2250 = vadd.xlane.f32.xlu0 %v2248_v52  ;;  %v2249_v56 = vmul.f32 %v7801_v51, %v7801_v51  ;;  %3144 = vmatpush1.bf16.msra.mxu1 %v5434_v30  ;;  %v5345_v52 = vcombine.high %v2282_v44, %v2290_v47  ;;  %v2353_v30 = vld [vmem:[%s7593_s1 + $0x250] sm:$0xff]  ;;  %v2323_v18 = vld [vmem:[%s7593_s1 + $0x160] sm:$0xff]  ;;  %v2316_v24 = vld [vmem:[%s7593_s1 + $0x128] sm:$0xff] }
 0xac9   : > { %3186 = vmatprep.subr.bf16.mxu0 %v5437_v32  ;;  %3145 = vmatprep.subr.bf16.mxu1 %v5451_v36  ;;  %v2354_v32 = vld [vmem:[%s7593_s1 + $0x258] sm:$0xff]  ;;  %v5407_v35 = vcombine.high %v2345_v29, %v2353_v30  ;;  %v5406_v43 = vcombine.low %v2345_v29, %v2353_v30  ;;  %v2385_v47 = vld [vmem:[%s7593_s1 + $0x350] sm:$0xff]  ;;  %v2324_v25 = vld [vmem:[%s7593_s1 + $0x168] sm:$0xff] }
 0xaca   : > { %2252 = vadd.xlane.f32.xlu1 %v2249_v56  ;;  %3187 = vmatpush1.bf16.msra.mxu0 %v5436_v31  ;;  %v2346_v31 = vld [vmem:[%s7593_s1 + $0x218] sm:$0xff]  ;;  %v2331_v29 = vld [vmem:[%s7593_s1 + $0x1a0] sm:$0xff] }
 0xacb   : > { %3188 = vmatprep.subr.bf16.mxu0 %v5453_v42  ;;  %v5409_v36 = vcombine.high %v2346_v31, %v2354_v32  ;;  %v2370_v42 = vld [vmem:[%s7593_s1 + $0x2d8] sm:$0xff]  ;;  %v5408_v16 = vcombine.low %v2346_v31, %v2354_v32  ;;  %v2339_v30 = vld [vmem:[%s7593_s1 + $0x1e0] sm:$0xff]  ;;  %v2332_v31 = vld [vmem:[%s7593_s1 + $0x1a8] sm:$0xff] }
 0xacc   : > { %3146 = vmatpush1.bf16.msra.mxu1 %v5450_v40  ;;  %v2369_v40 = vld [vmem:[%s7593_s1 + $0x2d0] sm:$0xff]  ;;  %v2340_v32 = vld [vmem:[%s7593_s1 + $0x1e8] sm:$0xff] }
 0xacd   : > { %3217 = vmatprep.subr.bf16.mxu1 %v5343_v46  ;;  %v5423_v44 = vcombine.high %v2361_v37, %v2369_v40  ;;  %v2377_v46 = vld [vmem:[%s7593_s1 + $0x310] sm:$0xff] }
 0xace   : > { %3189 = vmatpush1.bf16.msra.mxu0 %v5452_v15  ;;  %v2362_v15 = vld [vmem:[%s7593_s1 + $0x298] sm:$0xff] }
 0xacf   : > { %3260 = vmatprep.subr.bf16.mxu0 %v5345_v52  ;;  %v2386_v52 = vld [vmem:[%s7593_s1 + $0x358] sm:$0xff] }
 0xb55   : > { %v2251_v56 = vpop.xlane.xlu0 %2250 }
 0xb56   : > { %v2254_v58 = vmul.f32 0.0078125, %v2251_v56  ;;  %v5422_v56 = vcombine.low %v2361_v37, %v2369_v40  ;;  %v2347_v37 = vld [vmem:[%s7593_s1 + $0x220] sm:$0xff] }
 0xb57   : > { %v2253_v59 = vpop.xlane.xlu1 %2252  ;;  %v2355_v40 = vld [vmem:[%s7593_s1 + $0x260] sm:$0xff] }
 0xb58   : > { %v2256_v60 = vadd.f32 1e-05, %v2254_v58  ;;  %v2255_v61 = vmul.f32 0.0078125, %v2253_v59  ;;  %v5424_v58 = vcombine.low %v2362_v15, %v2370_v42  ;;  %v5439_v59 = vcombine.high %v2377_v46, %v2385_v47 }
 0xb5a   : > { %6368 = vrsqrt.f32 %v2256_v60  ;;  %v2257_v62 = vadd.f32 1e-05, %v2255_v61  ;;  %v2393_v61 = vld [vmem:[%s7593_s1 + $0x390] sm:$0xff] }
 0xb5c   : > { %6370 = vrsqrt.f32 %v2257_v62  ;;  %v2401_v62 = vld [vmem:[%s7593_s1 + $0x3d0] sm:$0xff] }
 0xb5d   : > { %v5454_v6 = vcombine.low %v2393_v61, %v2401_v62 }
 0xb64   : > { %v6369_v63 = vpop.eup %6368 }
 0xb65   : > { %v2260_v0 = vmul.f32 %v6369_v63, %v7799_v49  ;;  %v2394_v63 = vld [vmem:[%s7593_s1 + $0x398] sm:$0xff] }
 0xb66   : > { %v6371_v48 = vpop.eup %6370 }
 0xb67   : > { %v2268_v53 = vmul.f32 %v5336_v55, %v2260_v0  ;;  %v2261_v2 = vmul.f32 %v6371_v48, %v7801_v51  ;;  %v2313_v51 = vld [vmem:[%s7593_s1 + $0x110] sm:$0xff]  ;;  %v5438_v0 = vcombine.low %v2377_v46, %v2385_v47  ;;  %v2363_v46 = vld [vmem:[%s7593_s1 + $0x2a0] sm:$0xff] }
 0xb68   : > { %v5375_v23 = vcombine.high %v2313_v51, %v2321_v14  ;;  %v5374_v19 = vcombine.low %v2313_v51, %v2321_v14  ;;  %v2299_v51 = vld [vmem:[%s7593_s1 + $0xa0] sm:$0xff] }
 0xb69   : > { %v2269_v5 = vmul.f32 %v5336_v55, %v2261_v2  ;;  %v7845_v8 = vadd.f32 %v5337_v4, %v2268_v53  ;;  %v2402_v55 = vld [vmem:[%s7593_s1 + $0x3d8] sm:$0xff]  ;;  %v5455_v53 = vcombine.high %v2393_v61, %v2401_v62  ;;  %v2307_v14 = vld [vmem:[%s7593_s1 + $0xe0] sm:$0xff] }
 0xb6a   : > { %v5457_v2 = vcombine.high %v2394_v63, %v2402_v55  ;;  %v5456_v7 = vcombine.low %v2394_v63, %v2402_v55  ;;  %v2371_v47 = vld [vmem:[%s7593_s1 + $0x2e0] sm:$0xff]  ;;  %v2380_v63 = vld [vmem:[%s7593_s1 + $0x328] sm:$0xff] }
 0xb6b   : > { %v7847_v9 = vadd.f32 %v5337_v4, %v2269_v5  ;;  %v2283_v4 = vld [vmem:[%s7593_s1 + $0x20] sm:$0xff]  ;;  %v2388_v55 = vld [vmem:[%s7593_s1 + $0x368] sm:$0xff] }
 0xb6c   : > { %v2291_v5 = vld [vmem:[%s7593_s1 + $0x60] sm:$0xff] }
 0xb6d   : > { %v7851_v49 = vpack.c.bf16 %v7847_v9, %v7845_v8  ;;  %v2379_v61 = vld [vmem:[%s7593_s1 + $0x320] sm:$0xff] }
 0xb6e   : > { %v2387_v62 = vld [vmem:[%s7593_s1 + $0x360] sm:$0xff] }
 0xb6f   : > { %3164 = vmatmul.mubr.bf16.vlgmr.msra.gmra.mrb[16].mxu1 %v7851_v49  ;;  %3207 = vmatmul.mubr.bf16.vlgmr.msra.gmra.mrb[12].mxu0 %v7851_v49 }
 0xb70   : > { %3218 = vmatpush1.bf16.msra.mxu1 %v5342_v45  ;;  %3261 = vmatpush1.bf16.msra.mxu0 %v5344_v50  ;;  %v5425_v45 = vcombine.high %v2362_v15, %v2370_v42  ;;  %v2378_v50 = vld [vmem:[%s7593_s1 + $0x318] sm:$0xff]  ;;  %v2348_v15 = vld [vmem:[%s7593_s1 + $0x228] sm:$0xff] }
 0xb71   : > { %3219 = vmatprep.subr.bf16.mxu1 %v5359_v13  ;;  %3262 = vmatprep.subr.bf16.mxu0 %v5361_v12  ;;  %v5441_v60 = vcombine.high %v2378_v50, %v2386_v52  ;;  %v5440_v48 = vcombine.low %v2378_v50, %v2386_v52  ;;  %v5347_v13 = vcombine.high %v2283_v4, %v2291_v5  ;;  %v2356_v42 = vld [vmem:[%s7593_s1 + $0x268] sm:$0xff] }
 0xb72   : > { %3249 = vmatprep.mubr.bf16.mxu1 %v6951_v10  ;;  %3292 = vmatprep.mubr.bf16.mxu0 %v6951_v10  ;;  %v5349_v12 = vcombine.high %v2284_v1, %v2292_v3  ;;  %v2364_v50 = vld [vmem:[%s7593_s1 + $0x2a8] sm:$0xff] }
 0xb73   : > { %v2372_v52 = vld [vmem:[%s7593_s1 + $0x2e8] sm:$0xff] }
 0xb74   : > { %3220 = vmatpush1.bf16.msra.mxu1 %v5358_v21  ;;  %3263 = vmatpush1.bf16.msra.mxu0 %v5360_v22  ;;  %v5346_v21 = vcombine.low %v2283_v4, %v2291_v5  ;;  %v5348_v22 = vcombine.low %v2284_v1, %v2292_v3  ;;  %v2395_v4 = vld [vmem:[%s7593_s1 + $0x3a0] sm:$0xff]  ;;  %v2396_v1 = vld [vmem:[%s7593_s1 + $0x3a8] sm:$0xff] }
 0xb75   : > { %3221 = vmatprep.subr.bf16.mxu1 %v5375_v23  ;;  %3264 = vmatprep.subr.bf16.mxu0 %v5377_v11  ;;  %v5363_v23 = vcombine.high %v2299_v51, %v2307_v14  ;;  %v5365_v11 = vcombine.high %v2300_v17, %v2308_v20  ;;  %v2403_v5 = vld [vmem:[%s7593_s1 + $0x3e0] sm:$0xff]  ;;  %v2404_v3 = vld [vmem:[%s7593_s1 + $0x3e8] sm:$0xff] }
 0xb78   : > { %3222 = vmatpush1.bf16.msra.mxu1 %v5374_v19  ;;  %3265 = vmatpush1.bf16.msra.mxu0 %v5376_v26  ;;  %v5362_v19 = vcombine.low %v2299_v51, %v2307_v14  ;;  %v5364_v26 = vcombine.low %v2300_v17, %v2308_v20  ;;  %v2285_v51 = vld [vmem:[%s7593_s1 + $0x30] sm:$0xff]  ;;  %v2286_v17 = vld [vmem:[%s7593_s1 + $0x38] sm:$0xff] }
 0xb79   : > { %3223 = vmatprep.subr.bf16.mxu1 %v5391_v27  ;;  %3266 = vmatprep.subr.bf16.mxu0 %v5393_v28  ;;  %v5379_v27 = vcombine.high %v2315_v54, %v2323_v18  ;;  %v5381_v28 = vcombine.high %v2316_v24, %v2324_v25  ;;  %v2293_v14 = vld [vmem:[%s7593_s1 + $0x70] sm:$0xff]  ;;  %v2294_v20 = vld [vmem:[%s7593_s1 + $0x78] sm:$0xff] }
 0xb7c   : > { %3224 = vmatpush1.bf16.msra.mxu1 %v5390_v33  ;;  %3267 = vmatpush1.bf16.msra.mxu0 %v5392_v34  ;;  %v5378_v33 = vcombine.low %v2315_v54, %v2323_v18  ;;  %v5380_v34 = vcombine.low %v2316_v24, %v2324_v25  ;;  %v2301_v54 = vld [vmem:[%s7593_s1 + $0xb0] sm:$0xff]  ;;  %v2302_v24 = vld [vmem:[%s7593_s1 + $0xb8] sm:$0xff] }
 0xb7d   : > { %3225 = vmatprep.subr.bf16.mxu1 %v5407_v35  ;;  %3268 = vmatprep.subr.bf16.mxu0 %v5409_v36  ;;  %v5395_v35 = vcombine.high %v2331_v29, %v2339_v30  ;;  %v5397_v36 = vcombine.high %v2332_v31, %v2340_v32  ;;  %v2309_v18 = vld [vmem:[%s7593_s1 + $0xf0] sm:$0xff]  ;;  %v2310_v25 = vld [vmem:[%s7593_s1 + $0xf8] sm:$0xff] }
 0xb80   : > { %3226 = vmatpush1.bf16.msra.mxu1 %v5406_v43  ;;  %3269 = vmatpush1.bf16.msra.mxu0 %v5408_v16  ;;  %v5394_v43 = vcombine.low %v2331_v29, %v2339_v30  ;;  %v5396_v16 = vcombine.low %v2332_v31, %v2340_v32  ;;  %v2317_v29 = vld [vmem:[%s7593_s1 + $0x130] sm:$0xff]  ;;  %v2318_v31 = vld [vmem:[%s7593_s1 + $0x138] sm:$0xff] }
 0xb81   : > { %3227 = vmatprep.subr.bf16.mxu1 %v5423_v44  ;;  %3270 = vmatprep.subr.bf16.mxu0 %v5425_v45  ;;  %v5411_v44 = vcombine.high %v2347_v37, %v2355_v40  ;;  %v5413_v45 = vcombine.high %v2348_v15, %v2356_v42  ;;  %v2325_v30 = vld [vmem:[%s7593_s1 + $0x170] sm:$0xff]  ;;  %v2326_v32 = vld [vmem:[%s7593_s1 + $0x178] sm:$0xff] }
 0xb84   : > { %3228 = vmatpush1.bf16.msra.mxu1 %v5422_v56  ;;  %3271 = vmatpush1.bf16.msra.mxu0 %v5424_v58  ;;  %v5410_v56 = vcombine.low %v2347_v37, %v2355_v40  ;;  %v5412_v58 = vcombine.low %v2348_v15, %v2356_v42  ;;  %v2333_v37 = vld [vmem:[%s7593_s1 + $0x1b0] sm:$0xff]  ;;  %v2334_v15 = vld [vmem:[%s7593_s1 + $0x1b8] sm:$0xff] }
 0xb85   : > { %3229 = vmatprep.subr.bf16.mxu1 %v5439_v59  ;;  %3272 = vmatprep.subr.bf16.mxu0 %v5441_v60  ;;  %v5427_v59 = vcombine.high %v2363_v46, %v2371_v47  ;;  %v5429_v60 = vcombine.high %v2364_v50, %v2372_v52  ;;  %v2341_v40 = vld [vmem:[%s7593_s1 + $0x1f0] sm:$0xff]  ;;  %v2342_v42 = vld [vmem:[%s7593_s1 + $0x1f8] sm:$0xff] }
 0xb88   : > { %3230 = vmatpush1.bf16.msra.mxu1 %v5438_v0  ;;  %3273 = vmatpush1.bf16.msra.mxu0 %v5440_v48  ;;  %v5426_v0 = vcombine.low %v2363_v46, %v2371_v47  ;;  %v5428_v48 = vcombine.low %v2364_v50, %v2372_v52  ;;  %v2349_v46 = vld [vmem:[%s7593_s1 + $0x230] sm:$0xff]  ;;  %v2350_v50 = vld [vmem:[%s7593_s1 + $0x238] sm:$0xff] }
 0xb89   : > { %3231 = vmatprep.subr.bf16.mxu1 %v5455_v53  ;;  %3274 = vmatprep.subr.bf16.mxu0 %v5457_v2  ;;  %v5443_v53 = vcombine.high %v2379_v61, %v2387_v62  ;;  %v5445_v2 = vcombine.high %v2380_v63, %v2388_v55  ;;  %v2357_v47 = vld [vmem:[%s7593_s1 + $0x270] sm:$0xff]  ;;  %v2358_v52 = vld [vmem:[%s7593_s1 + $0x278] sm:$0xff] }
 0xb8c   : > { %3232 = vmatpush1.bf16.msra.mxu1 %v5454_v6  ;;  %3275 = vmatpush1.bf16.msra.mxu0 %v5456_v7  ;;  %v5442_v6 = vcombine.low %v2379_v61, %v2387_v62  ;;  %v5444_v7 = vcombine.low %v2380_v63, %v2388_v55  ;;  %v2373_v61 = vld [vmem:[%s7593_s1 + $0x2f0] sm:$0xff]  ;;  %v2366_v62 = vld [vmem:[%s7593_s1 + $0x2b8] sm:$0xff]  ;;  %v5414_v55 = vcombine.low %v2349_v46, %v2357_v47 }
 0xb8d   : > { %3303 = vmatprep.subr.bf16.mxu1 %v5347_v13  ;;  %3346 = vmatprep.subr.bf16.mxu0 %v5349_v12  ;;  %v5459_v13 = vcombine.high %v2395_v4, %v2403_v5  ;;  %v5461_v12 = vcombine.high %v2396_v1, %v2404_v3  ;;  %v2374_v63 = vld [vmem:[%s7593_s1 + $0x2f8] sm:$0xff] }
 0xb8f   : > { %3250 = vmatmul.mubr.bf16.vlgmr.msra.gmra.mrb[20].mxu1 %v7851_v49  ;;  %3293 = vmatmul.mubr.bf16.vlgmr.msra.gmra.mrb[16].mxu0 %v7851_v49 }
 0xb90   : > { %3304 = vmatpush1.bf16.msra.mxu1 %v5346_v21  ;;  %3347 = vmatpush1.bf16.msra.mxu0 %v5348_v22  ;;  %v5458_v21 = vcombine.low %v2395_v4, %v2403_v5  ;;  %v5460_v22 = vcombine.low %v2396_v1, %v2404_v3  ;;  %v2389_v4 = vld [vmem:[%s7593_s1 + $0x370] sm:$0xff]  ;;  %v2382_v5 = vld [vmem:[%s7593_s1 + $0x338] sm:$0xff] }
 0xb91   : > { %3305 = vmatprep.subr.bf16.mxu1 %v5363_v23  ;;  %3348 = vmatprep.subr.bf16.mxu0 %v5365_v11  ;;  %v5351_v23 = vcombine.high %v2285_v51, %v2293_v14  ;;  %v5353_v11 = vcombine.high %v2286_v17, %v2294_v20  ;;  %v2390_v1 = vld [vmem:[%s7593_s1 + $0x378] sm:$0xff] }
 0xb92   : > { %3335 = vmatprep.mubr.bf16.mxu1 %v6951_v10  ;;  %3378 = vmatprep.mubr.bf16.mxu0 %v6951_v10 }
 0xb94   : > { %3306 = vmatpush1.bf16.msra.mxu1 %v5362_v19  ;;  %3349 = vmatpush1.bf16.msra.mxu0 %v5364_v26  ;;  %v5350_v19 = vcombine.low %v2285_v51, %v2293_v14  ;;  %v5352_v26 = vcombine.low %v2286_v17, %v2294_v20  ;;  %v2405_v51 = vld [vmem:[%s7593_s1 + $0x3f0] sm:$0xff]  ;;  %v2398_v14 = vld [vmem:[%s7593_s1 + $0x3b8] sm:$0xff] }
 0xb95   : > { %3307 = vmatprep.subr.bf16.mxu1 %v5379_v27  ;;  %3350 = vmatprep.subr.bf16.mxu0 %v5381_v28  ;;  %v5367_v27 = vcombine.high %v2301_v54, %v2309_v18  ;;  %v5369_v28 = vcombine.high %v2302_v24, %v2310_v25  ;;  %v2406_v17 = vld [vmem:[%s7593_s1 + $0x3f8] sm:$0xff] }
 0xb98   : > { %3308 = vmatpush1.bf16.msra.mxu1 %v5378_v33  ;;  %3351 = vmatpush1.bf16.msra.mxu0 %v5380_v34  ;;  %v5366_v33 = vcombine.low %v2301_v54, %v2309_v18  ;;  %v5368_v34 = vcombine.low %v2302_v24, %v2310_v25  ;;  %v5464_v54 = vcombine.low %v2398_v14, %v2406_v17  ;;  %v6208_v18 = vld [vmem:[%s7597_s20 + $0x40] sm:$0xff]  }
 0xb99   : > { %3309 = vmatprep.subr.bf16.mxu1 %v5395_v35  ;;  %3352 = vmatprep.subr.bf16.mxu0 %v5397_v36  ;;  %v5383_v35 = vcombine.high %v2317_v29, %v2325_v30  ;;  %v5385_v36 = vcombine.high %v2318_v31, %v2326_v32  ;;  %v6209_v24 = vld [vmem:[%s7597_s20 + $0xc0] sm:$0xff]  }
 0xb9a   : > { %v6210_v25 = vld [vmem:[%s7597_s20] sm:$0xff]  }
 0xb9c   : > { %3310 = vmatpush1.bf16.msra.mxu1 %v5394_v43  ;;  %3353 = vmatpush1.bf16.msra.mxu0 %v5396_v16  ;;  %v5382_v43 = vcombine.low %v2317_v29, %v2325_v30  ;;  %v5384_v16 = vcombine.low %v2318_v31, %v2326_v32  ;;  %v6215_v29 = vld [vmem:[%s7597_s20 + $0x88] sm:$0xff]   ;;  %v6216_v30 = vld [vmem:[%s7597_s20 + $0x50] sm:$0xff]  }
 0xb9d   : > { %3311 = vmatprep.subr.bf16.mxu1 %v5411_v44  ;;  %3354 = vmatprep.subr.bf16.mxu0 %v5413_v45  ;;  %v5399_v44 = vcombine.high %v2333_v37, %v2341_v40  ;;  %v5401_v45 = vcombine.high %v2334_v15, %v2342_v42  ;;  %v6217_v31 = vld [vmem:[%s7597_s20 + $0xd0] sm:$0xff]  }
 0xb9e   : > { %v6218_v32 = vld [vmem:[%s7597_s20 + $0x10] sm:$0xff]  }
 0xba0   : > { %3312 = vmatpush1.bf16.msra.mxu1 %v5410_v56  ;;  %3355 = vmatpush1.bf16.msra.mxu0 %v5412_v58  ;;  %v5398_v56 = vcombine.low %v2333_v37, %v2341_v40  ;;  %v5415_v58 = vcombine.high %v2349_v46, %v2357_v47  ;;  %v6224_v37 = vld [vmem:[%s7597_s20 + $0x60] sm:$0xff]   ;;  %v6232_v46 = vld [vmem:[%s7597_s20 + $0x70] sm:$0xff]  }
 0xba1   : > { %3313 = vmatprep.subr.bf16.mxu1 %v5427_v59  ;;  %3356 = vmatprep.subr.bf16.mxu0 %v5429_v60  ;;  %v5417_v59 = vcombine.high %v2350_v50, %v2358_v52  ;;  %v2365_v60 = vld [vmem:[%s7593_s1 + $0x2b0] sm:$0xff]  ;;  %v6225_v40 = vld [vmem:[%s7597_s20 + $0xe0] sm:$0xff]  }
 0xba2   : > { %v5430_v3 = vcombine.low %v2365_v60, %v2373_v61  ;;  %v6233_v47 = vld [vmem:[%s7597_s20 + $0xf0] sm:$0xff]  }
 0xba4   : > { %3314 = vmatpush1.bf16.msra.mxu1 %v5426_v0  ;;  %3357 = vmatpush1.bf16.msra.mxu0 %v5428_v48  ;;  %v5416_v0 = vcombine.low %v2350_v50, %v2358_v52  ;;  %v5431_v48 = vcombine.high %v2365_v60, %v2373_v61  ;;  %v6234_v50 = vld [vmem:[%s7597_s20 + $0x30] sm:$0xff]   ;;  %v6240_v60 = vld [vmem:[%s7597_s20 + $0x140] sm:$0xff]  }
 0xba5   : > { %3315 = vmatprep.subr.bf16.mxu1 %v5443_v53  ;;  %3358 = vmatprep.subr.bf16.mxu0 %v5445_v2  ;;  %v5433_v53 = vcombine.high %v2366_v62, %v2374_v63  ;;  %v2381_v2 = vld [vmem:[%s7593_s1 + $0x330] sm:$0xff]  ;;  %v6241_v61 = vld [vmem:[%s7597_s20 + $0x1c0] sm:$0xff]  }
 0xba6   : > { %v5446_v20 = vcombine.low %v2381_v2, %v2389_v4  ;;  %v6235_v52 = vld [vmem:[%s7597_s20 + $0xb0] sm:$0xff]  }
 0xba8   : > { %3316 = vmatpush1.bf16.msra.mxu1 %v5442_v6  ;;  %3359 = vmatpush1.bf16.msra.mxu0 %v5444_v7  ;;  %v5432_v6 = vcombine.low %v2366_v62, %v2374_v63  ;;  %v5447_v7 = vcombine.high %v2381_v2, %v2389_v4  ;;  %v7990_v62 = vld [vmem:[%s7595_s25] sm:$0xff]  ;;  %v2425_v63 = vsub.s32 3, %v7639_v38 }
 0xba9   : > { %3317 = vmatprep.subr.bf16.mxu1 %v5459_v13  ;;  %3360 = vmatprep.subr.bf16.mxu0 %v5461_v12  ;;  %v5449_v13 = vcombine.high %v2382_v5, %v2390_v1  ;;  %v2397_v12 = vld [vmem:[%s7593_s1 + $0x3b0] sm:$0xff] }
 0xbac   : > { %3318 = vmatpush1.bf16.msra.mxu1 %v5458_v21  ;;  %3361 = vmatpush1.bf16.msra.mxu0 %v5460_v22  ;;  %v5448_v21 = vcombine.low %v2382_v5, %v2390_v1  ;;  %v5463_v22 = vcombine.high %v2397_v12, %v2405_v51 }
 0xbad   : > { %3389 = vmatprep.subr.bf16.mxu1 %v5351_v23  ;;  %3432 = vmatprep.subr.bf16.mxu0 %v5353_v11  ;;  %v5465_v23 = vcombine.high %v2398_v14, %v2406_v17  ;;  %v5462_v11 = vcombine.low %v2397_v12, %v2405_v51 }
 0xbaf   : > { %3336 = vmatmul.mubr.bf16.vlgmr.msra.gmra.mrb[24].mxu1 %v7851_v49  ;;  %3379 = vmatmul.mubr.bf16.vlgmr.msra.gmra.mrb[20].mxu0 %v7851_v49 }
 0xbb0   : > { %3390 = vmatpush1.bf16.msra.mxu1 %v5350_v19  ;;  %3433 = vmatpush1.bf16.msra.mxu0 %v5352_v26  ;;  %v6211_v19 = vld [vmem:[%s7597_s20 + $0x80] sm:$0xff]   ;;  %v6212_v26 = vld [vmem:[%s7597_s20 + $0x48] sm:$0xff]  }
 0xbb1   : > { %3391 = vmatprep.subr.bf16.mxu1 %v5367_v27  ;;  %3434 = vmatprep.subr.bf16.mxu0 %v5369_v28  ;;  %v6213_v27 = vld [vmem:[%s7597_s20 + $0xc8] sm:$0xff]  }
 0xbb2   : > { %3421 = vmatprep.mubr.bf16.mxu1 %v6951_v10  ;;  %3464 = vmatprep.mubr.bf16.mxu0 %v6951_v10  ;;  %v5400_v10 = vcombine.low %v2334_v15, %v2342_v42  ;;  %v6214_v28 = vld [vmem:[%s7597_s20 + $0x8] sm:$0xff]   ;;  %v6226_v15 = vld [vmem:[%s7597_s20 + $0x20] sm:$0xff]  }
 0xbb3   : > { %v6227_v42 = vld [vmem:[%s7597_s20 + $0xa0] sm:$0xff]  }
 0xbb4   : > { %3392 = vmatpush1.bf16.msra.mxu1 %v5366_v33  ;;  %3435 = vmatpush1.bf16.msra.mxu0 %v5368_v34  ;;  %v6219_v33 = vld [vmem:[%s7597_s20 + $0x90] sm:$0xff]   ;;  %v6221_v34 = vld [vmem:[%s7597_s20 + $0xd8] sm:$0xff]  }
 0xbb5   : > { %3393 = vmatprep.subr.bf16.mxu1 %v5383_v35  ;;  %3436 = vmatprep.subr.bf16.mxu0 %v5385_v36  ;;  %v6222_v35 = vld [vmem:[%s7597_s20 + $0x18] sm:$0xff]  }
 0xbb6   : > { %v6223_v36 = vld [vmem:[%s7597_s20 + $0x98] sm:$0xff]  }
 0xbb8   : > { %3394 = vmatpush1.bf16.msra.mxu1 %v5382_v43  ;;  %3437 = vmatpush1.bf16.msra.mxu0 %v5384_v16  ;;  %v6228_v43 = vld [vmem:[%s7597_s20 + $0x68] sm:$0xff]  }
 0xbb9   : > { %3395 = vmatprep.subr.bf16.mxu1 %v5399_v44  ;;  %3438 = vmatprep.subr.bf16.mxu0 %v5401_v45  ;;  %v6229_v16 = vld [vmem:[%s7597_s20 + $0xe8] sm:$0xff]  }
 0xbba   : > { %v6230_v44 = vld [vmem:[%s7597_s20 + $0x28] sm:$0xff]  }
 0xbbb   : > { %v6231_v45 = vld [vmem:[%s7597_s20 + $0xa8] sm:$0xff]  }
 0xbbc   : > { %3396 = vmatpush1.bf16.msra.mxu1 %v5398_v56  ;;  %3439 = vmatpush1.bf16.msra.mxu0 %v5400_v10  ;;  %v6236_v56 = vld [vmem:[%s7597_s20 + $0x78] sm:$0xff]  }
 0xbbd   : > { %3397 = vmatprep.subr.bf16.mxu1 %v5415_v58  ;;  %3440 = vmatprep.subr.bf16.mxu0 %v5417_v59  ;;  %v6237_v10 = vld [vmem:[%s7597_s20 + $0xf8] sm:$0xff]  }
 0xbbe   : > { %v6238_v58 = vld [vmem:[%s7597_s20 + $0x38] sm:$0xff]  }
 0xbbf   : > { %v6239_v59 = vld [vmem:[%s7597_s20 + $0xb8] sm:$0xff]  }
 0xbc0   : > { %3398 = vmatpush1.bf16.msra.mxu1 %v5414_v55  ;;  %3441 = vmatpush1.bf16.msra.mxu0 %v5416_v0  ;;  %v2414_v55 = vrot.slane %v7990_v62, %v7642_v39  ;;  %v2422_v0 = vrot.slane %v7990_v62, %v7674_v57 }
 0xbc1   : > { %3399 = vmatprep.subr.bf16.mxu1 %v5431_v48  ;;  %3442 = vmatprep.subr.bf16.mxu0 %v5433_v53  ;;  %v2418_v48 = vrot.slane %v7990_v62, %v7646_v41  ;;  %v2426_v53 = vrot.slane %v7990_v62, %v2425_v63 }
 0xbc4   : > { %3400 = vmatpush1.bf16.msra.mxu1 %v5430_v3  ;;  %3443 = vmatpush1.bf16.msra.mxu0 %v5432_v6 }
 0xbc5   : > { %3401 = vmatprep.subr.bf16.mxu1 %v5447_v7  ;;  %3444 = vmatprep.subr.bf16.mxu0 %v5449_v13 }
 0xbc8   : > { %3402 = vmatpush1.bf16.msra.mxu1 %v5446_v20  ;;  %3445 = vmatpush1.bf16.msra.mxu0 %v5448_v21 }
 0xbc9   : > { %3403 = vmatprep.subr.bf16.mxu1 %v5463_v22  ;;  %3446 = vmatprep.subr.bf16.mxu0 %v5465_v23 }
 0xbcc   : > { %3404 = vmatpush1.bf16.msra.mxu1 %v5462_v11  ;;  %3447 = vmatpush1.bf16.msra.mxu0 %v5464_v54 }
 0xbcd   : > { %5659 = vmatprep.subr.bf16.mxu1 %v6208_v18  ;;  %5681 = vmatprep.subr.bf16.mxu0 %v6209_v24 }
 0xbcf   : > { %3422 = vmatmul.mubr.bf16.vlgmr.msra.gmra.mrb[28].mxu1 %v7851_v49  ;;  %3465 = vmatmul.mubr.bf16.vlgmr.msra.gmra.mrb[24].mxu0 %v7851_v49  ;;  %v6220_v49 = vld [vmem:[%s7597_s20 + $0x58] sm:$0xff]  }
 0xbd0   : > { %5660 = vmatpush3.bf16.msra.mxu1 %v6210_v25  ;;  %5682 = vmatpush3.bf16.msra.mxu0 %v6211_v19 }
 0xbd1   : > { %5661 = vmatprep.subr.bf16.mxu1 %v6212_v26  ;;  %5683 = vmatprep.subr.bf16.mxu0 %v6213_v27 }
 0xbd4   : > { %5662 = vmatpush3.bf16.msra.mxu1 %v6214_v28  ;;  %5684 = vmatpush3.bf16.msra.mxu0 %v6215_v29 }
 0xbd5   : > { %5663 = vmatprep.subr.bf16.mxu1 %v6216_v30  ;;  %5685 = vmatprep.subr.bf16.mxu0 %v6217_v31 }
 0xbd8   : > { %5664 = vmatpush3.bf16.msra.mxu1 %v6218_v32  ;;  %5686 = vmatpush3.bf16.msra.mxu0 %v6219_v33  ;;  %v6242_v32 = vld [vmem:[%s7597_s20 + $0x100] sm:$0xff]  }
 0xbd9   : > { %5665 = vmatprep.subr.bf16.mxu1 %v6220_v49  ;;  %5687 = vmatprep.subr.bf16.mxu0 %v6221_v34  ;;  %v6243_v33 = vld [vmem:[%s7597_s20 + $0x180] sm:$0xff]   ;;  %v6244_v49 = vld [vmem:[%s7597_s20 + $0x148] sm:$0xff]  }
 0xbda   : > { %v6245_v34 = vld [vmem:[%s7597_s20 + $0x1c8] sm:$0xff]  }
 0xbdc   : > { %5666 = vmatpush3.bf16.msra.mxu1 %v6222_v35  ;;  %5688 = vmatpush3.bf16.msra.mxu0 %v6223_v36  ;;  %v6246_v35 = vld [vmem:[%s7597_s20 + $0x108] sm:$0xff]  }
 0xbdd   : > { %5667 = vmatprep.subr.bf16.mxu1 %v6224_v37  ;;  %5689 = vmatprep.subr.bf16.mxu0 %v6225_v40  ;;  %v6247_v36 = vld [vmem:[%s7597_s20 + $0x188] sm:$0xff]   ;;  %v6248_v37 = vld [vmem:[%s7597_s20 + $0x150] sm:$0xff]  }
 0xbde   : > { %v6249_v40 = vld [vmem:[%s7597_s20 + $0x1d0] sm:$0xff]  }
 0xbe0   : > { %5668 = vmatpush3.bf16.msra.mxu1 %v6226_v15  ;;  %5690 = vmatpush3.bf16.msra.mxu0 %v6227_v42  ;;  %v6250_v15 = vld [vmem:[%s7597_s20 + $0x110] sm:$0xff]  }
 0xbe1   : > { %5669 = vmatprep.subr.bf16.mxu1 %v6228_v43  ;;  %5691 = vmatprep.subr.bf16.mxu0 %v6229_v16  ;;  %v6251_v42 = vld [vmem:[%s7597_s20 + $0x190] sm:$0xff]   ;;  %v6252_v43 = vld [vmem:[%s7597_s20 + $0x158] sm:$0xff]  }
 0xbe2   : > { %v6253_v16 = vld [vmem:[%s7597_s20 + $0x1d8] sm:$0xff]  }
 0xbe4   : > { %5670 = vmatpush3.bf16.msra.mxu1 %v6230_v44  ;;  %5692 = vmatpush3.bf16.msra.mxu0 %v6231_v45  ;;  %v6254_v44 = vld [vmem:[%s7597_s20 + $0x118] sm:$0xff]  }
 0xbe5   : > { %5671 = vmatprep.subr.bf16.mxu1 %v6232_v46  ;;  %5693 = vmatprep.subr.bf16.mxu0 %v6233_v47  ;;  %v6255_v45 = vld [vmem:[%s7597_s20 + $0x198] sm:$0xff]   ;;  %v6256_v46 = vld [vmem:[%s7597_s20 + $0x160] sm:$0xff]  }
 0xbe6   : > { %v6257_v47 = vld [vmem:[%s7597_s20 + $0x1e0] sm:$0xff]  }
 0xbe8   : > { %5672 = vmatpush3.bf16.msra.mxu1 %v6234_v50  ;;  %5694 = vmatpush3.bf16.msra.mxu0 %v6235_v52  ;;  %v6258_v50 = vld [vmem:[%s7597_s20 + $0x120] sm:$0xff]  }
 0xbe9   : > { %5673 = vmatprep.subr.bf16.mxu1 %v6236_v56  ;;  %5695 = vmatprep.subr.bf16.mxu0 %v6237_v10  ;;  %v6259_v52 = vld [vmem:[%s7597_s20 + $0x1a0] sm:$0xff]   ;;  %v6260_v56 = vld [vmem:[%s7597_s20 + $0x168] sm:$0xff]  }
 0xbea   : > { %v6261_v10 = vld [vmem:[%s7597_s20 + $0x1e8] sm:$0xff]  }
 0xbec   : > { %5674 = vmatpush3.bf16.msra.mxu1 %v6238_v58  ;;  %5696 = vmatpush3.bf16.msra.mxu0 %v6239_v59  ;;  %v2429_v58 = vsub.s32 4, %v7639_v38  ;;  %v2437_v59 = vsub.s32 6, %v7639_v38 }
 0xbed   : > { %5703 = vmatprep.subr.bf16.mxu1 %v6240_v60  ;;  %5725 = vmatprep.subr.bf16.mxu0 %v6241_v61  ;;  %v2433_v60 = vsub.s32 5, %v7639_v38  ;;  %v2441_v61 = vsub.s32 7, %v7639_v38 }
 0xc42   : > { %v3165_v2 = vpop.f32.mrb[16].mxu1  ;;  %v3208_v4 = vpop.f32.mrb[12].mxu0 }
 0xc43   : > { %v3166_v5 = vadd.f32 %v3165_v2, %v2414_v55  ;;  %v3209_v1 = vadd.f32 %v3208_v4, %v2422_v0  ;;  %v3167_v3 = vpop.f32.mrb[17].mxu1  ;;  %v3210_v6 = vpop.f32.mrb[13].mxu0  ;;  %v6264_v2 = vld [vmem:[%s7597_s20 + $0x170] sm:$0xff]  }
 0xc44   : > { %v3168_v7 = vadd.f32 %v3167_v3, %v2418_v48  ;;  %v3211_v13 = vadd.f32 %v3210_v6, %v2426_v53  ;;  %v3169_v12 = vpop.f32.mrb[18].mxu1  ;;  %v3212_v51 = vpop.f32.mrb[14].mxu0  ;;  %v6265_v4 = vld [vmem:[%s7597_s20 + $0x1f0] sm:$0xff]  }
 0xc45   : > { %v3170_v14 = vadd.f32 %v3169_v12, %v2414_v55  ;;  %v3213_v17 = vadd.f32 %v3212_v51, %v2422_v0  ;;  %v3171_v20 = vpop.f32.mrb[19].mxu1  ;;  %v3214_v21 = vpop.f32.mrb[15].mxu0  ;;  %v3475_v11 = vmax.f32 %v3166_v5, 0.0  ;;  %v3477_v54 = vmax.f32 %v3209_v1, 0.0  ;;  %v6262_v55 = vld [vmem:[%s7597_s20 + $0x128] sm:$0xff]  }
 0xc46   : > { %v3172_v22 = vadd.f32 %v3171_v20, %v2418_v48  ;;  %v3215_v23 = vadd.f32 %v3214_v21, %v2426_v53  ;;  %v3476_v25 = vmax.f32 %v3168_v7, 0.0  ;;  %v3478_v19 = vmax.f32 %v3211_v13, 0.0  ;;  %v6263_v0 = vld [vmem:[%s7597_s20 + $0x1a8] sm:$0xff]   ;;  %v6266_v7 = vld [vmem:[%s7597_s20 + $0x130] sm:$0xff]   ;;  %v6268_v20 = vld [vmem:[%s7597_s20 + $0x178] sm:$0xff]  }
 0xc47   : > { %v3491_v18 = vmax.f32 %v3170_v14, 0.0  ;;  %v3493_v24 = vmax.f32 %v3213_v17, 0.0  ;;  %v2430_v48 = vrot.slane %v7990_v62, %v2429_v58  ;;  %v2438_v53 = vrot.slane %v7990_v62, %v2437_v59  ;;  %v6267_v13 = vld [vmem:[%s7597_s20 + $0x1b0] sm:$0xff]   ;;  %v6269_v21 = vld [vmem:[%s7597_s20 + $0x1f8] sm:$0xff]  }
 0xc48   : > { %v3492_v26 = vmax.f32 %v3172_v22, 0.0  ;;  %v3494_v27 = vmax.f32 %v3215_v23, 0.0  ;;  %v2434_v5 = vrot.slane %v7990_v62, %v2433_v60  ;;  %v2442_v1 = vrot.slane %v7990_v62, %v2441_v61 }
 0xc49   : > { %v3507_v28 = vpack.c.bf16 %v3491_v18, %v3475_v11  ;;  %v3509_v29 = vpack.c.bf16 %v3493_v24, %v3477_v54 }
 0xc4a   : > { %v3508_v30 = vpack.c.bf16 %v3492_v26, %v3476_v25  ;;  %v3510_v31 = vpack.c.bf16 %v3494_v27, %v3478_v19  ;;  %v6270_v27 = vld [vmem:[%s7597_s20 + $0x138] sm:$0xff]  }
 0xc4c   : > { %4586 = vmatprep.mubr.bf16.mxu1 %v3508_v30  ;;  %4627 = vmatprep.mubr.bf16.mxu0 %v3510_v31 }
 0xc4d   : > { %4587 = vmatmul.mubr.bf16.vlgmr.msra.gmra.mrb[32].mxu1 %v3507_v28  ;;  %4628 = vmatmul.mubr.bf16.vlgmr.msra.gmra.mrb[28].mxu0 %v3509_v29  ;;  %v6271_v28 = vld [vmem:[%s7597_s20 + $0x1b8] sm:$0xff]  }
 0xc4e   : > { %5704 = vmatpush3.bf16.msra.mxu1 %v6242_v32  ;;  %5726 = vmatpush3.bf16.msra.mxu0 %v6243_v33  ;;  %v6272_v33 = vld [vmem:[%s7597_s20 + $0x240] sm:$0xff]  }
 0xc4f   : > { %5705 = vmatprep.subr.bf16.mxu1 %v6244_v49  ;;  %5727 = vmatprep.subr.bf16.mxu0 %v6245_v34  ;;  %v6273_v49 = vld [vmem:[%s7597_s20 + $0x2c0] sm:$0xff]  }
 0xc52   : > { %5706 = vmatpush3.bf16.msra.mxu1 %v6246_v35  ;;  %5728 = vmatpush3.bf16.msra.mxu0 %v6247_v36 }
 0xc53   : > { %5707 = vmatprep.subr.bf16.mxu1 %v6248_v37  ;;  %5729 = vmatprep.subr.bf16.mxu0 %v6249_v40 }
 0xc56   : > { %5708 = vmatpush3.bf16.msra.mxu1 %v6250_v15  ;;  %5730 = vmatpush3.bf16.msra.mxu0 %v6251_v42 }
 0xc57   : > { %5709 = vmatprep.subr.bf16.mxu1 %v6252_v43  ;;  %5731 = vmatprep.subr.bf16.mxu0 %v6253_v16  ;;  %v6274_v16 = vld [vmem:[%s7597_s20 + $0x200] sm:$0xff]  }
 0xc5a   : > { %5710 = vmatpush3.bf16.msra.mxu1 %v6254_v44  ;;  %5732 = vmatpush3.bf16.msra.mxu0 %v6255_v45  ;;  %v6275_v44 = vld [vmem:[%s7597_s20 + $0x280] sm:$0xff]   ;;  %v6276_v45 = vld [vmem:[%s7597_s20 + $0x248] sm:$0xff]  }
 0xc5b   : > { %5711 = vmatprep.subr.bf16.mxu1 %v6256_v46  ;;  %5733 = vmatprep.subr.bf16.mxu0 %v6257_v47  ;;  %v6277_v46 = vld [vmem:[%s7597_s20 + $0x2c8] sm:$0xff]  }
 0xc5c   : > { %v6278_v47 = vld [vmem:[%s7597_s20 + $0x208] sm:$0xff]  }
 0xc5e   : > { %5712 = vmatpush3.bf16.msra.mxu1 %v6258_v50  ;;  %5734 = vmatpush3.bf16.msra.mxu0 %v6259_v52  ;;  %v6279_v50 = vld [vmem:[%s7597_s20 + $0x288] sm:$0xff]   ;;  %v6280_v52 = vld [vmem:[%s7597_s20 + $0x250] sm:$0xff]  }
 0xc5f   : > { %5713 = vmatprep.subr.bf16.mxu1 %v6260_v56  ;;  %5735 = vmatprep.subr.bf16.mxu0 %v6261_v10  ;;  %v6281_v56 = vld [vmem:[%s7597_s20 + $0x2d0] sm:$0xff]  }
 0xc60   : > { %v6282_v10 = vld [vmem:[%s7597_s20 + $0x210] sm:$0xff]  }
 0xc62   : > { %v3251_v3 = vpop.f32.mrb[20].mxu1  ;;  %v3294_v6 = vpop.f32.mrb[16].mxu0  ;;  %5714 = vmatpush3.bf16.msra.mxu1 %v6262_v55  ;;  %5736 = vmatpush3.bf16.msra.mxu0 %v6263_v0  ;;  %v6283_v55 = vld [vmem:[%s7597_s20 + $0x290] sm:$0xff]   ;;  %v6284_v0 = vld [vmem:[%s7597_s20 + $0x258] sm:$0xff]  }
 0xc63   : > { %v3252_v12 = vadd.f32 %v3251_v3, %v2430_v48  ;;  %v3295_v51 = vadd.f32 %v3294_v6, %v2438_v53  ;;  %v3253_v14 = vpop.f32.mrb[21].mxu1  ;;  %v3296_v17 = vpop.f32.mrb[17].mxu0  ;;  %5715 = vmatprep.subr.bf16.mxu1 %v6264_v2  ;;  %5737 = vmatprep.subr.bf16.mxu0 %v6265_v4  ;;  %v6287_v2 = vld [vmem:[%s7597_s20 + $0x298] sm:$0xff]   ;;  %v6288_v4 = vld [vmem:[%s7597_s20 + $0x260] sm:$0xff]   ;;  %v6292_v6 = vld [vmem:[%s7597_s20 + $0x268] sm:$0xff]  }
 0xc64   : > { %v3254_v22 = vadd.f32 %v3253_v14, %v2434_v5  ;;  %v3297_v23 = vadd.f32 %v3296_v17, %v2442_v1  ;;  %v3255_v11 = vpop.f32.mrb[22].mxu1  ;;  %v3298_v62 = vpop.f32.mrb[18].mxu0  ;;  %v6291_v3 = vld [vmem:[%s7597_s20 + $0x2a0] sm:$0xff]  }
 0xc65   : > { %v3256_v54 = vadd.f32 %v3255_v11, %v2430_v48  ;;  %v3299_v18 = vadd.f32 %v3298_v62, %v2438_v53  ;;  %v3257_v24 = vpop.f32.mrb[23].mxu1  ;;  %v3300_v25 = vpop.f32.mrb[19].mxu0  ;;  %v3479_v29 = vmax.f32 %v3252_v12, 0.0  ;;  %v3481_v30 = vmax.f32 %v3295_v51, 0.0  ;;  %v6285_v48 = vld [vmem:[%s7597_s20 + $0x2d8] sm:$0xff]   ;;  %v6294_v12 = vld [vmem:[%s7597_s20 + $0x228] sm:$0xff]  }
 0xc66   : > { %v3258_v19 = vadd.f32 %v3257_v24, %v2434_v5  ;;  %v3301_v26 = vadd.f32 %v3300_v25, %v2442_v1  ;;  %5716 = vmatpush3.bf16.msra.mxu1 %v6266_v7  ;;  %5738 = vmatpush3.bf16.msra.mxu0 %v6267_v13  ;;  %v3480_v34 = vmax.f32 %v3254_v22, 0.0  ;;  %v3482_v35 = vmax.f32 %v3297_v23, 0.0  ;;  %v6286_v53 = vld [vmem:[%s7597_s20 + $0x218] sm:$0xff]   ;;  %v6289_v5 = vld [vmem:[%s7597_s20 + $0x2e0] sm:$0xff]   ;;  %v6293_v7 = vld [vmem:[%s7597_s20 + $0x2e8] sm:$0xff]  }
 0xc67   : > { %v3495_v31 = vmax.f32 %v3256_v54, 0.0  ;;  %v3497_v32 = vmax.f32 %v3299_v18, 0.0  ;;  %5717 = vmatprep.subr.bf16.mxu1 %v6268_v20  ;;  %5739 = vmatprep.subr.bf16.mxu0 %v6269_v21  ;;  %v6290_v1 = vld [vmem:[%s7597_s20 + $0x220] sm:$0xff]   ;;  %v8071_v13 = vld [vmem:[%s7595_s25 + $0x8] sm:$0xff]  ;;  %v6296_v20 = vld [vmem:[%s7597_s20 + $0x270] sm:$0xff]  }
 0xc68   : > { %v3496_v36 = vmax.f32 %v3258_v19, 0.0  ;;  %v3498_v37 = vmax.f32 %v3301_v26, 0.0  ;;  %v6295_v51 = vld [vmem:[%s7597_s20 + $0x2a8] sm:$0xff]   ;;  %v2446_v14 = vrot.slane %v8071_v13, %v7642_v39  ;;  %v2454_v17 = vrot.slane %v8071_v13, %v7674_v57  ;;  %v6297_v21 = vld [vmem:[%s7597_s20 + $0x2f0] sm:$0xff]   ;;  %v6300_v19 = vld [vmem:[%s7597_s20 + $0x278] sm:$0xff]  }
 0xc69   : > { %v3511_v40 = vpack.c.bf16 %v3495_v31, %v3479_v29  ;;  %v3513_v15 = vpack.c.bf16 %v3497_v32, %v3481_v30  ;;  %v2450_v22 = vrot.slane %v8071_v13, %v7646_v41  ;;  %v2458_v23 = vrot.slane %v8071_v13, %v2425_v63  ;;  %v6298_v54 = vld [vmem:[%s7597_s20 + $0x230] sm:$0xff]   ;;  %v6301_v41 = vld [vmem:[%s7597_s20 + $0x2f8] sm:$0xff]  }
 0xc6a   : > { %v3512_v42 = vpack.c.bf16 %v3496_v36, %v3480_v34  ;;  %v3514_v43 = vpack.c.bf16 %v3498_v37, %v3482_v35  ;;  %5718 = vmatpush3.bf16.msra.mxu1 %v6270_v27  ;;  %5740 = vmatpush3.bf16.msra.mxu0 %v6271_v28  ;;  %v6299_v39 = vld [vmem:[%s7597_s20 + $0x2b0] sm:$0xff]   ;;  %v6302_v34 = vld [vmem:[%s7597_s20 + $0x238] sm:$0xff]  }
 0xc6b   : > { %5747 = vmatprep.subr.bf16.mxu1 %v6272_v33  ;;  %5769 = vmatprep.subr.bf16.mxu0 %v6273_v49  ;;  %v6303_v35 = vld [vmem:[%s7597_s20 + $0x2b8] sm:$0xff]  }
 0xc6c   : > { %4668 = vmatprep.mubr.bf16.mxu1 %v3512_v42  ;;  %4709 = vmatprep.mubr.bf16.mxu0 %v3514_v43  ;;  %v6304_v42 = vld [vmem:[%s7597_s20 + $0x340] sm:$0xff]  }
 0xc6d   : > { %4669 = vmatmul.mubr.bf16.vlgmr.msra.gmra.mrb[36].mxu1 %v3511_v40  ;;  %4710 = vmatmul.mubr.bf16.vlgmr.msra.gmra.mrb[32].mxu0 %v3513_v15  ;;  %v6305_v43 = vld [vmem:[%s7597_s20 + $0x3c0] sm:$0xff]  }
 0xc6e   : > { %5748 = vmatpush3.bf16.msra.mxu1 %v6274_v16  ;;  %5770 = vmatpush3.bf16.msra.mxu0 %v6275_v44 }
 0xc6f   : > { %5749 = vmatprep.subr.bf16.mxu1 %v6276_v45  ;;  %5771 = vmatprep.subr.bf16.mxu0 %v6277_v46 }
 0xc72   : > { %5750 = vmatpush3.bf16.msra.mxu1 %v6278_v47  ;;  %5772 = vmatpush3.bf16.msra.mxu0 %v6279_v50 }
 0xc73   : > { %5751 = vmatprep.subr.bf16.mxu1 %v6280_v52  ;;  %5773 = vmatprep.subr.bf16.mxu0 %v6281_v56 }
 0xc76   : > { %5752 = vmatpush3.bf16.msra.mxu1 %v6282_v10  ;;  %5774 = vmatpush3.bf16.msra.mxu0 %v6283_v55  ;;  %v6306_v10 = vld [vmem:[%s7597_s20 + $0x300] sm:$0xff]  }
 0xc77   : > { %5753 = vmatprep.subr.bf16.mxu1 %v6284_v0  ;;  %5775 = vmatprep.subr.bf16.mxu0 %v6285_v48  ;;  %v6307_v55 = vld [vmem:[%s7597_s20 + $0x380] sm:$0xff]   ;;  %v6308_v0 = vld [vmem:[%s7597_s20 + $0x348] sm:$0xff]  }
 0xc78   : > { %v6309_v48 = vld [vmem:[%s7597_s20 + $0x3c8] sm:$0xff]  }
 0xc7a   : > { %5754 = vmatpush3.bf16.msra.mxu1 %v6286_v53  ;;  %5776 = vmatpush3.bf16.msra.mxu0 %v6287_v2  ;;  %v6310_v53 = vld [vmem:[%s7597_s20 + $0x308] sm:$0xff]  }
 0xc7b   : > { %5755 = vmatprep.subr.bf16.mxu1 %v6288_v4  ;;  %5777 = vmatprep.subr.bf16.mxu0 %v6289_v5  ;;  %v6311_v2 = vld [vmem:[%s7597_s20 + $0x388] sm:$0xff]   ;;  %v6312_v4 = vld [vmem:[%s7597_s20 + $0x350] sm:$0xff]  }
 0xc7c   : > { %v6313_v5 = vld [vmem:[%s7597_s20 + $0x3d0] sm:$0xff]  }
 0xc7e   : > { %5756 = vmatpush3.bf16.msra.mxu1 %v6290_v1  ;;  %5778 = vmatpush3.bf16.msra.mxu0 %v6291_v3  ;;  %v6314_v1 = vld [vmem:[%s7597_s20 + $0x310] sm:$0xff]  }
 0xc7f   : > { %5757 = vmatprep.subr.bf16.mxu1 %v6292_v6  ;;  %5779 = vmatprep.subr.bf16.mxu0 %v6293_v7  ;;  %v6315_v3 = vld [vmem:[%s7597_s20 + $0x390] sm:$0xff]   ;;  %v6316_v6 = vld [vmem:[%s7597_s20 + $0x358] sm:$0xff]  }
 0xc80   : > { %v6317_v7 = vld [vmem:[%s7597_s20 + $0x3d8] sm:$0xff]  }
 0xc82   : > { %v3337_v11 = vpop.f32.mrb[24].mxu1  ;;  %v3380_v62 = vpop.f32.mrb[20].mxu0  ;;  %5758 = vmatpush3.bf16.msra.mxu1 %v6294_v12  ;;  %5780 = vmatpush3.bf16.msra.mxu0 %v6295_v51  ;;  %v6318_v12 = vld [vmem:[%s7597_s20 + $0x318] sm:$0xff]  }
 0xc83   : > { %v3338_v18 = vadd.f32 %v3337_v11, %v2446_v14  ;;  %v3381_v24 = vadd.f32 %v3380_v62, %v2454_v17  ;;  %v3339_v57 = vpop.f32.mrb[25].mxu1  ;;  %v3382_v25 = vpop.f32.mrb[21].mxu0  ;;  %5759 = vmatprep.subr.bf16.mxu1 %v6296_v20  ;;  %5781 = vmatprep.subr.bf16.mxu0 %v6297_v21  ;;  %v6319_v51 = vld [vmem:[%s7597_s20 + $0x398] sm:$0xff]   ;;  %v6322_v20 = vld [vmem:[%s7597_s20 + $0x320] sm:$0xff]   ;;  %v6326_v11 = vld [vmem:[%s7597_s20 + $0x328] sm:$0xff]  }
 0xc84   : > { %v3340_v26 = vadd.f32 %v3339_v57, %v2450_v22  ;;  %v3383_v27 = vadd.f32 %v3382_v25, %v2458_v23  ;;  %v3341_v28 = vpop.f32.mrb[26].mxu1  ;;  %v3384_v63 = vpop.f32.mrb[22].mxu0  ;;  %v6323_v21 = vld [vmem:[%s7597_s20 + $0x3a0] sm:$0xff]   ;;  %v6327_v62 = vld [vmem:[%s7597_s20 + $0x3a8] sm:$0xff]   ;;  %v2466_v57 = vrot.slane %v8071_v13, %v2433_v60  ;;  %v2474_v25 = vrot.slane %v8071_v13, %v2441_v61  ;;  %v6333_v60 = vld [vmem:[%s7597_s20 + $0x3f8] sm:$0xff]  }
 0xc85   : > { %v3342_v29 = vadd.f32 %v3341_v28, %v2446_v14  ;;  %v3385_v30 = vadd.f32 %v3384_v63, %v2454_v17  ;;  %v3343_v31 = vpop.f32.mrb[27].mxu1  ;;  %v3386_v32 = vpop.f32.mrb[23].mxu0  ;;  %v3483_v36 = vmax.f32 %v3338_v18, 0.0  ;;  %v3485_v37 = vmax.f32 %v3381_v24, 0.0  ;;  %v6320_v14 = vld [vmem:[%s7597_s20 + $0x360] sm:$0xff]   ;;  %v6328_v18 = vld [vmem:[%s7597_s20 + $0x370] sm:$0xff]  }
 0xc86   : > { %v3344_v33 = vadd.f32 %v3343_v31, %v2450_v22  ;;  %v3387_v49 = vadd.f32 %v3386_v32, %v2458_v23  ;;  %5760 = vmatpush3.bf16.msra.mxu1 %v6298_v54  ;;  %5782 = vmatpush3.bf16.msra.mxu0 %v6299_v39  ;;  %v3484_v16 = vmax.f32 %v3340_v26, 0.0  ;;  %v3486_v44 = vmax.f32 %v3383_v27, 0.0  ;;  %v6321_v17 = vld [vmem:[%s7597_s20 + $0x3e0] sm:$0xff]   ;;  %v6324_v22 = vld [vmem:[%s7597_s20 + $0x368] sm:$0xff]   ;;  %v6329_v24 = vld [vmem:[%s7597_s20 + $0x3f0] sm:$0xff]  }
 0xc87   : > { %v3499_v40 = vmax.f32 %v3342_v29, 0.0  ;;  %v3501_v15 = vmax.f32 %v3385_v30, 0.0  ;;  %5761 = vmatprep.subr.bf16.mxu1 %v6300_v19  ;;  %5783 = vmatprep.subr.bf16.mxu0 %v6301_v41  ;;  %v6325_v23 = vld [vmem:[%s7597_s20 + $0x3e8] sm:$0xff]   ;;  %v2462_v54 = vrot.slane %v8071_v13, %v2429_v58  ;;  %v2470_v39 = vrot.slane %v8071_v13, %v2437_v59  ;;  %v6330_v58 = vld [vmem:[%s7597_s20 + $0x330] sm:$0xff]   ;;  %v6332_v29 = vld [vmem:[%s7597_s20 + $0x378] sm:$0xff]  }
 0xc88   : > { %v3500_v45 = vmax.f32 %v3344_v33, 0.0  ;;  %v3502_v46 = vmax.f32 %v3387_v49, 0.0  ;;  %v6331_v26 = vld [vmem:[%s7597_s20 + $0x3b0] sm:$0xff]  }
 0xc89   : > { %v3515_v47 = vpack.c.bf16 %v3499_v40, %v3483_v36  ;;  %v3517_v50 = vpack.c.bf16 %v3501_v15, %v3485_v37  ;;  %v6334_v36 = vld [vmem:[%s7597_s20 + $0x338] sm:$0xff]  }
 0xc8a   : > { %v3516_v52 = vpack.c.bf16 %v3500_v45, %v3484_v16  ;;  %v3518_v56 = vpack.c.bf16 %v3502_v46, %v3486_v44  ;;  %5762 = vmatpush3.bf16.msra.mxu1 %v6302_v34  ;;  %5784 = vmatpush3.bf16.msra.mxu0 %v6303_v35  ;;  %v6335_v37 = vld [vmem:[%s7597_s20 + $0x3b8] sm:$0xff]  }
 0xc8b   : > { %5791 = vmatprep.subr.bf16.mxu1 %v6304_v42  ;;  %5813 = vmatprep.subr.bf16.mxu0 %v6305_v43 }
 0xc8c   : > { %4750 = vmatprep.mubr.bf16.mxu1 %v3516_v52  ;;  %4791 = vmatprep.mubr.bf16.mxu0 %v3518_v56 }
 0xc8d   : > { %4751 = vmatmul.mubr.bf16.vlgmr.msra.gmra.mrb[40].mxu1 %v3515_v47  ;;  %4792 = vmatmul.mubr.bf16.vlgmr.msra.gmra.mrb[36].mxu0 %v3517_v50 }
 0xc8e   : > { %5792 = vmatpush3.bf16.msra.mxu1 %v6306_v10  ;;  %5814 = vmatpush3.bf16.msra.mxu0 %v6307_v55 }
 0xc8f   : > { %5793 = vmatprep.subr.bf16.mxu1 %v6308_v0  ;;  %5815 = vmatprep.subr.bf16.mxu0 %v6309_v48  ;;  %v5466_v0 = vld [vmem:[%s838_s28] ss:$0 sm:$0xff] }
 0xc92   : > { %5794 = vmatpush3.bf16.msra.mxu1 %v6310_v53  ;;  %5816 = vmatpush3.bf16.msra.mxu0 %v6311_v2 }
 0xc93   : > { %5795 = vmatprep.subr.bf16.mxu1 %v6312_v4  ;;  %5817 = vmatprep.subr.bf16.mxu0 %v6313_v5 }
 0xc96   : > { %5796 = vmatpush3.bf16.msra.mxu1 %v6314_v1  ;;  %5818 = vmatpush3.bf16.msra.mxu0 %v6315_v3 }
 0xc97   : > { %5797 = vmatprep.subr.bf16.mxu1 %v6316_v6  ;;  %5819 = vmatprep.subr.bf16.mxu0 %v6317_v7 }
 0xc9a   : > { %5798 = vmatpush3.bf16.msra.mxu1 %v6318_v12  ;;  %5820 = vmatpush3.bf16.msra.mxu0 %v6319_v51 }
 0xc9b   : > { %5799 = vmatprep.subr.bf16.mxu1 %v6320_v14  ;;  %5821 = vmatprep.subr.bf16.mxu0 %v6321_v17 }
 0xc9e   : > { %5800 = vmatpush3.bf16.msra.mxu1 %v6322_v20  ;;  %5822 = vmatpush3.bf16.msra.mxu0 %v6323_v21 }
 0xc9f   : > { %5801 = vmatprep.subr.bf16.mxu1 %v6324_v22  ;;  %5823 = vmatprep.subr.bf16.mxu0 %v6325_v23 }
 0xca2   : > { %v3423_v19 = vpop.f32.mrb[28].mxu1  ;;  %v3466_v41 = vpop.f32.mrb[24].mxu0  ;;  %5802 = vmatpush3.bf16.msra.mxu1 %v6326_v11  ;;  %5824 = vmatpush3.bf16.msra.mxu0 %v6327_v62 }
 0xca3   : > { %v3424_v27 = vadd.f32 %v3423_v19, %v2462_v54  ;;  %v3467_v59 = vadd.f32 %v3466_v41, %v2470_v39  ;;  %v3425_v28 = vpop.f32.mrb[29].mxu1  ;;  %v3468_v63 = vpop.f32.mrb[25].mxu0  ;;  %5803 = vmatprep.subr.bf16.mxu1 %v6328_v18  ;;  %5825 = vmatprep.subr.bf16.mxu0 %v6329_v24 }
 0xca4   : > { %v3426_v30 = vadd.f32 %v3425_v28, %v2466_v57  ;;  %v3469_v38 = vadd.f32 %v3468_v63, %v2474_v25  ;;  %v3427_v31 = vpop.f32.mrb[30].mxu1  ;;  %v3470_v61 = vpop.f32.mrb[26].mxu0 }
 0xca5   : > { %v3428_v13 = vadd.f32 %v3427_v31, %v2462_v54  ;;  %v3471_v32 = vadd.f32 %v3470_v61, %v2470_v39  ;;  %v3429_v33 = vpop.f32.mrb[31].mxu1  ;;  %v3472_v49 = vpop.f32.mrb[27].mxu0  ;;  %v3487_v40 = vmax.f32 %v3424_v27, 0.0  ;;  %v3489_v15 = vmax.f32 %v3467_v59, 0.0 }
 0xca6   : > { %v3430_v34 = vadd.f32 %v3429_v33, %v2466_v57  ;;  %v3473_v35 = vadd.f32 %v3472_v49, %v2474_v25  ;;  %5804 = vmatpush3.bf16.msra.mxu1 %v6330_v58  ;;  %5826 = vmatpush3.bf16.msra.mxu0 %v6331_v26  ;;  %v3488_v16 = vmax.f32 %v3426_v30, 0.0  ;;  %v3490_v44 = vmax.f32 %v3469_v38, 0.0 }
 0xca7   : > { %v3503_v42 = vmax.f32 %v3428_v13, 0.0  ;;  %v3505_v43 = vmax.f32 %v3471_v32, 0.0  ;;  %5805 = vmatprep.subr.bf16.mxu1 %v6332_v29  ;;  %5827 = vmatprep.subr.bf16.mxu0 %v6333_v60 }
 0xca8   : > { %v3504_v45 = vmax.f32 %v3430_v34, 0.0  ;;  %v3506_v46 = vmax.f32 %v3473_v35, 0.0 }
 0xca9   : > { %v3519_v47 = vpack.c.bf16 %v3503_v42, %v3487_v40  ;;  %v3521_v50 = vpack.c.bf16 %v3505_v43, %v3489_v15 }
 0xcaa   : > { %v3520_v52 = vpack.c.bf16 %v3504_v45, %v3488_v16  ;;  %v3522_v56 = vpack.c.bf16 %v3506_v46, %v3490_v44  ;;  %5806 = vmatpush3.bf16.msra.mxu1 %v6334_v36  ;;  %5828 = vmatpush3.bf16.msra.mxu0 %v6335_v37 }
 0xcac   : > { %4832 = vmatprep.mubr.bf16.mxu1 %v3520_v52  ;;  %4873 = vmatprep.mubr.bf16.mxu0 %v3522_v56 }
 0xcad   : > { %4833 = vmatmul.mubr.bf16.vlgmr.msra.gmra.mrb[44].mxu1 %v3519_v47  ;;  %4874 = vmatmul.mubr.bf16.vlgmr.msra.gmra.mrb[40].mxu0 %v3521_v50 }
 0xd20   : > { %v5675_v10 = vpop.f32.mrb[32].mxu1  ;;  %v5697_v55 = vpop.f32.mrb[28].mxu0 }
 0xd21   : > { %v5676_v48 = vpop.f32.mrb[33].mxu1  ;;  %v5698_v53 = vpop.f32.mrb[29].mxu0 }
 0xd22   : > { %v5677_v2 = vadd.f32 %v5676_v48, %v5675_v10  ;;  %v5699_v4 = vadd.f32 %v5698_v53, %v5697_v55  ;;  %v5678_v5 = vpop.f32.mrb[34].mxu1  ;;  %v5700_v1 = vpop.f32.mrb[30].mxu0 }
 0xd23   : > { %v5679_v3 = vpop.f32.mrb[35].mxu1  ;;  %v5701_v6 = vpop.f32.mrb[31].mxu0 }
 0xd24   : > { %v4589_v7 = vadd.f32 %v5677_v2, %v5466_v0  ;;  %v5680_v12 = vadd.f32 %v5679_v3, %v5678_v5  ;;  %v5702_v51 = vadd.f32 %v5701_v6, %v5700_v1 }
 0xd26   : > { %v4630_v14 = vadd.f32 %v5699_v4, %v4589_v7  ;;  %v4592_v17 = vadd.f32 %v5680_v12, %v5466_v0 }
 0xd28   : > { %v4633_v20 = vadd.f32 %v5702_v51, %v4592_v17 }
 0xd40   : > { %v5719_v21 = vpop.f32.mrb[36].mxu1  ;;  %v5741_v22 = vpop.f32.mrb[32].mxu0 }
 0xd41   : > { %v5720_v23 = vpop.f32.mrb[37].mxu1  ;;  %v5742_v11 = vpop.f32.mrb[33].mxu0 }
 0xd42   : > { %v5721_v62 = vadd.f32 %v5720_v23, %v5719_v21  ;;  %v5743_v54 = vadd.f32 %v5742_v11, %v5741_v22  ;;  %v5722_v39 = vpop.f32.mrb[38].mxu1  ;;  %v5744_v18 = vpop.f32.mrb[34].mxu0  ;;  %v5595_v22 = vld [vmem:[%s846_s26] ss:$0 sm:$0xff] }
 0xd43   : > { %v5723_v24 = vpop.f32.mrb[39].mxu1  ;;  %v5745_v57 = vpop.f32.mrb[35].mxu0 }
 0xd44   : > { %v4671_v25 = vadd.f32 %v5721_v62, %v4630_v14  ;;  %v5724_v19 = vadd.f32 %v5723_v24, %v5722_v39  ;;  %v5746_v41 = vadd.f32 %v5745_v57, %v5744_v18  ;;  %v5596_v62 = vld [vmem:[%s854_s23] ss:$0 sm:$0xff] }
 0xd46   : > { %v4712_v58 = vadd.f32 %v5743_v54, %v4671_v25  ;;  %v4674_v26 = vadd.f32 %v5724_v19, %v4633_v20 }
 0xd48   : > { %v4715_v27 = vadd.f32 %v5746_v41, %v4674_v26 }
 0xd60   : > { %v5763_v59 = vpop.f32.mrb[40].mxu1  ;;  %v5785_v28 = vpop.f32.mrb[36].mxu0 }
 0xd61   : > { %v5764_v63 = vpop.f32.mrb[41].mxu1  ;;  %v5786_v29 = vpop.f32.mrb[37].mxu0 }
 0xd62   : > { %v5765_v60 = vadd.f32 %v5764_v63, %v5763_v59  ;;  %v5787_v30 = vadd.f32 %v5786_v29, %v5785_v28  ;;  %v5766_v38 = vpop.f32.mrb[42].mxu1  ;;  %v5788_v31 = vpop.f32.mrb[38].mxu0 }
 0xd63   : > { %v5767_v61 = vpop.f32.mrb[43].mxu1  ;;  %v5789_v13 = vpop.f32.mrb[39].mxu0 }
 0xd64   : > { %v4753_v32 = vadd.f32 %v5765_v60, %v4712_v58  ;;  %v5768_v33 = vadd.f32 %v5767_v61, %v5766_v38  ;;  %v5790_v49 = vadd.f32 %v5789_v13, %v5788_v31 }
 0xd66   : > { %v4794_v34 = vadd.f32 %v5787_v30, %v4753_v32  ;;  %v4756_v35 = vadd.f32 %v5768_v33, %v4715_v27 }
 0xd68   : > { %v4797_v36 = vadd.f32 %v5790_v49, %v4756_v35 }
 0xd80   : > { %v5807_v37 = vpop.f32.mrb[44].mxu1  ;;  %v5829_v40 = vpop.f32.mrb[40].mxu0 }
 0xd81   : > { %v5808_v15 = vpop.f32.mrb[45].mxu1  ;;  %v5830_v42 = vpop.f32.mrb[41].mxu0 }
 0xd82   : > { %v5809_v43 = vadd.f32 %v5808_v15, %v5807_v37  ;;  %v5831_v16 = vadd.f32 %v5830_v42, %v5829_v40  ;;  %v5810_v44 = vpop.f32.mrb[46].mxu1  ;;  %v5832_v45 = vpop.f32.mrb[42].mxu0 }
 0xd83   : > { %v5811_v46 = vpop.f32.mrb[47].mxu1  ;;  %v5833_v47 = vpop.f32.mrb[43].mxu0 }
 0xd84   : > { %v4835_v50 = vadd.f32 %v5809_v43, %v4794_v34  ;;  %v5812_v52 = vadd.f32 %v5811_v46, %v5810_v44  ;;  %v5834_v56 = vadd.f32 %v5833_v47, %v5832_v45 }
 0xd86   : > { %v4876_v10 = vadd.f32 %v5831_v16, %v4835_v50  ;;  %v4838_v55 = vadd.f32 %v5812_v52, %v4797_v36 }
 0xd88   : > { %v4879_v0 = vadd.f32 %v5834_v56, %v4838_v55  ;;  %v4882_v48 = vadd.f32 %v4876_v10, %v7845_v8 }
 0xd8a   : > { %4886 = vadd.xlane.f32.xlu0 %v4882_v48  ;;  %v4883_v53 = vadd.f32 %v4879_v0, %v7847_v9 }
 0xd8c   : > { %4888 = vadd.xlane.f32.xlu1 %v4883_v53 }
 0xe17   : > { %v4887_v2 = vpop.xlane.xlu0 %4886 }
 0xe18   : > { %v4890_v4 = vmul.f32 0.0078125, %v4887_v2 }
 0xe19   : > { %v4889_v5 = vpop.xlane.xlu1 %4888 }
 0xe1a   : > { %v4892_v1 = vsub.f32 %v4882_v48, %v4890_v4  ;;  %v4891_v3 = vmul.f32 0.0078125, %v4889_v5 }
 0xe1c   : > { %v4893_v6 = vsub.f32 %v4883_v53, %v4891_v3  ;;  %v4894_v7 = vmul.f32 %v4892_v1, %v4892_v1 }
 0xe1e   : > { %4896 = vadd.xlane.f32.xlu0 %v4894_v7  ;;  %v4895_v12 = vmul.f32 %v4893_v6, %v4893_v6 }
 0xe20   : > { %4898 = vadd.xlane.f32.xlu1 %v4895_v12 }
 0xeab   : > { %v4897_v51 = vpop.xlane.xlu0 %4896 }
 0xeac   : > { %v4900_v14 = vmul.f32 0.0078125, %v4897_v51 }
 0xead   : > { %v4899_v17 = vpop.xlane.xlu1 %4898 }
 0xeae   : > { %v4902_v8 = vadd.f32 1e-05, %v4900_v14  ;;  %v4901_v20 = vmul.f32 0.0078125, %v4899_v17 }
 0xeb0   : > { %6372 = vrsqrt.f32 %v4902_v8  ;;  %v4903_v9 = vadd.f32 1e-05, %v4901_v20 }
 0xeb2   : > { %6374 = vrsqrt.f32 %v4903_v9 }
 0xeba   : > { %v6373_v21 = vpop.eup %6372 }
 0xebb   : > { %v4906_v23 = vmul.f32 %v6373_v21, %v4892_v1 }
 0xebc   : > { %v6375_v11 = vpop.eup %6374 }
 0xebd   : > { %v4914_v54 = vmul.f32 %v5595_v22, %v4906_v23  ;;  %v4907_v39 = vmul.f32 %v6375_v11, %v4893_v6  ;;  %4929 = sbr.rel (%p5597_p8) target bundleno = 3780 (0xec4), region = 156 }
 0xebf   : > { %v4922_v18 = vadd.f32 %v5596_v62, %v4914_v54  ;;  %v4915_v24 = vmul.f32 %v5595_v22, %v4907_v39 }
 0xec1   : > { %4924 = vst [vmem:[#allocation2] sm:$0xff] %v4922_v18  ;;  %v4923_v57 = vadd.f32 %v5596_v62, %v4915_v24  ;;  %4930 = vst [vmem:[#allocation23] sm:$0xff] (!%p5597_p8), %v4922_v18 }
 0xec3   : > { %4925 = vst [vmem:[#allocation2 + $0x8] sm:$0xff] %v4923_v57  ;;  %4931 = vst [vmem:[#allocation23 + $0x8] sm:$0xff] (!%p5597_p8), %v4923_v57 }
 0xec4 PF: > { %s8307_s14 = sld [smem:[#allocation31_spill]]  ;;  %s6957_s16 = smov [#allocation23]  }
 0xec5   : > { %s4938_s15 = sshll.u32 %s6957_s16, 4  ;;  %s4939_s15 = int_to_ptr.vmem [resolvable:$true] %s4938_s15 }
 0xec6   : > { %s6850_s24 = scalar_lea.vmem %s4939_s15, 256  ;;  %p6857_p2 = scmp.lt.s32.totalorder %s4939_s15, %s4939_s15 }
 0xec7   : > { %p6851_p1 = scmp.ne.s32.totalorder %s4939_s15, %s6850_s24  ;;  %p6858_p0 = scmp.lt.s32.totalorder %s6850_s24, %s6850_s24 }
 0xec9   : > { %p6859_p13 = por %p6858_p0, %p6857_p2 }
 0xeca   : > { %p6099_p9 = scmp.eq.s32.totalorder %s8307_s14, 3 }
 0xecc   : > { %p6852_p5 = pnand %p6851_p1, %p6099_p9 }
 0xece   : > { %p6853_p7 = pneg %p6852_p5 }
 0xed0   : > { %p6860_p12 = pnand %p6859_p13, %p6853_p7 }
 0xed2   : > { %6863 = shalt.err (!%p6860_p12)
}
 0xed3   : > { %s8308_s21 = sld [smem:[#allocation45_spill]] }
 0xed9   : > { %s8309_s17 = smov %s8308_s21  ;;  %s6864_s4 = scalar_lea.hbm %s8308_s21, 256 }
 0xeda   : > { %p6865_p6 = scmp.ne.s32.totalorder %s8309_s17, %s6864_s4  ;;  %p6870_p4 = scmp.lt.u32.totalorder %s6864_s4, %s8309_s17 }
 0xedc   : > { %p6866_p11 = pnand %p6865_p6, %p6099_p9 }
 0xede   : > { %p6867_p10 = pneg %p6866_p11 }
 0xee0   : > { %p6872_p3 = pnand %p6870_p4, %p6867_p10 }
 0xee2   : > { %6875 = shalt.err (!%p6872_p3)
}
 0xee3   : > { %s6958_s26 = smov 128   ;;  %s6959_s23 = smov 8  }
 0xee4   : > { %6037 = dma.vmem_to_hbm [thread:$0]  (%p6099_p9), %s4939_s15, 256, %s8309_s17, [#allocation5], %s6958_s26, %s6958_s26, %s6959_s23  }
 0xee5   : > { %6909 = dma.done.wait (%p6099_p9), [#allocation5], 256  }
 0xee6   : > { %6911 = vsyncadd (%p6099_p9), [#allocation5], 4294967040 }
 0xee7 PF: > { %s8310_s24 = sld [smem:[#allocation32_spill]]  ;;  %s8311_s21 = sld [smem:[#allocation29_spill]] }
 0xee8   : > { %s8312_s22 = sld [smem:[#allocation30_spill]]  ;;  %s8313_s23 = sld [smem:[#allocation33_spill]] }
 0xeed   : > { %p27_p8 = scmp.ge.s32.totalorder %s8310_s24, 6  }
 0xeef   :  { %29 = sbr.rel (!%p27_p8) target bundleno = 15 (0xf), region = 265 }
 0xef6   :  { %4954 = vsyncpa [#allocation4], 1 }
 0xef7   :  { %4956 = vsyncpa [#allocation4 + $0x1], 1 }
 0xef8   :  { %4957 = vsyncpa [#allocation7], 1 }
 0xef9   :  { %4958 = vsyncpa [#allocation10], 1 }
 0xefa   :  { %4959 = vsyncpa [#allocation5], 1 }
 0xefb   :  { %4961 = vsyncpa [#allocation5 + $0x1], 1 }

</bundles_post_ra>
